<compile_context>
chip_gen: v7x
topology: tpu7x:2x2x1
jax: 0.10.0
libtpu: 0.0.40
codegen_flags: <defaults>
</compile_context>

<pallas_src>
import jax
import jax.numpy as jnp
from jax import lax
from jax.experimental import pallas as pl
from jax.experimental.pallas import tpu as pltpu  # noqa: F401  (TPU backend)

# ---------------- "config" (deterministic, small) ----------------
DIM_WORD = 32                    # config.dim_word
LSTM_HIDDEN = 16                 # config.lstm_hidden
W_DIM = 2 * LSTM_HIDDEN          # == DIM_WORD (required by the PyTorch model wiring)
VOCAB = 50
INIT_RANGE = 0.02                # config.initializer_range
B = 2                            # documents per batch
MAX_CONTENT_LEN = 8              # S : sentences per document
MAX_SENT_LEN = 8                 # T : words per sentence


# ======================= Fused forward kernel =======================

def _forward_kernel(xw_ref, cmask_ref, smask_ref, lbl_ref, pmask_ref,
                    w1x_ref, b1_ref, w1h_ref,
                    w2x_ref, b2_ref, w2h_ref,
                    prevu_ref, later_ref,
                    loss_ref, adj_ref):
    H = LSTM_HIDDEN
    T = MAX_SENT_LEN
    S = MAX_CONTENT_LEN
    Bn = B
    N = Bn * S
    f32 = jnp.float32

    def cell(g, c_cat):
        # g: [rows, 8H] joint pre-activation [i_f f_f g_f o_f | i_b f_b g_b o_b]
        # c_cat: [rows, 2H] = [c_f | c_b]
        i = jax.nn.sigmoid(jnp.concatenate([g[:, 0:H],         g[:, 4 * H:5 * H]], axis=1))
        f = jax.nn.sigmoid(jnp.concatenate([g[:, H:2 * H],     g[:, 5 * H:6 * H]], axis=1))
        gc = jnp.tanh(     jnp.concatenate([g[:, 2 * H:3 * H], g[:, 6 * H:7 * H]], axis=1))
        o = jax.nn.sigmoid(jnp.concatenate([g[:, 3 * H:4 * H], g[:, 7 * H:8 * H]], axis=1))
        c_new = f * c_cat + i * gc
        h_new = o * jnp.tanh(c_new)          # [rows, 2H] = [h_f | h_b]
        return h_new, c_new

    # ---------------- sentence BiLSTM ----------------
    # Fused fwd+bwd input projection: one [T*N, E] @ [E, 8H] MXU pass (128x128 out).
    gx1 = jnp.dot(xw_ref[...], w1x_ref[...], preferred_element_type=f32) + b1_ref[...]
    w1h = w1h_ref[...]                       # [2H, 8H] block-diagonal hidden weights
    cmask = cmask_ref[...]                   # [N, T]

    h1 = jnp.zeros((N, 2 * H), f32)
    c1 = jnp.zeros((N, 2 * H), f32)
    hf1 = [None] * T
    hb1 = [None] * T
    for u in range(T):                       # fully unrolled (T = 8)
        ub = T - 1 - u
        # fwd gates use word u, bwd gates use word T-1-u (time-major row blocks)
        gxu = jnp.concatenate([gx1[u * N:(u + 1) * N, 0:4 * H],
                               gx1[ub * N:(ub + 1) * N, 4 * H:8 * H]], axis=1)   # [N, 8H]
        g = gxu + jnp.dot(h1, w1h, preferred_element_type=f32)
        h1, c1 = cell(g, c1)
        hf1[u] = h1[:, 0:H]
        hb1[ub] = h1[:, H:2 * H]

    # masked max-pool over words (PyTorch semantics: max over output*mask)
    sent_vec = jnp.concatenate([hf1[0], hb1[0]], axis=1) * cmask[:, 0:1]
    for t in range(1, T):
        out_t = jnp.concatenate([hf1[t], hb1[t]], axis=1) * cmask[:, t:t + 1]
        sent_vec = jnp.maximum(sent_vec, out_t)                                   # [N, 2H]

    # ---------------- graph BiLSTM ----------------
    gx2 = jnp.dot(sent_vec, w2x_ref[...], preferred_element_type=f32) + b2_ref[...]  # [N, 8H]
    w2h = w2h_ref[...]
    smask = smask_ref[...]                   # [B, S]

    h2 = jnp.zeros((Bn, 2 * H), f32)
    c2 = jnp.zeros((Bn, 2 * H), f32)
    hf2 = [None] * S
    hb2 = [None] * S
    for s in range(S):                       # fully unrolled (S = 8)
        sb = S - 1 - s
        g_f = jnp.concatenate([gx2[b * S + s:b * S + s + 1, 0:4 * H]
                               for b in range(Bn)], axis=0)                       # [B, 4H]
        g_b = jnp.concatenate([gx2[b * S + sb:b * S + sb + 1, 4 * H:8 * H]
                               for b in range(Bn)], axis=0)                       # [B, 4H]
        g = jnp.concatenate([g_f, g_b], axis=1) + jnp.dot(h2, w2h,
                                                          preferred_element_type=f32)
        h2, c2 = cell(g, c2)
        hf2[s] = h2[:, 0:H]
        hb2[sb] = h2[:, H:2 * H]

    # sequence-masked graph output per sentence position
    gouts = [jnp.concatenate([hf2[s], hb2[s]], axis=1) * smask[:, s:s + 1]
             for s in range(S)]              # each [B, 2H]

    # doc-major feature matrix [B*S, 2H] (row = b*S + s)
    x_flat = jnp.concatenate([gouts[s][b:b + 1, :]
                              for b in range(Bn) for s in range(S)], axis=0)

    # ---------------- adjacency + clamped BCE ----------------
    # prevU = prev @ U is pre-fused in the wrapper (associativity).
    t_mat = jnp.dot(x_flat, prevu_ref[...], preferred_element_type=f32)           # [B*S, 2H]
    l_mat = jnp.dot(x_flat, later_ref[...], preferred_element_type=f32)           # [B*S, 2H]
    # single t @ xl^T product; per-doc adjacency = diagonal blocks
    logits = lax.dot_general(t_mat, l_mat, (((1,), (1,)), ((), ())),
                             preferred_element_type=f32)                          # [B*S, B*S]

    total = jnp.zeros((1, 1), f32)
    for b in range(Bn):                      # static, B = 2
        a = logits[b * S:(b + 1) * S, b * S:(b + 1) * S]                           # [S, S]
        adj_ref[b] = jax.nn.sigmoid(a)
        lbl = lbl_ref[b]
        pm = pmask_ref[b]
        # Clamped BCE from logits (shared softplus):
        #   log(sigmoid(a))   = min(a, 0)  - log(1 + exp(-|a|))
        #   log(1-sigmoid(a)) = min(-a, 0) - log(1 + exp(-|a|))
        sp = jnp.log(1.0 + jnp.exp(-jnp.abs(a)))
        log_p = jnp.maximum(jnp.minimum(a, 0.0) - sp, -100.0)     # torch BCELoss clamp
        log_1mp = jnp.maximum(jnp.minimum(-a, 0.0) - sp, -100.0)
        bce = -(lbl * log_p + (1.0 - lbl) * log_1mp)
        num = jnp.sum(bce * pm, keepdims=True)                                    # (1,1)
        den = jnp.maximum(jnp.sum(pm, keepdims=True), 1.0)
        total = total + num / den
    loss_ref[...] = total / Bn


# ======================= Parameters & packing =======================

def init_params(key):
    std = INIT_RANGE
    keys = jax.random.split(key, 8)

    def nrm(k, shape):
        return std * jax.random.normal(k, shape, jnp.float32)

    def lstm_params(k, input_dim):
        ks = jax.random.split(k, 4)
        z = jnp.zeros((4 * LSTM_HIDDEN,), jnp.float32)
        return dict(
            w_ih_f=nrm(ks[0], (4 * LSTM_HIDDEN, input_dim)),
            w_hh_f=nrm(ks[1], (4 * LSTM_HIDDEN, LSTM_HIDDEN)),
            b_ih_f=z, b_hh_f=z,
            w_ih_b=nrm(ks[2], (4 * LSTM_HIDDEN, input_dim)),
            w_hh_b=nrm(ks[3], (4 * LSTM_HIDDEN, LSTM_HIDDEN)),
            b_ih_b=z, b_hh_b=z,
        )

    return dict(
        emb=nrm(keys[0], (VOCAB, DIM_WORD)).at[0].set(0.0),   # padding_idx=0
        lstm_sent=lstm_params(keys[1], DIM_WORD),
        lstm_graph=lstm_params(keys[2], DIM_WORD),            # input dim == W_DIM
        U=nrm(keys[3], (W_DIM, W_DIM)),
        prev=nrm(keys[4], (W_DIM, W_DIM)),
        later=nrm(keys[5], (W_DIM, W_DIM)),
    )


def _pack_lstm(p):
    """Pack one BiLSTM into fused kernel operands (done once, outside the step)."""
    H = LSTM_HIDDEN
    w_ih_cat = jnp.concatenate([p['w_ih_f'].T, p['w_ih_b'].T], axis=1)            # [in, 8H]
    b_cat = jnp.concatenate([p['b_ih_f'] + p['b_hh_f'],
                             p['b_ih_b'] + p['b_hh_b']]).reshape(1, 8 * H)        # [1, 8H]
    # block-diagonal hidden weights: [h_f | h_b] @ blk = [h_f@Whh_f^T | h_b@Whh_b^T]
    w_hh_blk = jnp.zeros((2 * H, 8 * H), jnp.float32)
    w_hh_blk = w_hh_blk.at[0:H, 0:4 * H].set(p['w_hh_f'].T)
    w_hh_blk = w_hh_blk.at[H:2 * H, 4 * H:8 * H].set(p['w_hh_b'].T)
    return w_ih_cat, b_cat, w_hh_blk


def pack_fused_params(params):
    w1x, b1, w1h = _pack_lstm(params['lstm_sent'])
    w2x, b2, w2h = _pack_lstm(params['lstm_graph'])
    prevU = params['prev'] @ params['U']          # fold prev@U once (associativity)
    return dict(emb=params['emb'], w1x=w1x, b1=b1, w1h=w1h,
                w2x=w2x, b2=b2, w2h=w2h, prevU=prevU, later=params['later'])


# ======================= Forward pass =======================

def forward(fused, contents, contents_mask, seq_masks, labels, content_length):
    N = B * MAX_CONTENT_LEN
    T = MAX_SENT_LEN
    S = MAX_CONTENT_LEN

    # embedding lookup (padding row 0 is zero), then time-major flatten so the
    # kernel's single input-projection matmul sees word t of every sentence as a
    # contiguous row block.
    emb = jnp.take(fused['emb'], contents, axis=0)                 # [N, T, E]
    emb_tm = jnp.transpose(emb, (1, 0, 2)).reshape(T * N, DIM_WORD)

    valid = (jnp.arange(S)[None, :] < content_length[:, None]).astype(jnp.float32)   # [B, S]
    pairmask = valid[:, :, None] * valid[:, None, :]                                  # [B, S, S]

    loss, adj = pl.pallas_call(
        _forward_kernel,
        out_shape=(jax.ShapeDtypeStruct((1, 1), jnp.float32),
                   jax.ShapeDtypeStruct((B, S, S), jnp.float32)),
    )(emb_tm,
      contents_mask.astype(jnp.float32),
      seq_masks.astype(jnp.float32),
      labels.astype(jnp.float32),
      pairmask,
      fused['w1x'], fused['b1'], fused['w1h'],
      fused['w2x'], fused['b2'], fused['w2h'],
      fused['prevU'], fused['later'])
    # rl_lambda*0 and gcl_lambda*0 omitted (no-ops for config.rl=config.gcl=0)
    return loss[0, 0], adj


# ======================= Main =======================

if __name__ == "__main__":
    key = jax.random.PRNGKey(0)
    pkey, dkey = jax.random.split(key)
    params = init_params(pkey)
    fused = pack_fused_params(params)     # one-time weight packing, outside jitted step

    k1, k2, k3 = jax.random.split(dkey, 3)
    N = B * MAX_CONTENT_LEN
    contents = jax.random.randint(k1, (N, MAX_SENT_LEN), 1, VOCAB, dtype=jnp.int32)
    word_lens = jax.random.randint(k2, (N,), 3, MAX_SENT_LEN + 1)
    contents_mask = (jnp.arange(MAX_SENT_LEN)[None, :] < word_lens[:, None]).astype(jnp.float32)
    contents = jnp.where(contents_mask > 0, contents, 0)           # padding token 0

    content_length = jnp.array([MAX_CONTENT_LEN, 6], dtype=jnp.int32)   # sentences per doc
    seq_masks = (jnp.arange(MAX_CONTENT_LEN)[None, :] < content_length[:, None]).astype(jnp.float32)
    labels = jax.random.bernoulli(k3, 0.3, (B, MAX_CONTENT_LEN, MAX_CONTENT_LEN)).astype(jnp.float32)

    loss, adj = jax.jit(forward)(fused, contents, contents_mask, seq_masks, labels, content_length)
    jax.block_until_ready((loss, adj))
    print("KERNEL_OK")
</pallas_src>

<mosaic_0001>
module attributes {stable_mosaic.version = 11 : i64} {
  func.func @_forward_kernel(%arg0: memref<128x32xf32, #tpu.memory_space<vmem>>, %arg1: memref<16x8xf32, #tpu.memory_space<vmem>>, %arg2: memref<2x8xf32, #tpu.memory_space<vmem>>, %arg3: memref<2x8x8xf32, #tpu.memory_space<vmem>>, %arg4: memref<2x8x8xf32, #tpu.memory_space<vmem>>, %arg5: memref<32x128xf32, #tpu.memory_space<vmem>>, %arg6: memref<1x128xf32, #tpu.memory_space<vmem>>, %arg7: memref<32x128xf32, #tpu.memory_space<vmem>>, %arg8: memref<32x128xf32, #tpu.memory_space<vmem>>, %arg9: memref<1x128xf32, #tpu.memory_space<vmem>>, %arg10: memref<32x128xf32, #tpu.memory_space<vmem>>, %arg11: memref<32x32xf32, #tpu.memory_space<vmem>>, %arg12: memref<32x32xf32, #tpu.memory_space<vmem>>, %arg13: memref<1x1xf32, #tpu.memory_space<vmem>>, %arg14: memref<2x8x8xf32, #tpu.memory_space<vmem>>) attributes {dimension_semantics = [], scalar_prefetch = 0 : i64, scratch_operands = 0 : i64, tpu.core_type = #tpu.core_type<tc>} {
    %c0 = arith.constant 0 : index
    %c0_0 = arith.constant 0 : index
    %0 = vector.load %arg0[%c0, %c0_0] : memref<128x32xf32, #tpu.memory_space<vmem>>, vector<128x32xf32>
    %c0_1 = arith.constant 0 : index
    %c0_2 = arith.constant 0 : index
    %1 = vector.load %arg5[%c0_1, %c0_2] : memref<32x128xf32, #tpu.memory_space<vmem>>, vector<32x128xf32>
    %cst = arith.constant dense<0.000000e+00> : vector<128x128xf32>
    %2 = tpu.matmul %0, %1, %cst {dimension_numbers = #tpu.dot_dimension_numbers<[1], [0], [0], [1], [0, 0, 1, 1], [], []>} : vector<128x32xf32>, vector<32x128xf32>, vector<128x128xf32> -> vector<128x128xf32>
    %c0_3 = arith.constant 0 : index
    %c0_4 = arith.constant 0 : index
    %3 = vector.load %arg6[%c0_3, %c0_4] : memref<1x128xf32, #tpu.memory_space<vmem>>, vector<1x128xf32>
    %4 = vector.broadcast %3 : vector<1x128xf32> to vector<128x128xf32>
    %5 = arith.addf %2, %4 : vector<128x128xf32>
    %c0_5 = arith.constant 0 : index
    %c0_6 = arith.constant 0 : index
    %6 = vector.load %arg7[%c0_5, %c0_6] : memref<32x128xf32, #tpu.memory_space<vmem>>, vector<32x128xf32>
    %c0_7 = arith.constant 0 : index
    %c0_8 = arith.constant 0 : index
    %7 = vector.load %arg1[%c0_7, %c0_8] : memref<16x8xf32, #tpu.memory_space<vmem>>, vector<16x8xf32>
    %cst_9 = arith.constant 0.000000e+00 : f32
    %8 = vector.broadcast %cst_9 : f32 to vector<16x32xf32>
    %cst_10 = arith.constant 0.000000e+00 : f32
    %9 = vector.broadcast %cst_10 : f32 to vector<16x32xf32>
    %10 = vector.extract_strided_slice %5 {offsets = [0, 0], sizes = [16, 64], strides = [1, 1]} : vector<128x128xf32> to vector<16x64xf32>
    %11 = vector.extract_strided_slice %5 {offsets = [112, 64], sizes = [16, 64], strides = [1, 1]} : vector<128x128xf32> to vector<16x64xf32>
    %12 = tpu.concatenate %10, %11 in 1 : vector<16x64xf32>, vector<16x64xf32> -> vector<16x128xf32>
    %cst_11 = arith.constant dense<0.000000e+00> : vector<16x128xf32>
    %13 = tpu.matmul %8, %6, %cst_11 {dimension_numbers = #tpu.dot_dimension_numbers<[1], [0], [0], [1], [0, 0, 1, 1], [], []>} : vector<16x32xf32>, vector<32x128xf32>, vector<16x128xf32> -> vector<16x128xf32>
    %14 = arith.addf %12, %13 : vector<16x128xf32>
    %15 = vector.extract_strided_slice %14 {offsets = [0, 0], sizes = [16, 16], strides = [1, 1]} : vector<16x128xf32> to vector<16x16xf32>
    %16 = vector.extract_strided_slice %14 {offsets = [0, 64], sizes = [16, 16], strides = [1, 1]} : vector<16x128xf32> to vector<16x16xf32>
    %17 = tpu.concatenate %15, %16 in 1 : vector<16x16xf32>, vector<16x16xf32> -> vector<16x32xf32>
    %18 = arith.negf %17 : vector<16x32xf32>
    %19 = math.exp %18 : vector<16x32xf32>
    %cst_12 = arith.constant 1.000000e+00 : f32
    %20 = vector.broadcast %cst_12 : f32 to vector<16x32xf32>
    %21 = arith.addf %20, %19 : vector<16x32xf32>
    %22 = arith.divf %20, %21 : vector<16x32xf32>
    %23 = vector.extract_strided_slice %14 {offsets = [0, 16], sizes = [16, 16], strides = [1, 1]} : vector<16x128xf32> to vector<16x16xf32>
    %24 = vector.extract_strided_slice %14 {offsets = [0, 80], sizes = [16, 16], strides = [1, 1]} : vector<16x128xf32> to vector<16x16xf32>
    %25 = tpu.concatenate %23, %24 in 1 : vector<16x16xf32>, vector<16x16xf32> -> vector<16x32xf32>
    %26 = arith.negf %25 : vector<16x32xf32>
    %27 = math.exp %26 : vector<16x32xf32>
    %cst_13 = arith.constant 1.000000e+00 : f32
    %28 = vector.broadcast %cst_13 : f32 to vector<16x32xf32>
    %29 = arith.addf %28, %27 : vector<16x32xf32>
    %30 = arith.divf %28, %29 : vector<16x32xf32>
    %31 = vector.extract_strided_slice %14 {offsets = [0, 32], sizes = [16, 16], strides = [1, 1]} : vector<16x128xf32> to vector<16x16xf32>
    %32 = vector.extract_strided_slice %14 {offsets = [0, 96], sizes = [16, 16], strides = [1, 1]} : vector<16x128xf32> to vector<16x16xf32>
    %33 = tpu.concatenate %31, %32 in 1 : vector<16x16xf32>, vector<16x16xf32> -> vector<16x32xf32>
    %34 = math.tanh %33 : vector<16x32xf32>
    %35 = vector.extract_strided_slice %14 {offsets = [0, 48], sizes = [16, 16], strides = [1, 1]} : vector<16x128xf32> to vector<16x16xf32>
    %36 = vector.extract_strided_slice %14 {offsets = [0, 112], sizes = [16, 16], strides = [1, 1]} : vector<16x128xf32> to vector<16x16xf32>
    %37 = tpu.concatenate %35, %36 in 1 : vector<16x16xf32>, vector<16x16xf32> -> vector<16x32xf32>
    %38 = arith.negf %37 : vector<16x32xf32>
    %39 = math.exp %38 : vector<16x32xf32>
    %cst_14 = arith.constant 1.000000e+00 : f32
    %40 = vector.broadcast %cst_14 : f32 to vector<16x32xf32>
    %41 = arith.addf %40, %39 : vector<16x32xf32>
    %42 = arith.divf %40, %41 : vector<16x32xf32>
    %43 = arith.mulf %30, %9 : vector<16x32xf32>
    %44 = arith.mulf %22, %34 : vector<16x32xf32>
    %45 = arith.addf %43, %44 : vector<16x32xf32>
    %46 = math.tanh %45 : vector<16x32xf32>
    %47 = arith.mulf %42, %46 : vector<16x32xf32>
    %48 = vector.extract_strided_slice %47 {offsets = [0, 0], sizes = [16, 16], strides = [1, 1]} : vector<16x32xf32> to vector<16x16xf32>
    %49 = vector.extract_strided_slice %47 {offsets = [0, 16], sizes = [16, 16], strides = [1, 1]} : vector<16x32xf32> to vector<16x16xf32>
    %50 = vector.extract_strided_slice %5 {offsets = [16, 0], sizes = [16, 64], strides = [1, 1]} : vector<128x128xf32> to vector<16x64xf32>
    %51 = vector.extract_strided_slice %5 {offsets = [96, 64], sizes = [16, 64], strides = [1, 1]} : vector<128x128xf32> to vector<16x64xf32>
    %52 = tpu.concatenate %50, %51 in 1 : vector<16x64xf32>, vector<16x64xf32> -> vector<16x128xf32>
    %cst_15 = arith.constant dense<0.000000e+00> : vector<16x128xf32>
    %53 = tpu.matmul %47, %6, %cst_15 {dimension_numbers = #tpu.dot_dimension_numbers<[1], [0], [0], [1], [0, 0, 1, 1], [], []>} : vector<16x32xf32>, vector<32x128xf32>, vector<16x128xf32> -> vector<16x128xf32>
    %54 = arith.addf %52, %53 : vector<16x128xf32>
    %55 = vector.extract_strided_slice %54 {offsets = [0, 0], sizes = [16, 16], strides = [1, 1]} : vector<16x128xf32> to vector<16x16xf32>
    %56 = vector.extract_strided_slice %54 {offsets = [0, 64], sizes = [16, 16], strides = [1, 1]} : vector<16x128xf32> to vector<16x16xf32>
    %57 = tpu.concatenate %55, %56 in 1 : vector<16x16xf32>, vector<16x16xf32> -> vector<16x32xf32>
    %58 = arith.negf %57 : vector<16x32xf32>
    %59 = math.exp %58 : vector<16x32xf32>
    %cst_16 = arith.constant 1.000000e+00 : f32
    %60 = vector.broadcast %cst_16 : f32 to vector<16x32xf32>
    %61 = arith.addf %60, %59 : vector<16x32xf32>
    %62 = arith.divf %60, %61 : vector<16x32xf32>
    %63 = vector.extract_strided_slice %54 {offsets = [0, 16], sizes = [16, 16], strides = [1, 1]} : vector<16x128xf32> to vector<16x16xf32>
    %64 = vector.extract_strided_slice %54 {offsets = [0, 80], sizes = [16, 16], strides = [1, 1]} : vector<16x128xf32> to vector<16x16xf32>
    %65 = tpu.concatenate %63, %64 in 1 : vector<16x16xf32>, vector<16x16xf32> -> vector<16x32xf32>
    %66 = arith.negf %65 : vector<16x32xf32>
    %67 = math.exp %66 : vector<16x32xf32>
    %cst_17 = arith.constant 1.000000e+00 : f32
    %68 = vector.broadcast %cst_17 : f32 to vector<16x32xf32>
    %69 = arith.addf %68, %67 : vector<16x32xf32>
    %70 = arith.divf %68, %69 : vector<16x32xf32>
    %71 = vector.extract_strided_slice %54 {offsets = [0, 32], sizes = [16, 16], strides = [1, 1]} : vector<16x128xf32> to vector<16x16xf32>
    %72 = vector.extract_strided_slice %54 {offsets = [0, 96], sizes = [16, 16], strides = [1, 1]} : vector<16x128xf32> to vector<16x16xf32>
    %73 = tpu.concatenate %71, %72 in 1 : vector<16x16xf32>, vector<16x16xf32> -> vector<16x32xf32>
    %74 = math.tanh %73 : vector<16x32xf32>
    %75 = vector.extract_strided_slice %54 {offsets = [0, 48], sizes = [16, 16], strides = [1, 1]} : vector<16x128xf32> to vector<16x16xf32>
    %76 = vector.extract_strided_slice %54 {offsets = [0, 112], sizes = [16, 16], strides = [1, 1]} : vector<16x128xf32> to vector<16x16xf32>
    %77 = tpu.concatenate %75, %76 in 1 : vector<16x16xf32>, vector<16x16xf32> -> vector<16x32xf32>
    %78 = arith.negf %77 : vector<16x32xf32>
    %79 = math.exp %78 : vector<16x32xf32>
    %cst_18 = arith.constant 1.000000e+00 : f32
    %80 = vector.broadcast %cst_18 : f32 to vector<16x32xf32>
    %81 = arith.addf %80, %79 : vector<16x32xf32>
    %82 = arith.divf %80, %81 : vector<16x32xf32>
    %83 = arith.mulf %70, %45 : vector<16x32xf32>
    %84 = arith.mulf %62, %74 : vector<16x32xf32>
    %85 = arith.addf %83, %84 : vector<16x32xf32>
    %86 = math.tanh %85 : vector<16x32xf32>
    %87 = arith.mulf %82, %86 : vector<16x32xf32>
    %88 = vector.extract_strided_slice %87 {offsets = [0, 0], sizes = [16, 16], strides = [1, 1]} : vector<16x32xf32> to vector<16x16xf32>
    %89 = vector.extract_strided_slice %87 {offsets = [0, 16], sizes = [16, 16], strides = [1, 1]} : vector<16x32xf32> to vector<16x16xf32>
    %90 = vector.extract_strided_slice %5 {offsets = [32, 0], sizes = [16, 64], strides = [1, 1]} : vector<128x128xf32> to vector<16x64xf32>
    %91 = vector.extract_strided_slice %5 {offsets = [80, 64], sizes = [16, 64], strides = [1, 1]} : vector<128x128xf32> to vector<16x64xf32>
    %92 = tpu.concatenate %90, %91 in 1 : vector<16x64xf32>, vector<16x64xf32> -> vector<16x128xf32>
    %cst_19 = arith.constant dense<0.000000e+00> : vector<16x128xf32>
    %93 = tpu.matmul %87, %6, %cst_19 {dimension_numbers = #tpu.dot_dimension_numbers<[1], [0], [0], [1], [0, 0, 1, 1], [], []>} : vector<16x32xf32>, vector<32x128xf32>, vector<16x128xf32> -> vector<16x128xf32>
    %94 = arith.addf %92, %93 : vector<16x128xf32>
    %95 = vector.extract_strided_slice %94 {offsets = [0, 0], sizes = [16, 16], strides = [1, 1]} : vector<16x128xf32> to vector<16x16xf32>
    %96 = vector.extract_strided_slice %94 {offsets = [0, 64], sizes = [16, 16], strides = [1, 1]} : vector<16x128xf32> to vector<16x16xf32>
    %97 = tpu.concatenate %95, %96 in 1 : vector<16x16xf32>, vector<16x16xf32> -> vector<16x32xf32>
    %98 = arith.negf %97 : vector<16x32xf32>
    %99 = math.exp %98 : vector<16x32xf32>
    %cst_20 = arith.constant 1.000000e+00 : f32
    %100 = vector.broadcast %cst_20 : f32 to vector<16x32xf32>
    %101 = arith.addf %100, %99 : vector<16x32xf32>
    %102 = arith.divf %100, %101 : vector<16x32xf32>
    %103 = vector.extract_strided_slice %94 {offsets = [0, 16], sizes = [16, 16], strides = [1, 1]} : vector<16x128xf32> to vector<16x16xf32>
    %104 = vector.extract_strided_slice %94 {offsets = [0, 80], sizes = [16, 16], strides = [1, 1]} : vector<16x128xf32> to vector<16x16xf32>
    %105 = tpu.concatenate %103, %104 in 1 : vector<16x16xf32>, vector<16x16xf32> -> vector<16x32xf32>
    %106 = arith.negf %105 : vector<16x32xf32>
    %107 = math.exp %106 : vector<16x32xf32>
    %cst_21 = arith.constant 1.000000e+00 : f32
    %108 = vector.broadcast %cst_21 : f32 to vector<16x32xf32>
    %109 = arith.addf %108, %107 : vector<16x32xf32>
    %110 = arith.divf %108, %109 : vector<16x32xf32>
    %111 = vector.extract_strided_slice %94 {offsets = [0, 32], sizes = [16, 16], strides = [1, 1]} : vector<16x128xf32> to vector<16x16xf32>
    %112 = vector.extract_strided_slice %94 {offsets = [0, 96], sizes = [16, 16], strides = [1, 1]} : vector<16x128xf32> to vector<16x16xf32>
    %113 = tpu.concatenate %111, %112 in 1 : vector<16x16xf32>, vector<16x16xf32> -> vector<16x32xf32>
    %114 = math.tanh %113 : vector<16x32xf32>
    %115 = vector.extract_strided_slice %94 {offsets = [0, 48], sizes = [16, 16], strides = [1, 1]} : vector<16x128xf32> to vector<16x16xf32>
    %116 = vector.extract_strided_slice %94 {offsets = [0, 112], sizes = [16, 16], strides = [1, 1]} : vector<16x128xf32> to vector<16x16xf32>
    %117 = tpu.concatenate %115, %116 in 1 : vector<16x16xf32>, vector<16x16xf32> -> vector<16x32xf32>
    %118 = arith.negf %117 : vector<16x32xf32>
    %119 = math.exp %118 : vector<16x32xf32>
    %cst_22 = arith.constant 1.000000e+00 : f32
    %120 = vector.broadcast %cst_22 : f32 to vector<16x32xf32>
    %121 = arith.addf %120, %119 : vector<16x32xf32>
    %122 = arith.divf %120, %121 : vector<16x32xf32>
    %123 = arith.mulf %110, %85 : vector<16x32xf32>
    %124 = arith.mulf %102, %114 : vector<16x32xf32>
    %125 = arith.addf %123, %124 : vector<16x32xf32>
    %126 = math.tanh %125 : vector<16x32xf32>
    %127 = arith.mulf %122, %126 : vector<16x32xf32>
    %128 = vector.extract_strided_slice %127 {offsets = [0, 0], sizes = [16, 16], strides = [1, 1]} : vector<16x32xf32> to vector<16x16xf32>
    %129 = vector.extract_strided_slice %127 {offsets = [0, 16], sizes = [16, 16], strides = [1, 1]} : vector<16x32xf32> to vector<16x16xf32>
    %130 = vector.extract_strided_slice %5 {offsets = [48, 0], sizes = [16, 64], strides = [1, 1]} : vector<128x128xf32> to vector<16x64xf32>
    %131 = vector.extract_strided_slice %5 {offsets = [64, 64], sizes = [16, 64], strides = [1, 1]} : vector<128x128xf32> to vector<16x64xf32>
    %132 = tpu.concatenate %130, %131 in 1 : vector<16x64xf32>, vector<16x64xf32> -> vector<16x128xf32>
    %cst_23 = arith.constant dense<0.000000e+00> : vector<16x128xf32>
    %133 = tpu.matmul %127, %6, %cst_23 {dimension_numbers = #tpu.dot_dimension_numbers<[1], [0], [0], [1], [0, 0, 1, 1], [], []>} : vector<16x32xf32>, vector<32x128xf32>, vector<16x128xf32> -> vector<16x128xf32>
    %134 = arith.addf %132, %133 : vector<16x128xf32>
    %135 = vector.extract_strided_slice %134 {offsets = [0, 0], sizes = [16, 16], strides = [1, 1]} : vector<16x128xf32> to vector<16x16xf32>
    %136 = vector.extract_strided_slice %134 {offsets = [0, 64], sizes = [16, 16], strides = [1, 1]} : vector<16x128xf32> to vector<16x16xf32>
    %137 = tpu.concatenate %135, %136 in 1 : vector<16x16xf32>, vector<16x16xf32> -> vector<16x32xf32>
    %138 = arith.negf %137 : vector<16x32xf32>
    %139 = math.exp %138 : vector<16x32xf32>
    %cst_24 = arith.constant 1.000000e+00 : f32
    %140 = vector.broadcast %cst_24 : f32 to vector<16x32xf32>
    %141 = arith.addf %140, %139 : vector<16x32xf32>
    %142 = arith.divf %140, %141 : vector<16x32xf32>
    %143 = vector.extract_strided_slice %134 {offsets = [0, 16], sizes = [16, 16], strides = [1, 1]} : vector<16x128xf32> to vector<16x16xf32>
    %144 = vector.extract_strided_slice %134 {offsets = [0, 80], sizes = [16, 16], strides = [1, 1]} : vector<16x128xf32> to vector<16x16xf32>
    %145 = tpu.concatenate %143, %144 in 1 : vector<16x16xf32>, vector<16x16xf32> -> vector<16x32xf32>
    %146 = arith.negf %145 : vector<16x32xf32>
    %147 = math.exp %146 : vector<16x32xf32>
    %cst_25 = arith.constant 1.000000e+00 : f32
    %148 = vector.broadcast %cst_25 : f32 to vector<16x32xf32>
    %149 = arith.addf %148, %147 : vector<16x32xf32>
    %150 = arith.divf %148, %149 : vector<16x32xf32>
    %151 = vector.extract_strided_slice %134 {offsets = [0, 32], sizes = [16, 16], strides = [1, 1]} : vector<16x128xf32> to vector<16x16xf32>
    %152 = vector.extract_strided_slice %134 {offsets = [0, 96], sizes = [16, 16], strides = [1, 1]} : vector<16x128xf32> to vector<16x16xf32>
    %153 = tpu.concatenate %151, %152 in 1 : vector<16x16xf32>, vector<16x16xf32> -> vector<16x32xf32>
    %154 = math.tanh %153 : vector<16x32xf32>
    %155 = vector.extract_strided_slice %134 {offsets = [0, 48], sizes = [16, 16], strides = [1, 1]} : vector<16x128xf32> to vector<16x16xf32>
    %156 = vector.extract_strided_slice %134 {offsets = [0, 112], sizes = [16, 16], strides = [1, 1]} : vector<16x128xf32> to vector<16x16xf32>
    %157 = tpu.concatenate %155, %156 in 1 : vector<16x16xf32>, vector<16x16xf32> -> vector<16x32xf32>
    %158 = arith.negf %157 : vector<16x32xf32>
    %159 = math.exp %158 : vector<16x32xf32>
    %cst_26 = arith.constant 1.000000e+00 : f32
    %160 = vector.broadcast %cst_26 : f32 to vector<16x32xf32>
    %161 = arith.addf %160, %159 : vector<16x32xf32>
    %162 = arith.divf %160, %161 : vector<16x32xf32>
    %163 = arith.mulf %150, %125 : vector<16x32xf32>
    %164 = arith.mulf %142, %154 : vector<16x32xf32>
    %165 = arith.addf %163, %164 : vector<16x32xf32>
    %166 = math.tanh %165 : vector<16x32xf32>
    %167 = arith.mulf %162, %166 : vector<16x32xf32>
    %168 = vector.extract_strided_slice %167 {offsets = [0, 0], sizes = [16, 16], strides = [1, 1]} : vector<16x32xf32> to vector<16x16xf32>
    %169 = vector.extract_strided_slice %167 {offsets = [0, 16], sizes = [16, 16], strides = [1, 1]} : vector<16x32xf32> to vector<16x16xf32>
    %170 = vector.extract_strided_slice %5 {offsets = [64, 0], sizes = [16, 64], strides = [1, 1]} : vector<128x128xf32> to vector<16x64xf32>
    %171 = vector.extract_strided_slice %5 {offsets = [48, 64], sizes = [16, 64], strides = [1, 1]} : vector<128x128xf32> to vector<16x64xf32>
    %172 = tpu.concatenate %170, %171 in 1 : vector<16x64xf32>, vector<16x64xf32> -> vector<16x128xf32>
    %cst_27 = arith.constant dense<0.000000e+00> : vector<16x128xf32>
    %173 = tpu.matmul %167, %6, %cst_27 {dimension_numbers = #tpu.dot_dimension_numbers<[1], [0], [0], [1], [0, 0, 1, 1], [], []>} : vector<16x32xf32>, vector<32x128xf32>, vector<16x128xf32> -> vector<16x128xf32>
    %174 = arith.addf %172, %173 : vector<16x128xf32>
    %175 = vector.extract_strided_slice %174 {offsets = [0, 0], sizes = [16, 16], strides = [1, 1]} : vector<16x128xf32> to vector<16x16xf32>
    %176 = vector.extract_strided_slice %174 {offsets = [0, 64], sizes = [16, 16], strides = [1, 1]} : vector<16x128xf32> to vector<16x16xf32>
    %177 = tpu.concatenate %175, %176 in 1 : vector<16x16xf32>, vector<16x16xf32> -> vector<16x32xf32>
    %178 = arith.negf %177 : vector<16x32xf32>
    %179 = math.exp %178 : vector<16x32xf32>
    %cst_28 = arith.constant 1.000000e+00 : f32
    %180 = vector.broadcast %cst_28 : f32 to vector<16x32xf32>
    %181 = arith.addf %180, %179 : vector<16x32xf32>
    %182 = arith.divf %180, %181 : vector<16x32xf32>
    %183 = vector.extract_strided_slice %174 {offsets = [0, 16], sizes = [16, 16], strides = [1, 1]} : vector<16x128xf32> to vector<16x16xf32>
    %184 = vector.extract_strided_slice %174 {offsets = [0, 80], sizes = [16, 16], strides = [1, 1]} : vector<16x128xf32> to vector<16x16xf32>
    %185 = tpu.concatenate %183, %184 in 1 : vector<16x16xf32>, vector<16x16xf32> -> vector<16x32xf32>
    %186 = arith.negf %185 : vector<16x32xf32>
    %187 = math.exp %186 : vector<16x32xf32>
    %cst_29 = arith.constant 1.000000e+00 : f32
    %188 = vector.broadcast %cst_29 : f32 to vector<16x32xf32>
    %189 = arith.addf %188, %187 : vector<16x32xf32>
    %190 = arith.divf %188, %189 : vector<16x32xf32>
    %191 = vector.extract_strided_slice %174 {offsets = [0, 32], sizes = [16, 16], strides = [1, 1]} : vector<16x128xf32> to vector<16x16xf32>
    %192 = vector.extract_strided_slice %174 {offsets = [0, 96], sizes = [16, 16], strides = [1, 1]} : vector<16x128xf32> to vector<16x16xf32>
    %193 = tpu.concatenate %191, %192 in 1 : vector<16x16xf32>, vector<16x16xf32> -> vector<16x32xf32>
    %194 = math.tanh %193 : vector<16x32xf32>
    %195 = vector.extract_strided_slice %174 {offsets = [0, 48], sizes = [16, 16], strides = [1, 1]} : vector<16x128xf32> to vector<16x16xf32>
    %196 = vector.extract_strided_slice %174 {offsets = [0, 112], sizes = [16, 16], strides = [1, 1]} : vector<16x128xf32> to vector<16x16xf32>
    %197 = tpu.concatenate %195, %196 in 1 : vector<16x16xf32>, vector<16x16xf32> -> vector<16x32xf32>
    %198 = arith.negf %197 : vector<16x32xf32>
    %199 = math.exp %198 : vector<16x32xf32>
    %cst_30 = arith.constant 1.000000e+00 : f32
    %200 = vector.broadcast %cst_30 : f32 to vector<16x32xf32>
    %201 = arith.addf %200, %199 : vector<16x32xf32>
    %202 = arith.divf %200, %201 : vector<16x32xf32>
    %203 = arith.mulf %190, %165 : vector<16x32xf32>
    %204 = arith.mulf %182, %194 : vector<16x32xf32>
    %205 = arith.addf %203, %204 : vector<16x32xf32>
    %206 = math.tanh %205 : vector<16x32xf32>
    %207 = arith.mulf %202, %206 : vector<16x32xf32>
    %208 = vector.extract_strided_slice %207 {offsets = [0, 0], sizes = [16, 16], strides = [1, 1]} : vector<16x32xf32> to vector<16x16xf32>
    %209 = vector.extract_strided_slice %207 {offsets = [0, 16], sizes = [16, 16], strides = [1, 1]} : vector<16x32xf32> to vector<16x16xf32>
    %210 = vector.extract_strided_slice %5 {offsets = [80, 0], sizes = [16, 64], strides = [1, 1]} : vector<128x128xf32> to vector<16x64xf32>
    %211 = vector.extract_strided_slice %5 {offsets = [32, 64], sizes = [16, 64], strides = [1, 1]} : vector<128x128xf32> to vector<16x64xf32>
    %212 = tpu.concatenate %210, %211 in 1 : vector<16x64xf32>, vector<16x64xf32> -> vector<16x128xf32>
    %cst_31 = arith.constant dense<0.000000e+00> : vector<16x128xf32>
    %213 = tpu.matmul %207, %6, %cst_31 {dimension_numbers = #tpu.dot_dimension_numbers<[1], [0], [0], [1], [0, 0, 1, 1], [], []>} : vector<16x32xf32>, vector<32x128xf32>, vector<16x128xf32> -> vector<16x128xf32>
    %214 = arith.addf %212, %213 : vector<16x128xf32>
    %215 = vector.extract_strided_slice %214 {offsets = [0, 0], sizes = [16, 16], strides = [1, 1]} : vector<16x128xf32> to vector<16x16xf32>
    %216 = vector.extract_strided_slice %214 {offsets = [0, 64], sizes = [16, 16], strides = [1, 1]} : vector<16x128xf32> to vector<16x16xf32>
    %217 = tpu.concatenate %215, %216 in 1 : vector<16x16xf32>, vector<16x16xf32> -> vector<16x32xf32>
    %218 = arith.negf %217 : vector<16x32xf32>
    %219 = math.exp %218 : vector<16x32xf32>
    %cst_32 = arith.constant 1.000000e+00 : f32
    %220 = vector.broadcast %cst_32 : f32 to vector<16x32xf32>
    %221 = arith.addf %220, %219 : vector<16x32xf32>
    %222 = arith.divf %220, %221 : vector<16x32xf32>
    %223 = vector.extract_strided_slice %214 {offsets = [0, 16], sizes = [16, 16], strides = [1, 1]} : vector<16x128xf32> to vector<16x16xf32>
    %224 = vector.extract_strided_slice %214 {offsets = [0, 80], sizes = [16, 16], strides = [1, 1]} : vector<16x128xf32> to vector<16x16xf32>
    %225 = tpu.concatenate %223, %224 in 1 : vector<16x16xf32>, vector<16x16xf32> -> vector<16x32xf32>
    %226 = arith.negf %225 : vector<16x32xf32>
    %227 = math.exp %226 : vector<16x32xf32>
    %cst_33 = arith.constant 1.000000e+00 : f32
    %228 = vector.broadcast %cst_33 : f32 to vector<16x32xf32>
    %229 = arith.addf %228, %227 : vector<16x32xf32>
    %230 = arith.divf %228, %229 : vector<16x32xf32>
    %231 = vector.extract_strided_slice %214 {offsets = [0, 32], sizes = [16, 16], strides = [1, 1]} : vector<16x128xf32> to vector<16x16xf32>
    %232 = vector.extract_strided_slice %214 {offsets = [0, 96], sizes = [16, 16], strides = [1, 1]} : vector<16x128xf32> to vector<16x16xf32>
    %233 = tpu.concatenate %231, %232 in 1 : vector<16x16xf32>, vector<16x16xf32> -> vector<16x32xf32>
    %234 = math.tanh %233 : vector<16x32xf32>
    %235 = vector.extract_strided_slice %214 {offsets = [0, 48], sizes = [16, 16], strides = [1, 1]} : vector<16x128xf32> to vector<16x16xf32>
    %236 = vector.extract_strided_slice %214 {offsets = [0, 112], sizes = [16, 16], strides = [1, 1]} : vector<16x128xf32> to vector<16x16xf32>
    %237 = tpu.concatenate %235, %236 in 1 : vector<16x16xf32>, vector<16x16xf32> -> vector<16x32xf32>
    %238 = arith.negf %237 : vector<16x32xf32>
    %239 = math.exp %238 : vector<16x32xf32>
    %cst_34 = arith.constant 1.000000e+00 : f32
    %240 = vector.broadcast %cst_34 : f32 to vector<16x32xf32>
    %241 = arith.addf %240, %239 : vector<16x32xf32>
    %242 = arith.divf %240, %241 : vector<16x32xf32>
    %243 = arith.mulf %230, %205 : vector<16x32xf32>
    %244 = arith.mulf %222, %234 : vector<16x32xf32>
    %245 = arith.addf %243, %244 : vector<16x32xf32>
    %246 = math.tanh %245 : vector<16x32xf32>
    %247 = arith.mulf %242, %246 : vector<16x32xf32>
    %248 = vector.extract_strided_slice %247 {offsets = [0, 0], sizes = [16, 16], strides = [1, 1]} : vector<16x32xf32> to vector<16x16xf32>
    %249 = vector.extract_strided_slice %247 {offsets = [0, 16], sizes = [16, 16], strides = [1, 1]} : vector<16x32xf32> to vector<16x16xf32>
    %250 = vector.extract_strided_slice %5 {offsets = [96, 0], sizes = [16, 64], strides = [1, 1]} : vector<128x128xf32> to vector<16x64xf32>
    %251 = vector.extract_strided_slice %5 {offsets = [16, 64], sizes = [16, 64], strides = [1, 1]} : vector<128x128xf32> to vector<16x64xf32>
    %252 = tpu.concatenate %250, %251 in 1 : vector<16x64xf32>, vector<16x64xf32> -> vector<16x128xf32>
    %cst_35 = arith.constant dense<0.000000e+00> : vector<16x128xf32>
    %253 = tpu.matmul %247, %6, %cst_35 {dimension_numbers = #tpu.dot_dimension_numbers<[1], [0], [0], [1], [0, 0, 1, 1], [], []>} : vector<16x32xf32>, vector<32x128xf32>, vector<16x128xf32> -> vector<16x128xf32>
    %254 = arith.addf %252, %253 : vector<16x128xf32>
    %255 = vector.extract_strided_slice %254 {offsets = [0, 0], sizes = [16, 16], strides = [1, 1]} : vector<16x128xf32> to vector<16x16xf32>
    %256 = vector.extract_strided_slice %254 {offsets = [0, 64], sizes = [16, 16], strides = [1, 1]} : vector<16x128xf32> to vector<16x16xf32>
    %257 = tpu.concatenate %255, %256 in 1 : vector<16x16xf32>, vector<16x16xf32> -> vector<16x32xf32>
    %258 = arith.negf %257 : vector<16x32xf32>
    %259 = math.exp %258 : vector<16x32xf32>
    %cst_36 = arith.constant 1.000000e+00 : f32
    %260 = vector.broadcast %cst_36 : f32 to vector<16x32xf32>
    %261 = arith.addf %260, %259 : vector<16x32xf32>
    %262 = arith.divf %260, %261 : vector<16x32xf32>
    %263 = vector.extract_strided_slice %254 {offsets = [0, 16], sizes = [16, 16], strides = [1, 1]} : vector<16x128xf32> to vector<16x16xf32>
    %264 = vector.extract_strided_slice %254 {offsets = [0, 80], sizes = [16, 16], strides = [1, 1]} : vector<16x128xf32> to vector<16x16xf32>
    %265 = tpu.concatenate %263, %264 in 1 : vector<16x16xf32>, vector<16x16xf32> -> vector<16x32xf32>
    %266 = arith.negf %265 : vector<16x32xf32>
    %267 = math.exp %266 : vector<16x32xf32>
    %cst_37 = arith.constant 1.000000e+00 : f32
    %268 = vector.broadcast %cst_37 : f32 to vector<16x32xf32>
    %269 = arith.addf %268, %267 : vector<16x32xf32>
    %270 = arith.divf %268, %269 : vector<16x32xf32>
    %271 = vector.extract_strided_slice %254 {offsets = [0, 32], sizes = [16, 16], strides = [1, 1]} : vector<16x128xf32> to vector<16x16xf32>
    %272 = vector.extract_strided_slice %254 {offsets = [0, 96], sizes = [16, 16], strides = [1, 1]} : vector<16x128xf32> to vector<16x16xf32>
    %273 = tpu.concatenate %271, %272 in 1 : vector<16x16xf32>, vector<16x16xf32> -> vector<16x32xf32>
    %274 = math.tanh %273 : vector<16x32xf32>
    %275 = vector.extract_strided_slice %254 {offsets = [0, 48], sizes = [16, 16], strides = [1, 1]} : vector<16x128xf32> to vector<16x16xf32>
    %276 = vector.extract_strided_slice %254 {offsets = [0, 112], sizes = [16, 16], strides = [1, 1]} : vector<16x128xf32> to vector<16x16xf32>
    %277 = tpu.concatenate %275, %276 in 1 : vector<16x16xf32>, vector<16x16xf32> -> vector<16x32xf32>
    %278 = arith.negf %277 : vector<16x32xf32>
    %279 = math.exp %278 : vector<16x32xf32>
    %cst_38 = arith.constant 1.000000e+00 : f32
    %280 = vector.broadcast %cst_38 : f32 to vector<16x32xf32>
    %281 = arith.addf %280, %279 : vector<16x32xf32>
    %282 = arith.divf %280, %281 : vector<16x32xf32>
    %283 = arith.mulf %270, %245 : vector<16x32xf32>
    %284 = arith.mulf %262, %274 : vector<16x32xf32>
    %285 = arith.addf %283, %284 : vector<16x32xf32>
    %286 = math.tanh %285 : vector<16x32xf32>
    %287 = arith.mulf %282, %286 : vector<16x32xf32>
    %288 = vector.extract_strided_slice %287 {offsets = [0, 0], sizes = [16, 16], strides = [1, 1]} : vector<16x32xf32> to vector<16x16xf32>
    %289 = vector.extract_strided_slice %287 {offsets = [0, 16], sizes = [16, 16], strides = [1, 1]} : vector<16x32xf32> to vector<16x16xf32>
    %290 = vector.extract_strided_slice %5 {offsets = [112, 0], sizes = [16, 64], strides = [1, 1]} : vector<128x128xf32> to vector<16x64xf32>
    %291 = vector.extract_strided_slice %5 {offsets = [0, 64], sizes = [16, 64], strides = [1, 1]} : vector<128x128xf32> to vector<16x64xf32>
    %292 = tpu.concatenate %290, %291 in 1 : vector<16x64xf32>, vector<16x64xf32> -> vector<16x128xf32>
    %cst_39 = arith.constant dense<0.000000e+00> : vector<16x128xf32>
    %293 = tpu.matmul %287, %6, %cst_39 {dimension_numbers = #tpu.dot_dimension_numbers<[1], [0], [0], [1], [0, 0, 1, 1], [], []>} : vector<16x32xf32>, vector<32x128xf32>, vector<16x128xf32> -> vector<16x128xf32>
    %294 = arith.addf %292, %293 : vector<16x128xf32>
    %295 = vector.extract_strided_slice %294 {offsets = [0, 0], sizes = [16, 16], strides = [1, 1]} : vector<16x128xf32> to vector<16x16xf32>
    %296 = vector.extract_strided_slice %294 {offsets = [0, 64], sizes = [16, 16], strides = [1, 1]} : vector<16x128xf32> to vector<16x16xf32>
    %297 = tpu.concatenate %295, %296 in 1 : vector<16x16xf32>, vector<16x16xf32> -> vector<16x32xf32>
    %298 = arith.negf %297 : vector<16x32xf32>
    %299 = math.exp %298 : vector<16x32xf32>
    %cst_40 = arith.constant 1.000000e+00 : f32
    %300 = vector.broadcast %cst_40 : f32 to vector<16x32xf32>
    %301 = arith.addf %300, %299 : vector<16x32xf32>
    %302 = arith.divf %300, %301 : vector<16x32xf32>
    %303 = vector.extract_strided_slice %294 {offsets = [0, 16], sizes = [16, 16], strides = [1, 1]} : vector<16x128xf32> to vector<16x16xf32>
    %304 = vector.extract_strided_slice %294 {offsets = [0, 80], sizes = [16, 16], strides = [1, 1]} : vector<16x128xf32> to vector<16x16xf32>
    %305 = tpu.concatenate %303, %304 in 1 : vector<16x16xf32>, vector<16x16xf32> -> vector<16x32xf32>
    %306 = arith.negf %305 : vector<16x32xf32>
    %307 = math.exp %306 : vector<16x32xf32>
    %cst_41 = arith.constant 1.000000e+00 : f32
    %308 = vector.broadcast %cst_41 : f32 to vector<16x32xf32>
    %309 = arith.addf %308, %307 : vector<16x32xf32>
    %310 = arith.divf %308, %309 : vector<16x32xf32>
    %311 = vector.extract_strided_slice %294 {offsets = [0, 32], sizes = [16, 16], strides = [1, 1]} : vector<16x128xf32> to vector<16x16xf32>
    %312 = vector.extract_strided_slice %294 {offsets = [0, 96], sizes = [16, 16], strides = [1, 1]} : vector<16x128xf32> to vector<16x16xf32>
    %313 = tpu.concatenate %311, %312 in 1 : vector<16x16xf32>, vector<16x16xf32> -> vector<16x32xf32>
    %314 = math.tanh %313 : vector<16x32xf32>
    %315 = vector.extract_strided_slice %294 {offsets = [0, 48], sizes = [16, 16], strides = [1, 1]} : vector<16x128xf32> to vector<16x16xf32>
    %316 = vector.extract_strided_slice %294 {offsets = [0, 112], sizes = [16, 16], strides = [1, 1]} : vector<16x128xf32> to vector<16x16xf32>
    %317 = tpu.concatenate %315, %316 in 1 : vector<16x16xf32>, vector<16x16xf32> -> vector<16x32xf32>
    %318 = arith.negf %317 : vector<16x32xf32>
    %319 = math.exp %318 : vector<16x32xf32>
    %cst_42 = arith.constant 1.000000e+00 : f32
    %320 = vector.broadcast %cst_42 : f32 to vector<16x32xf32>
    %321 = arith.addf %320, %319 : vector<16x32xf32>
    %322 = arith.divf %320, %321 : vector<16x32xf32>
    %323 = arith.mulf %310, %285 : vector<16x32xf32>
    %324 = arith.mulf %302, %314 : vector<16x32xf32>
    %325 = arith.addf %323, %324 : vector<16x32xf32>
    %326 = math.tanh %325 : vector<16x32xf32>
    %327 = arith.mulf %322, %326 : vector<16x32xf32>
    %328 = vector.extract_strided_slice %327 {offsets = [0, 0], sizes = [16, 16], strides = [1, 1]} : vector<16x32xf32> to vector<16x16xf32>
    %329 = vector.extract_strided_slice %327 {offsets = [0, 16], sizes = [16, 16], strides = [1, 1]} : vector<16x32xf32> to vector<16x16xf32>
    %330 = tpu.concatenate %48, %329 in 1 : vector<16x16xf32>, vector<16x16xf32> -> vector<16x32xf32>
    %331 = vector.extract_strided_slice %7 {offsets = [0, 0], sizes = [16, 1], strides = [1, 1]} : vector<16x8xf32> to vector<16x1xf32>
    %332 = vector.broadcast %331 : vector<16x1xf32> to vector<16x32xf32>
    %333 = arith.mulf %330, %332 : vector<16x32xf32>
    %334 = tpu.concatenate %88, %289 in 1 : vector<16x16xf32>, vector<16x16xf32> -> vector<16x32xf32>
    %335 = vector.extract_strided_slice %7 {offsets = [0, 1], sizes = [16, 1], strides = [1, 1]} : vector<16x8xf32> to vector<16x1xf32>
    %336 = vector.broadcast %335 : vector<16x1xf32> to vector<16x32xf32>
    %337 = arith.mulf %334, %336 : vector<16x32xf32>
    %338 = arith.maximumf %333, %337 : vector<16x32xf32>
    %339 = tpu.concatenate %128, %249 in 1 : vector<16x16xf32>, vector<16x16xf32> -> vector<16x32xf32>
    %340 = vector.extract_strided_slice %7 {offsets = [0, 2], sizes = [16, 1], strides = [1, 1]} : vector<16x8xf32> to vector<16x1xf32>
    %341 = vector.broadcast %340 : vector<16x1xf32> to vector<16x32xf32>
    %342 = arith.mulf %339, %341 : vector<16x32xf32>
    %343 = arith.maximumf %338, %342 : vector<16x32xf32>
    %344 = tpu.concatenate %168, %209 in 1 : vector<16x16xf32>, vector<16x16xf32> -> vector<16x32xf32>
    %345 = vector.extract_strided_slice %7 {offsets = [0, 3], sizes = [16, 1], strides = [1, 1]} : vector<16x8xf32> to vector<16x1xf32>
    %346 = vector.broadcast %345 : vector<16x1xf32> to vector<16x32xf32>
    %347 = arith.mulf %344, %346 : vector<16x32xf32>
    %348 = arith.maximumf %343, %347 : vector<16x32xf32>
    %349 = tpu.concatenate %208, %169 in 1 : vector<16x16xf32>, vector<16x16xf32> -> vector<16x32xf32>
    %350 = vector.extract_strided_slice %7 {offsets = [0, 4], sizes = [16, 1], strides = [1, 1]} : vector<16x8xf32> to vector<16x1xf32>
    %351 = vector.broadcast %350 : vector<16x1xf32> to vector<16x32xf32>
    %352 = arith.mulf %349, %351 : vector<16x32xf32>
    %353 = arith.maximumf %348, %352 : vector<16x32xf32>
    %354 = tpu.concatenate %248, %129 in 1 : vector<16x16xf32>, vector<16x16xf32> -> vector<16x32xf32>
    %355 = vector.extract_strided_slice %7 {offsets = [0, 5], sizes = [16, 1], strides = [1, 1]} : vector<16x8xf32> to vector<16x1xf32>
    %356 = vector.broadcast %355 : vector<16x1xf32> to vector<16x32xf32>
    %357 = arith.mulf %354, %356 : vector<16x32xf32>
    %358 = arith.maximumf %353, %357 : vector<16x32xf32>
    %359 = tpu.concatenate %288, %89 in 1 : vector<16x16xf32>, vector<16x16xf32> -> vector<16x32xf32>
    %360 = vector.extract_strided_slice %7 {offsets = [0, 6], sizes = [16, 1], strides = [1, 1]} : vector<16x8xf32> to vector<16x1xf32>
    %361 = vector.broadcast %360 : vector<16x1xf32> to vector<16x32xf32>
    %362 = arith.mulf %359, %361 : vector<16x32xf32>
    %363 = arith.maximumf %358, %362 : vector<16x32xf32>
    %364 = tpu.concatenate %328, %49 in 1 : vector<16x16xf32>, vector<16x16xf32> -> vector<16x32xf32>
    %365 = vector.extract_strided_slice %7 {offsets = [0, 7], sizes = [16, 1], strides = [1, 1]} : vector<16x8xf32> to vector<16x1xf32>
    %366 = vector.broadcast %365 : vector<16x1xf32> to vector<16x32xf32>
    %367 = arith.mulf %364, %366 : vector<16x32xf32>
    %368 = arith.maximumf %363, %367 : vector<16x32xf32>
    %c0_43 = arith.constant 0 : index
    %c0_44 = arith.constant 0 : index
    %369 = vector.load %arg8[%c0_43, %c0_44] : memref<32x128xf32, #tpu.memory_space<vmem>>, vector<32x128xf32>
    %cst_45 = arith.constant dense<0.000000e+00> : vector<16x128xf32>
    %370 = tpu.matmul %368, %369, %cst_45 {dimension_numbers = #tpu.dot_dimension_numbers<[1], [0], [0], [1], [0, 0, 1, 1], [], []>} : vector<16x32xf32>, vector<32x128xf32>, vector<16x128xf32> -> vector<16x128xf32>
    %c0_46 = arith.constant 0 : index
    %c0_47 = arith.constant 0 : index
    %371 = vector.load %arg9[%c0_46, %c0_47] : memref<1x128xf32, #tpu.memory_space<vmem>>, vector<1x128xf32>
    %372 = vector.broadcast %371 : vector<1x128xf32> to vector<16x128xf32>
    %373 = arith.addf %370, %372 : vector<16x128xf32>
    %c0_48 = arith.constant 0 : index
    %c0_49 = arith.constant 0 : index
    %374 = vector.load %arg10[%c0_48, %c0_49] : memref<32x128xf32, #tpu.memory_space<vmem>>, vector<32x128xf32>
    %c0_50 = arith.constant 0 : index
    %c0_51 = arith.constant 0 : index
    %375 = vector.load %arg2[%c0_50, %c0_51] : memref<2x8xf32, #tpu.memory_space<vmem>>, vector<2x8xf32>
    %cst_52 = arith.constant 0.000000e+00 : f32
    %376 = vector.broadcast %cst_52 : f32 to vector<2x32xf32>
    %cst_53 = arith.constant 0.000000e+00 : f32
    %377 = vector.broadcast %cst_53 : f32 to vector<2x32xf32>
    %378 = vector.extract_strided_slice %373 {offsets = [0, 0], sizes = [1, 64], strides = [1, 1]} : vector<16x128xf32> to vector<1x64xf32>
    %379 = vector.extract_strided_slice %373 {offsets = [8, 0], sizes = [1, 64], strides = [1, 1]} : vector<16x128xf32> to vector<1x64xf32>
    %380 = tpu.concatenate %378, %379 in 0 : vector<1x64xf32>, vector<1x64xf32> -> vector<2x64xf32>
    %381 = vector.extract_strided_slice %373 {offsets = [7, 64], sizes = [1, 64], strides = [1, 1]} : vector<16x128xf32> to vector<1x64xf32>
    %382 = vector.extract_strided_slice %373 {offsets = [15, 64], sizes = [1, 64], strides = [1, 1]} : vector<16x128xf32> to vector<1x64xf32>
    %383 = tpu.concatenate %381, %382 in 0 : vector<1x64xf32>, vector<1x64xf32> -> vector<2x64xf32>
    %384 = tpu.concatenate %380, %383 in 1 : vector<2x64xf32>, vector<2x64xf32> -> vector<2x128xf32>
    %cst_54 = arith.constant dense<0.000000e+00> : vector<2x128xf32>
    %385 = tpu.matmul %376, %374, %cst_54 {dimension_numbers = #tpu.dot_dimension_numbers<[1], [0], [0], [1], [0, 0, 1, 1], [], []>} : vector<2x32xf32>, vector<32x128xf32>, vector<2x128xf32> -> vector<2x128xf32>
    %386 = arith.addf %384, %385 : vector<2x128xf32>
    %387 = vector.extract_strided_slice %386 {offsets = [0, 0], sizes = [2, 16], strides = [1, 1]} : vector<2x128xf32> to vector<2x16xf32>
    %388 = vector.extract_strided_slice %386 {offsets = [0, 64], sizes = [2, 16], strides = [1, 1]} : vector<2x128xf32> to vector<2x16xf32>
    %389 = tpu.concatenate %387, %388 in 1 : vector<2x16xf32>, vector<2x16xf32> -> vector<2x32xf32>
    %390 = arith.negf %389 : vector<2x32xf32>
    %391 = math.exp %390 : vector<2x32xf32>
    %cst_55 = arith.constant 1.000000e+00 : f32
    %392 = vector.broadcast %cst_55 : f32 to vector<2x32xf32>
    %393 = arith.addf %392, %391 : vector<2x32xf32>
    %394 = arith.divf %392, %393 : vector<2x32xf32>
    %395 = vector.extract_strided_slice %386 {offsets = [0, 16], sizes = [2, 16], strides = [1, 1]} : vector<2x128xf32> to vector<2x16xf32>
    %396 = vector.extract_strided_slice %386 {offsets = [0, 80], sizes = [2, 16], strides = [1, 1]} : vector<2x128xf32> to vector<2x16xf32>
    %397 = tpu.concatenate %395, %396 in 1 : vector<2x16xf32>, vector<2x16xf32> -> vector<2x32xf32>
    %398 = arith.negf %397 : vector<2x32xf32>
    %399 = math.exp %398 : vector<2x32xf32>
    %cst_56 = arith.constant 1.000000e+00 : f32
    %400 = vector.broadcast %cst_56 : f32 to vector<2x32xf32>
    %401 = arith.addf %400, %399 : vector<2x32xf32>
    %402 = arith.divf %400, %401 : vector<2x32xf32>
    %403 = vector.extract_strided_slice %386 {offsets = [0, 32], sizes = [2, 16], strides = [1, 1]} : vector<2x128xf32> to vector<2x16xf32>
    %404 = vector.extract_strided_slice %386 {offsets = [0, 96], sizes = [2, 16], strides = [1, 1]} : vector<2x128xf32> to vector<2x16xf32>
    %405 = tpu.concatenate %403, %404 in 1 : vector<2x16xf32>, vector<2x16xf32> -> vector<2x32xf32>
    %406 = math.tanh %405 : vector<2x32xf32>
    %407 = vector.extract_strided_slice %386 {offsets = [0, 48], sizes = [2, 16], strides = [1, 1]} : vector<2x128xf32> to vector<2x16xf32>
    %408 = vector.extract_strided_slice %386 {offsets = [0, 112], sizes = [2, 16], strides = [1, 1]} : vector<2x128xf32> to vector<2x16xf32>
    %409 = tpu.concatenate %407, %408 in 1 : vector<2x16xf32>, vector<2x16xf32> -> vector<2x32xf32>
    %410 = arith.negf %409 : vector<2x32xf32>
    %411 = math.exp %410 : vector<2x32xf32>
    %cst_57 = arith.constant 1.000000e+00 : f32
    %412 = vector.broadcast %cst_57 : f32 to vector<2x32xf32>
    %413 = arith.addf %412, %411 : vector<2x32xf32>
    %414 = arith.divf %412, %413 : vector<2x32xf32>
    %415 = arith.mulf %402, %377 : vector<2x32xf32>
    %416 = arith.mulf %394, %406 : vector<2x32xf32>
    %417 = arith.addf %415, %416 : vector<2x32xf32>
    %418 = math.tanh %417 : vector<2x32xf32>
    %419 = arith.mulf %414, %418 : vector<2x32xf32>
    %420 = vector.extract_strided_slice %419 {offsets = [0, 0], sizes = [2, 16], strides = [1, 1]} : vector<2x32xf32> to vector<2x16xf32>
    %421 = vector.extract_strided_slice %419 {offsets = [0, 16], sizes = [2, 16], strides = [1, 1]} : vector<2x32xf32> to vector<2x16xf32>
    %422 = vector.extract_strided_slice %373 {offsets = [1, 0], sizes = [1, 64], strides = [1, 1]} : vector<16x128xf32> to vector<1x64xf32>
    %423 = vector.extract_strided_slice %373 {offsets = [9, 0], sizes = [1, 64], strides = [1, 1]} : vector<16x128xf32> to vector<1x64xf32>
    %424 = tpu.concatenate %422, %423 in 0 : vector<1x64xf32>, vector<1x64xf32> -> vector<2x64xf32>
    %425 = vector.extract_strided_slice %373 {offsets = [6, 64], sizes = [1, 64], strides = [1, 1]} : vector<16x128xf32> to vector<1x64xf32>
    %426 = vector.extract_strided_slice %373 {offsets = [14, 64], sizes = [1, 64], strides = [1, 1]} : vector<16x128xf32> to vector<1x64xf32>
    %427 = tpu.concatenate %425, %426 in 0 : vector<1x64xf32>, vector<1x64xf32> -> vector<2x64xf32>
    %428 = tpu.concatenate %424, %427 in 1 : vector<2x64xf32>, vector<2x64xf32> -> vector<2x128xf32>
    %cst_58 = arith.constant dense<0.000000e+00> : vector<2x128xf32>
    %429 = tpu.matmul %419, %374, %cst_58 {dimension_numbers = #tpu.dot_dimension_numbers<[1], [0], [0], [1], [0, 0, 1, 1], [], []>} : vector<2x32xf32>, vector<32x128xf32>, vector<2x128xf32> -> vector<2x128xf32>
    %430 = arith.addf %428, %429 : vector<2x128xf32>
    %431 = vector.extract_strided_slice %430 {offsets = [0, 0], sizes = [2, 16], strides = [1, 1]} : vector<2x128xf32> to vector<2x16xf32>
    %432 = vector.extract_strided_slice %430 {offsets = [0, 64], sizes = [2, 16], strides = [1, 1]} : vector<2x128xf32> to vector<2x16xf32>
    %433 = tpu.concatenate %431, %432 in 1 : vector<2x16xf32>, vector<2x16xf32> -> vector<2x32xf32>
    %434 = arith.negf %433 : vector<2x32xf32>
    %435 = math.exp %434 : vector<2x32xf32>
    %cst_59 = arith.constant 1.000000e+00 : f32
    %436 = vector.broadcast %cst_59 : f32 to vector<2x32xf32>
    %437 = arith.addf %436, %435 : vector<2x32xf32>
    %438 = arith.divf %436, %437 : vector<2x32xf32>
    %439 = vector.extract_strided_slice %430 {offsets = [0, 16], sizes = [2, 16], strides = [1, 1]} : vector<2x128xf32> to vector<2x16xf32>
    %440 = vector.extract_strided_slice %430 {offsets = [0, 80], sizes = [2, 16], strides = [1, 1]} : vector<2x128xf32> to vector<2x16xf32>
    %441 = tpu.concatenate %439, %440 in 1 : vector<2x16xf32>, vector<2x16xf32> -> vector<2x32xf32>
    %442 = arith.negf %441 : vector<2x32xf32>
    %443 = math.exp %442 : vector<2x32xf32>
    %cst_60 = arith.constant 1.000000e+00 : f32
    %444 = vector.broadcast %cst_60 : f32 to vector<2x32xf32>
    %445 = arith.addf %444, %443 : vector<2x32xf32>
    %446 = arith.divf %444, %445 : vector<2x32xf32>
    %447 = vector.extract_strided_slice %430 {offsets = [0, 32], sizes = [2, 16], strides = [1, 1]} : vector<2x128xf32> to vector<2x16xf32>
    %448 = vector.extract_strided_slice %430 {offsets = [0, 96], sizes = [2, 16], strides = [1, 1]} : vector<2x128xf32> to vector<2x16xf32>
    %449 = tpu.concatenate %447, %448 in 1 : vector<2x16xf32>, vector<2x16xf32> -> vector<2x32xf32>
    %450 = math.tanh %449 : vector<2x32xf32>
    %451 = vector.extract_strided_slice %430 {offsets = [0, 48], sizes = [2, 16], strides = [1, 1]} : vector<2x128xf32> to vector<2x16xf32>
    %452 = vector.extract_strided_slice %430 {offsets = [0, 112], sizes = [2, 16], strides = [1, 1]} : vector<2x128xf32> to vector<2x16xf32>
    %453 = tpu.concatenate %451, %452 in 1 : vector<2x16xf32>, vector<2x16xf32> -> vector<2x32xf32>
    %454 = arith.negf %453 : vector<2x32xf32>
    %455 = math.exp %454 : vector<2x32xf32>
    %cst_61 = arith.constant 1.000000e+00 : f32
    %456 = vector.broadcast %cst_61 : f32 to vector<2x32xf32>
    %457 = arith.addf %456, %455 : vector<2x32xf32>
    %458 = arith.divf %456, %457 : vector<2x32xf32>
    %459 = arith.mulf %446, %417 : vector<2x32xf32>
    %460 = arith.mulf %438, %450 : vector<2x32xf32>
    %461 = arith.addf %459, %460 : vector<2x32xf32>
    %462 = math.tanh %461 : vector<2x32xf32>
    %463 = arith.mulf %458, %462 : vector<2x32xf32>
    %464 = vector.extract_strided_slice %463 {offsets = [0, 0], sizes = [2, 16], strides = [1, 1]} : vector<2x32xf32> to vector<2x16xf32>
    %465 = vector.extract_strided_slice %463 {offsets = [0, 16], sizes = [2, 16], strides = [1, 1]} : vector<2x32xf32> to vector<2x16xf32>
    %466 = vector.extract_strided_slice %373 {offsets = [2, 0], sizes = [1, 64], strides = [1, 1]} : vector<16x128xf32> to vector<1x64xf32>
    %467 = vector.extract_strided_slice %373 {offsets = [10, 0], sizes = [1, 64], strides = [1, 1]} : vector<16x128xf32> to vector<1x64xf32>
    %468 = tpu.concatenate %466, %467 in 0 : vector<1x64xf32>, vector<1x64xf32> -> vector<2x64xf32>
    %469 = vector.extract_strided_slice %373 {offsets = [5, 64], sizes = [1, 64], strides = [1, 1]} : vector<16x128xf32> to vector<1x64xf32>
    %470 = vector.extract_strided_slice %373 {offsets = [13, 64], sizes = [1, 64], strides = [1, 1]} : vector<16x128xf32> to vector<1x64xf32>
    %471 = tpu.concatenate %469, %470 in 0 : vector<1x64xf32>, vector<1x64xf32> -> vector<2x64xf32>
    %472 = tpu.concatenate %468, %471 in 1 : vector<2x64xf32>, vector<2x64xf32> -> vector<2x128xf32>
    %cst_62 = arith.constant dense<0.000000e+00> : vector<2x128xf32>
    %473 = tpu.matmul %463, %374, %cst_62 {dimension_numbers = #tpu.dot_dimension_numbers<[1], [0], [0], [1], [0, 0, 1, 1], [], []>} : vector<2x32xf32>, vector<32x128xf32>, vector<2x128xf32> -> vector<2x128xf32>
    %474 = arith.addf %472, %473 : vector<2x128xf32>
    %475 = vector.extract_strided_slice %474 {offsets = [0, 0], sizes = [2, 16], strides = [1, 1]} : vector<2x128xf32> to vector<2x16xf32>
    %476 = vector.extract_strided_slice %474 {offsets = [0, 64], sizes = [2, 16], strides = [1, 1]} : vector<2x128xf32> to vector<2x16xf32>
    %477 = tpu.concatenate %475, %476 in 1 : vector<2x16xf32>, vector<2x16xf32> -> vector<2x32xf32>
    %478 = arith.negf %477 : vector<2x32xf32>
    %479 = math.exp %478 : vector<2x32xf32>
    %cst_63 = arith.constant 1.000000e+00 : f32
    %480 = vector.broadcast %cst_63 : f32 to vector<2x32xf32>
    %481 = arith.addf %480, %479 : vector<2x32xf32>
    %482 = arith.divf %480, %481 : vector<2x32xf32>
    %483 = vector.extract_strided_slice %474 {offsets = [0, 16], sizes = [2, 16], strides = [1, 1]} : vector<2x128xf32> to vector<2x16xf32>
    %484 = vector.extract_strided_slice %474 {offsets = [0, 80], sizes = [2, 16], strides = [1, 1]} : vector<2x128xf32> to vector<2x16xf32>
    %485 = tpu.concatenate %483, %484 in 1 : vector<2x16xf32>, vector<2x16xf32> -> vector<2x32xf32>
    %486 = arith.negf %485 : vector<2x32xf32>
    %487 = math.exp %486 : vector<2x32xf32>
    %cst_64 = arith.constant 1.000000e+00 : f32
    %488 = vector.broadcast %cst_64 : f32 to vector<2x32xf32>
    %489 = arith.addf %488, %487 : vector<2x32xf32>
    %490 = arith.divf %488, %489 : vector<2x32xf32>
    %491 = vector.extract_strided_slice %474 {offsets = [0, 32], sizes = [2, 16], strides = [1, 1]} : vector<2x128xf32> to vector<2x16xf32>
    %492 = vector.extract_strided_slice %474 {offsets = [0, 96], sizes = [2, 16], strides = [1, 1]} : vector<2x128xf32> to vector<2x16xf32>
    %493 = tpu.concatenate %491, %492 in 1 : vector<2x16xf32>, vector<2x16xf32> -> vector<2x32xf32>
    %494 = math.tanh %493 : vector<2x32xf32>
    %495 = vector.extract_strided_slice %474 {offsets = [0, 48], sizes = [2, 16], strides = [1, 1]} : vector<2x128xf32> to vector<2x16xf32>
    %496 = vector.extract_strided_slice %474 {offsets = [0, 112], sizes = [2, 16], strides = [1, 1]} : vector<2x128xf32> to vector<2x16xf32>
    %497 = tpu.concatenate %495, %496 in 1 : vector<2x16xf32>, vector<2x16xf32> -> vector<2x32xf32>
    %498 = arith.negf %497 : vector<2x32xf32>
    %499 = math.exp %498 : vector<2x32xf32>
    %cst_65 = arith.constant 1.000000e+00 : f32
    %500 = vector.broadcast %cst_65 : f32 to vector<2x32xf32>
    %501 = arith.addf %500, %499 : vector<2x32xf32>
    %502 = arith.divf %500, %501 : vector<2x32xf32>
    %503 = arith.mulf %490, %461 : vector<2x32xf32>
    %504 = arith.mulf %482, %494 : vector<2x32xf32>
    %505 = arith.addf %503, %504 : vector<2x32xf32>
    %506 = math.tanh %505 : vector<2x32xf32>
    %507 = arith.mulf %502, %506 : vector<2x32xf32>
    %508 = vector.extract_strided_slice %507 {offsets = [0, 0], sizes = [2, 16], strides = [1, 1]} : vector<2x32xf32> to vector<2x16xf32>
    %509 = vector.extract_strided_slice %507 {offsets = [0, 16], sizes = [2, 16], strides = [1, 1]} : vector<2x32xf32> to vector<2x16xf32>
    %510 = vector.extract_strided_slice %373 {offsets = [3, 0], sizes = [1, 64], strides = [1, 1]} : vector<16x128xf32> to vector<1x64xf32>
    %511 = vector.extract_strided_slice %373 {offsets = [11, 0], sizes = [1, 64], strides = [1, 1]} : vector<16x128xf32> to vector<1x64xf32>
    %512 = tpu.concatenate %510, %511 in 0 : vector<1x64xf32>, vector<1x64xf32> -> vector<2x64xf32>
    %513 = vector.extract_strided_slice %373 {offsets = [4, 64], sizes = [1, 64], strides = [1, 1]} : vector<16x128xf32> to vector<1x64xf32>
    %514 = vector.extract_strided_slice %373 {offsets = [12, 64], sizes = [1, 64], strides = [1, 1]} : vector<16x128xf32> to vector<1x64xf32>
    %515 = tpu.concatenate %513, %514 in 0 : vector<1x64xf32>, vector<1x64xf32> -> vector<2x64xf32>
    %516 = tpu.concatenate %512, %515 in 1 : vector<2x64xf32>, vector<2x64xf32> -> vector<2x128xf32>
    %cst_66 = arith.constant dense<0.000000e+00> : vector<2x128xf32>
    %517 = tpu.matmul %507, %374, %cst_66 {dimension_numbers = #tpu.dot_dimension_numbers<[1], [0], [0], [1], [0, 0, 1, 1], [], []>} : vector<2x32xf32>, vector<32x128xf32>, vector<2x128xf32> -> vector<2x128xf32>
    %518 = arith.addf %516, %517 : vector<2x128xf32>
    %519 = vector.extract_strided_slice %518 {offsets = [0, 0], sizes = [2, 16], strides = [1, 1]} : vector<2x128xf32> to vector<2x16xf32>
    %520 = vector.extract_strided_slice %518 {offsets = [0, 64], sizes = [2, 16], strides = [1, 1]} : vector<2x128xf32> to vector<2x16xf32>
    %521 = tpu.concatenate %519, %520 in 1 : vector<2x16xf32>, vector<2x16xf32> -> vector<2x32xf32>
    %522 = arith.negf %521 : vector<2x32xf32>
    %523 = math.exp %522 : vector<2x32xf32>
    %cst_67 = arith.constant 1.000000e+00 : f32
    %524 = vector.broadcast %cst_67 : f32 to vector<2x32xf32>
    %525 = arith.addf %524, %523 : vector<2x32xf32>
    %526 = arith.divf %524, %525 : vector<2x32xf32>
    %527 = vector.extract_strided_slice %518 {offsets = [0, 16], sizes = [2, 16], strides = [1, 1]} : vector<2x128xf32> to vector<2x16xf32>
    %528 = vector.extract_strided_slice %518 {offsets = [0, 80], sizes = [2, 16], strides = [1, 1]} : vector<2x128xf32> to vector<2x16xf32>
    %529 = tpu.concatenate %527, %528 in 1 : vector<2x16xf32>, vector<2x16xf32> -> vector<2x32xf32>
    %530 = arith.negf %529 : vector<2x32xf32>
    %531 = math.exp %530 : vector<2x32xf32>
    %cst_68 = arith.constant 1.000000e+00 : f32
    %532 = vector.broadcast %cst_68 : f32 to vector<2x32xf32>
    %533 = arith.addf %532, %531 : vector<2x32xf32>
    %534 = arith.divf %532, %533 : vector<2x32xf32>
    %535 = vector.extract_strided_slice %518 {offsets = [0, 32], sizes = [2, 16], strides = [1, 1]} : vector<2x128xf32> to vector<2x16xf32>
    %536 = vector.extract_strided_slice %518 {offsets = [0, 96], sizes = [2, 16], strides = [1, 1]} : vector<2x128xf32> to vector<2x16xf32>
    %537 = tpu.concatenate %535, %536 in 1 : vector<2x16xf32>, vector<2x16xf32> -> vector<2x32xf32>
    %538 = math.tanh %537 : vector<2x32xf32>
    %539 = vector.extract_strided_slice %518 {offsets = [0, 48], sizes = [2, 16], strides = [1, 1]} : vector<2x128xf32> to vector<2x16xf32>
    %540 = vector.extract_strided_slice %518 {offsets = [0, 112], sizes = [2, 16], strides = [1, 1]} : vector<2x128xf32> to vector<2x16xf32>
    %541 = tpu.concatenate %539, %540 in 1 : vector<2x16xf32>, vector<2x16xf32> -> vector<2x32xf32>
    %542 = arith.negf %541 : vector<2x32xf32>
    %543 = math.exp %542 : vector<2x32xf32>
    %cst_69 = arith.constant 1.000000e+00 : f32
    %544 = vector.broadcast %cst_69 : f32 to vector<2x32xf32>
    %545 = arith.addf %544, %543 : vector<2x32xf32>
    %546 = arith.divf %544, %545 : vector<2x32xf32>
    %547 = arith.mulf %534, %505 : vector<2x32xf32>
    %548 = arith.mulf %526, %538 : vector<2x32xf32>
    %549 = arith.addf %547, %548 : vector<2x32xf32>
    %550 = math.tanh %549 : vector<2x32xf32>
    %551 = arith.mulf %546, %550 : vector<2x32xf32>
    %552 = vector.extract_strided_slice %551 {offsets = [0, 0], sizes = [2, 16], strides = [1, 1]} : vector<2x32xf32> to vector<2x16xf32>
    %553 = vector.extract_strided_slice %551 {offsets = [0, 16], sizes = [2, 16], strides = [1, 1]} : vector<2x32xf32> to vector<2x16xf32>
    %554 = vector.extract_strided_slice %373 {offsets = [4, 0], sizes = [1, 64], strides = [1, 1]} : vector<16x128xf32> to vector<1x64xf32>
    %555 = vector.extract_strided_slice %373 {offsets = [12, 0], sizes = [1, 64], strides = [1, 1]} : vector<16x128xf32> to vector<1x64xf32>
    %556 = tpu.concatenate %554, %555 in 0 : vector<1x64xf32>, vector<1x64xf32> -> vector<2x64xf32>
    %557 = vector.extract_strided_slice %373 {offsets = [3, 64], sizes = [1, 64], strides = [1, 1]} : vector<16x128xf32> to vector<1x64xf32>
    %558 = vector.extract_strided_slice %373 {offsets = [11, 64], sizes = [1, 64], strides = [1, 1]} : vector<16x128xf32> to vector<1x64xf32>
    %559 = tpu.concatenate %557, %558 in 0 : vector<1x64xf32>, vector<1x64xf32> -> vector<2x64xf32>
    %560 = tpu.concatenate %556, %559 in 1 : vector<2x64xf32>, vector<2x64xf32> -> vector<2x128xf32>
    %cst_70 = arith.constant dense<0.000000e+00> : vector<2x128xf32>
    %561 = tpu.matmul %551, %374, %cst_70 {dimension_numbers = #tpu.dot_dimension_numbers<[1], [0], [0], [1], [0, 0, 1, 1], [], []>} : vector<2x32xf32>, vector<32x128xf32>, vector<2x128xf32> -> vector<2x128xf32>
    %562 = arith.addf %560, %561 : vector<2x128xf32>
    %563 = vector.extract_strided_slice %562 {offsets = [0, 0], sizes = [2, 16], strides = [1, 1]} : vector<2x128xf32> to vector<2x16xf32>
    %564 = vector.extract_strided_slice %562 {offsets = [0, 64], sizes = [2, 16], strides = [1, 1]} : vector<2x128xf32> to vector<2x16xf32>
    %565 = tpu.concatenate %563, %564 in 1 : vector<2x16xf32>, vector<2x16xf32> -> vector<2x32xf32>
    %566 = arith.negf %565 : vector<2x32xf32>
    %567 = math.exp %566 : vector<2x32xf32>
    %cst_71 = arith.constant 1.000000e+00 : f32
    %568 = vector.broadcast %cst_71 : f32 to vector<2x32xf32>
    %569 = arith.addf %568, %567 : vector<2x32xf32>
    %570 = arith.divf %568, %569 : vector<2x32xf32>
    %571 = vector.extract_strided_slice %562 {offsets = [0, 16], sizes = [2, 16], strides = [1, 1]} : vector<2x128xf32> to vector<2x16xf32>
    %572 = vector.extract_strided_slice %562 {offsets = [0, 80], sizes = [2, 16], strides = [1, 1]} : vector<2x128xf32> to vector<2x16xf32>
    %573 = tpu.concatenate %571, %572 in 1 : vector<2x16xf32>, vector<2x16xf32> -> vector<2x32xf32>
    %574 = arith.negf %573 : vector<2x32xf32>
    %575 = math.exp %574 : vector<2x32xf32>
    %cst_72 = arith.constant 1.000000e+00 : f32
    %576 = vector.broadcast %cst_72 : f32 to vector<2x32xf32>
    %577 = arith.addf %576, %575 : vector<2x32xf32>
    %578 = arith.divf %576, %577 : vector<2x32xf32>
    %579 = vector.extract_strided_slice %562 {offsets = [0, 32], sizes = [2, 16], strides = [1, 1]} : vector<2x128xf32> to vector<2x16xf32>
    %580 = vector.extract_strided_slice %562 {offsets = [0, 96], sizes = [2, 16], strides = [1, 1]} : vector<2x128xf32> to vector<2x16xf32>
    %581 = tpu.concatenate %579, %580 in 1 : vector<2x16xf32>, vector<2x16xf32> -> vector<2x32xf32>
    %582 = math.tanh %581 : vector<2x32xf32>
    %583 = vector.extract_strided_slice %562 {offsets = [0, 48], sizes = [2, 16], strides = [1, 1]} : vector<2x128xf32> to vector<2x16xf32>
    %584 = vector.extract_strided_slice %562 {offsets = [0, 112], sizes = [2, 16], strides = [1, 1]} : vector<2x128xf32> to vector<2x16xf32>
    %585 = tpu.concatenate %583, %584 in 1 : vector<2x16xf32>, vector<2x16xf32> -> vector<2x32xf32>
    %586 = arith.negf %585 : vector<2x32xf32>
    %587 = math.exp %586 : vector<2x32xf32>
    %cst_73 = arith.constant 1.000000e+00 : f32
    %588 = vector.broadcast %cst_73 : f32 to vector<2x32xf32>
    %589 = arith.addf %588, %587 : vector<2x32xf32>
    %590 = arith.divf %588, %589 : vector<2x32xf32>
    %591 = arith.mulf %578, %549 : vector<2x32xf32>
    %592 = arith.mulf %570, %582 : vector<2x32xf32>
    %593 = arith.addf %591, %592 : vector<2x32xf32>
    %594 = math.tanh %593 : vector<2x32xf32>
    %595 = arith.mulf %590, %594 : vector<2x32xf32>
    %596 = vector.extract_strided_slice %595 {offsets = [0, 0], sizes = [2, 16], strides = [1, 1]} : vector<2x32xf32> to vector<2x16xf32>
    %597 = vector.extract_strided_slice %595 {offsets = [0, 16], sizes = [2, 16], strides = [1, 1]} : vector<2x32xf32> to vector<2x16xf32>
    %598 = vector.extract_strided_slice %373 {offsets = [5, 0], sizes = [1, 64], strides = [1, 1]} : vector<16x128xf32> to vector<1x64xf32>
    %599 = vector.extract_strided_slice %373 {offsets = [13, 0], sizes = [1, 64], strides = [1, 1]} : vector<16x128xf32> to vector<1x64xf32>
    %600 = tpu.concatenate %598, %599 in 0 : vector<1x64xf32>, vector<1x64xf32> -> vector<2x64xf32>
    %601 = vector.extract_strided_slice %373 {offsets = [2, 64], sizes = [1, 64], strides = [1, 1]} : vector<16x128xf32> to vector<1x64xf32>
    %602 = vector.extract_strided_slice %373 {offsets = [10, 64], sizes = [1, 64], strides = [1, 1]} : vector<16x128xf32> to vector<1x64xf32>
    %603 = tpu.concatenate %601, %602 in 0 : vector<1x64xf32>, vector<1x64xf32> -> vector<2x64xf32>
    %604 = tpu.concatenate %600, %603 in 1 : vector<2x64xf32>, vector<2x64xf32> -> vector<2x128xf32>
    %cst_74 = arith.constant dense<0.000000e+00> : vector<2x128xf32>
    %605 = tpu.matmul %595, %374, %cst_74 {dimension_numbers = #tpu.dot_dimension_numbers<[1], [0], [0], [1], [0, 0, 1, 1], [], []>} : vector<2x32xf32>, vector<32x128xf32>, vector<2x128xf32> -> vector<2x128xf32>
    %606 = arith.addf %604, %605 : vector<2x128xf32>
    %607 = vector.extract_strided_slice %606 {offsets = [0, 0], sizes = [2, 16], strides = [1, 1]} : vector<2x128xf32> to vector<2x16xf32>
    %608 = vector.extract_strided_slice %606 {offsets = [0, 64], sizes = [2, 16], strides = [1, 1]} : vector<2x128xf32> to vector<2x16xf32>
    %609 = tpu.concatenate %607, %608 in 1 : vector<2x16xf32>, vector<2x16xf32> -> vector<2x32xf32>
    %610 = arith.negf %609 : vector<2x32xf32>
    %611 = math.exp %610 : vector<2x32xf32>
    %cst_75 = arith.constant 1.000000e+00 : f32
    %612 = vector.broadcast %cst_75 : f32 to vector<2x32xf32>
    %613 = arith.addf %612, %611 : vector<2x32xf32>
    %614 = arith.divf %612, %613 : vector<2x32xf32>
    %615 = vector.extract_strided_slice %606 {offsets = [0, 16], sizes = [2, 16], strides = [1, 1]} : vector<2x128xf32> to vector<2x16xf32>
    %616 = vector.extract_strided_slice %606 {offsets = [0, 80], sizes = [2, 16], strides = [1, 1]} : vector<2x128xf32> to vector<2x16xf32>
    %617 = tpu.concatenate %615, %616 in 1 : vector<2x16xf32>, vector<2x16xf32> -> vector<2x32xf32>
    %618 = arith.negf %617 : vector<2x32xf32>
    %619 = math.exp %618 : vector<2x32xf32>
    %cst_76 = arith.constant 1.000000e+00 : f32
    %620 = vector.broadcast %cst_76 : f32 to vector<2x32xf32>
    %621 = arith.addf %620, %619 : vector<2x32xf32>
    %622 = arith.divf %620, %621 : vector<2x32xf32>
    %623 = vector.extract_strided_slice %606 {offsets = [0, 32], sizes = [2, 16], strides = [1, 1]} : vector<2x128xf32> to vector<2x16xf32>
    %624 = vector.extract_strided_slice %606 {offsets = [0, 96], sizes = [2, 16], strides = [1, 1]} : vector<2x128xf32> to vector<2x16xf32>
    %625 = tpu.concatenate %623, %624 in 1 : vector<2x16xf32>, vector<2x16xf32> -> vector<2x32xf32>
    %626 = math.tanh %625 : vector<2x32xf32>
    %627 = vector.extract_strided_slice %606 {offsets = [0, 48], sizes = [2, 16], strides = [1, 1]} : vector<2x128xf32> to vector<2x16xf32>
    %628 = vector.extract_strided_slice %606 {offsets = [0, 112], sizes = [2, 16], strides = [1, 1]} : vector<2x128xf32> to vector<2x16xf32>
    %629 = tpu.concatenate %627, %628 in 1 : vector<2x16xf32>, vector<2x16xf32> -> vector<2x32xf32>
    %630 = arith.negf %629 : vector<2x32xf32>
    %631 = math.exp %630 : vector<2x32xf32>
    %cst_77 = arith.constant 1.000000e+00 : f32
    %632 = vector.broadcast %cst_77 : f32 to vector<2x32xf32>
    %633 = arith.addf %632, %631 : vector<2x32xf32>
    %634 = arith.divf %632, %633 : vector<2x32xf32>
    %635 = arith.mulf %622, %593 : vector<2x32xf32>
    %636 = arith.mulf %614, %626 : vector<2x32xf32>
    %637 = arith.addf %635, %636 : vector<2x32xf32>
    %638 = math.tanh %637 : vector<2x32xf32>
    %639 = arith.mulf %634, %638 : vector<2x32xf32>
    %640 = vector.extract_strided_slice %639 {offsets = [0, 0], sizes = [2, 16], strides = [1, 1]} : vector<2x32xf32> to vector<2x16xf32>
    %641 = vector.extract_strided_slice %639 {offsets = [0, 16], sizes = [2, 16], strides = [1, 1]} : vector<2x32xf32> to vector<2x16xf32>
    %642 = vector.extract_strided_slice %373 {offsets = [6, 0], sizes = [1, 64], strides = [1, 1]} : vector<16x128xf32> to vector<1x64xf32>
    %643 = vector.extract_strided_slice %373 {offsets = [14, 0], sizes = [1, 64], strides = [1, 1]} : vector<16x128xf32> to vector<1x64xf32>
    %644 = tpu.concatenate %642, %643 in 0 : vector<1x64xf32>, vector<1x64xf32> -> vector<2x64xf32>
    %645 = vector.extract_strided_slice %373 {offsets = [1, 64], sizes = [1, 64], strides = [1, 1]} : vector<16x128xf32> to vector<1x64xf32>
    %646 = vector.extract_strided_slice %373 {offsets = [9, 64], sizes = [1, 64], strides = [1, 1]} : vector<16x128xf32> to vector<1x64xf32>
    %647 = tpu.concatenate %645, %646 in 0 : vector<1x64xf32>, vector<1x64xf32> -> vector<2x64xf32>
    %648 = tpu.concatenate %644, %647 in 1 : vector<2x64xf32>, vector<2x64xf32> -> vector<2x128xf32>
    %cst_78 = arith.constant dense<0.000000e+00> : vector<2x128xf32>
    %649 = tpu.matmul %639, %374, %cst_78 {dimension_numbers = #tpu.dot_dimension_numbers<[1], [0], [0], [1], [0, 0, 1, 1], [], []>} : vector<2x32xf32>, vector<32x128xf32>, vector<2x128xf32> -> vector<2x128xf32>
    %650 = arith.addf %648, %649 : vector<2x128xf32>
    %651 = vector.extract_strided_slice %650 {offsets = [0, 0], sizes = [2, 16], strides = [1, 1]} : vector<2x128xf32> to vector<2x16xf32>
    %652 = vector.extract_strided_slice %650 {offsets = [0, 64], sizes = [2, 16], strides = [1, 1]} : vector<2x128xf32> to vector<2x16xf32>
    %653 = tpu.concatenate %651, %652 in 1 : vector<2x16xf32>, vector<2x16xf32> -> vector<2x32xf32>
    %654 = arith.negf %653 : vector<2x32xf32>
    %655 = math.exp %654 : vector<2x32xf32>
    %cst_79 = arith.constant 1.000000e+00 : f32
    %656 = vector.broadcast %cst_79 : f32 to vector<2x32xf32>
    %657 = arith.addf %656, %655 : vector<2x32xf32>
    %658 = arith.divf %656, %657 : vector<2x32xf32>
    %659 = vector.extract_strided_slice %650 {offsets = [0, 16], sizes = [2, 16], strides = [1, 1]} : vector<2x128xf32> to vector<2x16xf32>
    %660 = vector.extract_strided_slice %650 {offsets = [0, 80], sizes = [2, 16], strides = [1, 1]} : vector<2x128xf32> to vector<2x16xf32>
    %661 = tpu.concatenate %659, %660 in 1 : vector<2x16xf32>, vector<2x16xf32> -> vector<2x32xf32>
    %662 = arith.negf %661 : vector<2x32xf32>
    %663 = math.exp %662 : vector<2x32xf32>
    %cst_80 = arith.constant 1.000000e+00 : f32
    %664 = vector.broadcast %cst_80 : f32 to vector<2x32xf32>
    %665 = arith.addf %664, %663 : vector<2x32xf32>
    %666 = arith.divf %664, %665 : vector<2x32xf32>
    %667 = vector.extract_strided_slice %650 {offsets = [0, 32], sizes = [2, 16], strides = [1, 1]} : vector<2x128xf32> to vector<2x16xf32>
    %668 = vector.extract_strided_slice %650 {offsets = [0, 96], sizes = [2, 16], strides = [1, 1]} : vector<2x128xf32> to vector<2x16xf32>
    %669 = tpu.concatenate %667, %668 in 1 : vector<2x16xf32>, vector<2x16xf32> -> vector<2x32xf32>
    %670 = math.tanh %669 : vector<2x32xf32>
    %671 = vector.extract_strided_slice %650 {offsets = [0, 48], sizes = [2, 16], strides = [1, 1]} : vector<2x128xf32> to vector<2x16xf32>
    %672 = vector.extract_strided_slice %650 {offsets = [0, 112], sizes = [2, 16], strides = [1, 1]} : vector<2x128xf32> to vector<2x16xf32>
    %673 = tpu.concatenate %671, %672 in 1 : vector<2x16xf32>, vector<2x16xf32> -> vector<2x32xf32>
    %674 = arith.negf %673 : vector<2x32xf32>
    %675 = math.exp %674 : vector<2x32xf32>
    %cst_81 = arith.constant 1.000000e+00 : f32
    %676 = vector.broadcast %cst_81 : f32 to vector<2x32xf32>
    %677 = arith.addf %676, %675 : vector<2x32xf32>
    %678 = arith.divf %676, %677 : vector<2x32xf32>
    %679 = arith.mulf %666, %637 : vector<2x32xf32>
    %680 = arith.mulf %658, %670 : vector<2x32xf32>
    %681 = arith.addf %679, %680 : vector<2x32xf32>
    %682 = math.tanh %681 : vector<2x32xf32>
    %683 = arith.mulf %678, %682 : vector<2x32xf32>
    %684 = vector.extract_strided_slice %683 {offsets = [0, 0], sizes = [2, 16], strides = [1, 1]} : vector<2x32xf32> to vector<2x16xf32>
    %685 = vector.extract_strided_slice %683 {offsets = [0, 16], sizes = [2, 16], strides = [1, 1]} : vector<2x32xf32> to vector<2x16xf32>
    %686 = vector.extract_strided_slice %373 {offsets = [7, 0], sizes = [1, 64], strides = [1, 1]} : vector<16x128xf32> to vector<1x64xf32>
    %687 = vector.extract_strided_slice %373 {offsets = [15, 0], sizes = [1, 64], strides = [1, 1]} : vector<16x128xf32> to vector<1x64xf32>
    %688 = tpu.concatenate %686, %687 in 0 : vector<1x64xf32>, vector<1x64xf32> -> vector<2x64xf32>
    %689 = vector.extract_strided_slice %373 {offsets = [0, 64], sizes = [1, 64], strides = [1, 1]} : vector<16x128xf32> to vector<1x64xf32>
    %690 = vector.extract_strided_slice %373 {offsets = [8, 64], sizes = [1, 64], strides = [1, 1]} : vector<16x128xf32> to vector<1x64xf32>
    %691 = tpu.concatenate %689, %690 in 0 : vector<1x64xf32>, vector<1x64xf32> -> vector<2x64xf32>
    %692 = tpu.concatenate %688, %691 in 1 : vector<2x64xf32>, vector<2x64xf32> -> vector<2x128xf32>
    %cst_82 = arith.constant dense<0.000000e+00> : vector<2x128xf32>
    %693 = tpu.matmul %683, %374, %cst_82 {dimension_numbers = #tpu.dot_dimension_numbers<[1], [0], [0], [1], [0, 0, 1, 1], [], []>} : vector<2x32xf32>, vector<32x128xf32>, vector<2x128xf32> -> vector<2x128xf32>
    %694 = arith.addf %692, %693 : vector<2x128xf32>
    %695 = vector.extract_strided_slice %694 {offsets = [0, 0], sizes = [2, 16], strides = [1, 1]} : vector<2x128xf32> to vector<2x16xf32>
    %696 = vector.extract_strided_slice %694 {offsets = [0, 64], sizes = [2, 16], strides = [1, 1]} : vector<2x128xf32> to vector<2x16xf32>
    %697 = tpu.concatenate %695, %696 in 1 : vector<2x16xf32>, vector<2x16xf32> -> vector<2x32xf32>
    %698 = arith.negf %697 : vector<2x32xf32>
    %699 = math.exp %698 : vector<2x32xf32>
    %cst_83 = arith.constant 1.000000e+00 : f32
    %700 = vector.broadcast %cst_83 : f32 to vector<2x32xf32>
    %701 = arith.addf %700, %699 : vector<2x32xf32>
    %702 = arith.divf %700, %701 : vector<2x32xf32>
    %703 = vector.extract_strided_slice %694 {offsets = [0, 16], sizes = [2, 16], strides = [1, 1]} : vector<2x128xf32> to vector<2x16xf32>
    %704 = vector.extract_strided_slice %694 {offsets = [0, 80], sizes = [2, 16], strides = [1, 1]} : vector<2x128xf32> to vector<2x16xf32>
    %705 = tpu.concatenate %703, %704 in 1 : vector<2x16xf32>, vector<2x16xf32> -> vector<2x32xf32>
    %706 = arith.negf %705 : vector<2x32xf32>
    %707 = math.exp %706 : vector<2x32xf32>
    %cst_84 = arith.constant 1.000000e+00 : f32
    %708 = vector.broadcast %cst_84 : f32 to vector<2x32xf32>
    %709 = arith.addf %708, %707 : vector<2x32xf32>
    %710 = arith.divf %708, %709 : vector<2x32xf32>
    %711 = vector.extract_strided_slice %694 {offsets = [0, 32], sizes = [2, 16], strides = [1, 1]} : vector<2x128xf32> to vector<2x16xf32>
    %712 = vector.extract_strided_slice %694 {offsets = [0, 96], sizes = [2, 16], strides = [1, 1]} : vector<2x128xf32> to vector<2x16xf32>
    %713 = tpu.concatenate %711, %712 in 1 : vector<2x16xf32>, vector<2x16xf32> -> vector<2x32xf32>
    %714 = math.tanh %713 : vector<2x32xf32>
    %715 = vector.extract_strided_slice %694 {offsets = [0, 48], sizes = [2, 16], strides = [1, 1]} : vector<2x128xf32> to vector<2x16xf32>
    %716 = vector.extract_strided_slice %694 {offsets = [0, 112], sizes = [2, 16], strides = [1, 1]} : vector<2x128xf32> to vector<2x16xf32>
    %717 = tpu.concatenate %715, %716 in 1 : vector<2x16xf32>, vector<2x16xf32> -> vector<2x32xf32>
    %718 = arith.negf %717 : vector<2x32xf32>
    %719 = math.exp %718 : vector<2x32xf32>
    %cst_85 = arith.constant 1.000000e+00 : f32
    %720 = vector.broadcast %cst_85 : f32 to vector<2x32xf32>
    %721 = arith.addf %720, %719 : vector<2x32xf32>
    %722 = arith.divf %720, %721 : vector<2x32xf32>
    %723 = arith.mulf %710, %681 : vector<2x32xf32>
    %724 = arith.mulf %702, %714 : vector<2x32xf32>
    %725 = arith.addf %723, %724 : vector<2x32xf32>
    %726 = math.tanh %725 : vector<2x32xf32>
    %727 = arith.mulf %722, %726 : vector<2x32xf32>
    %728 = vector.extract_strided_slice %727 {offsets = [0, 0], sizes = [2, 16], strides = [1, 1]} : vector<2x32xf32> to vector<2x16xf32>
    %729 = vector.extract_strided_slice %727 {offsets = [0, 16], sizes = [2, 16], strides = [1, 1]} : vector<2x32xf32> to vector<2x16xf32>
    %730 = tpu.concatenate %420, %729 in 1 : vector<2x16xf32>, vector<2x16xf32> -> vector<2x32xf32>
    %731 = vector.extract_strided_slice %375 {offsets = [0, 0], sizes = [2, 1], strides = [1, 1]} : vector<2x8xf32> to vector<2x1xf32>
    %732 = vector.broadcast %731 : vector<2x1xf32> to vector<2x32xf32>
    %733 = arith.mulf %730, %732 : vector<2x32xf32>
    %734 = tpu.concatenate %464, %685 in 1 : vector<2x16xf32>, vector<2x16xf32> -> vector<2x32xf32>
    %735 = vector.extract_strided_slice %375 {offsets = [0, 1], sizes = [2, 1], strides = [1, 1]} : vector<2x8xf32> to vector<2x1xf32>
    %736 = vector.broadcast %735 : vector<2x1xf32> to vector<2x32xf32>
    %737 = arith.mulf %734, %736 : vector<2x32xf32>
    %738 = tpu.concatenate %508, %641 in 1 : vector<2x16xf32>, vector<2x16xf32> -> vector<2x32xf32>
    %739 = vector.extract_strided_slice %375 {offsets = [0, 2], sizes = [2, 1], strides = [1, 1]} : vector<2x8xf32> to vector<2x1xf32>
    %740 = vector.broadcast %739 : vector<2x1xf32> to vector<2x32xf32>
    %741 = arith.mulf %738, %740 : vector<2x32xf32>
    %742 = tpu.concatenate %552, %597 in 1 : vector<2x16xf32>, vector<2x16xf32> -> vector<2x32xf32>
    %743 = vector.extract_strided_slice %375 {offsets = [0, 3], sizes = [2, 1], strides = [1, 1]} : vector<2x8xf32> to vector<2x1xf32>
    %744 = vector.broadcast %743 : vector<2x1xf32> to vector<2x32xf32>
    %745 = arith.mulf %742, %744 : vector<2x32xf32>
    %746 = tpu.concatenate %596, %553 in 1 : vector<2x16xf32>, vector<2x16xf32> -> vector<2x32xf32>
    %747 = vector.extract_strided_slice %375 {offsets = [0, 4], sizes = [2, 1], strides = [1, 1]} : vector<2x8xf32> to vector<2x1xf32>
    %748 = vector.broadcast %747 : vector<2x1xf32> to vector<2x32xf32>
    %749 = arith.mulf %746, %748 : vector<2x32xf32>
    %750 = tpu.concatenate %640, %509 in 1 : vector<2x16xf32>, vector<2x16xf32> -> vector<2x32xf32>
    %751 = vector.extract_strided_slice %375 {offsets = [0, 5], sizes = [2, 1], strides = [1, 1]} : vector<2x8xf32> to vector<2x1xf32>
    %752 = vector.broadcast %751 : vector<2x1xf32> to vector<2x32xf32>
    %753 = arith.mulf %750, %752 : vector<2x32xf32>
    %754 = tpu.concatenate %684, %465 in 1 : vector<2x16xf32>, vector<2x16xf32> -> vector<2x32xf32>
    %755 = vector.extract_strided_slice %375 {offsets = [0, 6], sizes = [2, 1], strides = [1, 1]} : vector<2x8xf32> to vector<2x1xf32>
    %756 = vector.broadcast %755 : vector<2x1xf32> to vector<2x32xf32>
    %757 = arith.mulf %754, %756 : vector<2x32xf32>
    %758 = tpu.concatenate %728, %421 in 1 : vector<2x16xf32>, vector<2x16xf32> -> vector<2x32xf32>
    %759 = vector.extract_strided_slice %375 {offsets = [0, 7], sizes = [2, 1], strides = [1, 1]} : vector<2x8xf32> to vector<2x1xf32>
    %760 = vector.broadcast %759 : vector<2x1xf32> to vector<2x32xf32>
    %761 = arith.mulf %758, %760 : vector<2x32xf32>
    %762 = vector.extract_strided_slice %733 {offsets = [0, 0], sizes = [1, 32], strides = [1, 1]} : vector<2x32xf32> to vector<1x32xf32>
    %763 = vector.extract_strided_slice %737 {offsets = [0, 0], sizes = [1, 32], strides = [1, 1]} : vector<2x32xf32> to vector<1x32xf32>
    %764 = vector.extract_strided_slice %741 {offsets = [0, 0], sizes = [1, 32], strides = [1, 1]} : vector<2x32xf32> to vector<1x32xf32>
    %765 = vector.extract_strided_slice %745 {offsets = [0, 0], sizes = [1, 32], strides = [1, 1]} : vector<2x32xf32> to vector<1x32xf32>
    %766 = vector.extract_strided_slice %749 {offsets = [0, 0], sizes = [1, 32], strides = [1, 1]} : vector<2x32xf32> to vector<1x32xf32>
    %767 = vector.extract_strided_slice %753 {offsets = [0, 0], sizes = [1, 32], strides = [1, 1]} : vector<2x32xf32> to vector<1x32xf32>
    %768 = vector.extract_strided_slice %757 {offsets = [0, 0], sizes = [1, 32], strides = [1, 1]} : vector<2x32xf32> to vector<1x32xf32>
    %769 = vector.extract_strided_slice %761 {offsets = [0, 0], sizes = [1, 32], strides = [1, 1]} : vector<2x32xf32> to vector<1x32xf32>
    %770 = vector.extract_strided_slice %733 {offsets = [1, 0], sizes = [1, 32], strides = [1, 1]} : vector<2x32xf32> to vector<1x32xf32>
    %771 = vector.extract_strided_slice %737 {offsets = [1, 0], sizes = [1, 32], strides = [1, 1]} : vector<2x32xf32> to vector<1x32xf32>
    %772 = vector.extract_strided_slice %741 {offsets = [1, 0], sizes = [1, 32], strides = [1, 1]} : vector<2x32xf32> to vector<1x32xf32>
    %773 = vector.extract_strided_slice %745 {offsets = [1, 0], sizes = [1, 32], strides = [1, 1]} : vector<2x32xf32> to vector<1x32xf32>
    %774 = vector.extract_strided_slice %749 {offsets = [1, 0], sizes = [1, 32], strides = [1, 1]} : vector<2x32xf32> to vector<1x32xf32>
    %775 = vector.extract_strided_slice %753 {offsets = [1, 0], sizes = [1, 32], strides = [1, 1]} : vector<2x32xf32> to vector<1x32xf32>
    %776 = vector.extract_strided_slice %757 {offsets = [1, 0], sizes = [1, 32], strides = [1, 1]} : vector<2x32xf32> to vector<1x32xf32>
    %777 = vector.extract_strided_slice %761 {offsets = [1, 0], sizes = [1, 32], strides = [1, 1]} : vector<2x32xf32> to vector<1x32xf32>
    %778 = tpu.concatenate %762, %763, %764, %765, %766, %767, %768, %769, %770, %771, %772, %773, %774, %775, %776, %777 in 0 : vector<1x32xf32>, vector<1x32xf32>, vector<1x32xf32>, vector<1x32xf32>, vector<1x32xf32>, vector<1x32xf32>, vector<1x32xf32>, vector<1x32xf32>, vector<1x32xf32>, vector<1x32xf32>, vector<1x32xf32>, vector<1x32xf32>, vector<1x32xf32>, vector<1x32xf32>, vector<1x32xf32>, vector<1x32xf32> -> vector<16x32xf32>
    %c0_86 = arith.constant 0 : index
    %c0_87 = arith.constant 0 : index
    %779 = vector.load %arg11[%c0_86, %c0_87] : memref<32x32xf32, #tpu.memory_space<vmem>>, vector<32x32xf32>
    %cst_88 = arith.constant dense<0.000000e+00> : vector<16x32xf32>
    %780 = tpu.matmul %778, %779, %cst_88 {dimension_numbers = #tpu.dot_dimension_numbers<[1], [0], [0], [1], [0, 0, 1, 1], [], []>} : vector<16x32xf32>, vector<32x32xf32>, vector<16x32xf32> -> vector<16x32xf32>
    %c0_89 = arith.constant 0 : index
    %c0_90 = arith.constant 0 : index
    %781 = vector.load %arg12[%c0_89, %c0_90] : memref<32x32xf32, #tpu.memory_space<vmem>>, vector<32x32xf32>
    %cst_91 = arith.constant dense<0.000000e+00> : vector<16x32xf32>
    %782 = tpu.matmul %778, %781, %cst_91 {dimension_numbers = #tpu.dot_dimension_numbers<[1], [0], [0], [1], [0, 0, 1, 1], [], []>} : vector<16x32xf32>, vector<32x32xf32>, vector<16x32xf32> -> vector<16x32xf32>
    %cst_92 = arith.constant dense<0.000000e+00> : vector<16x16xf32>
    %783 = tpu.matmul %780, %782, %cst_92 {dimension_numbers = #tpu.dot_dimension_numbers<[1], [1], [0], [0], [0, 0, 1, 0], [], []>} : vector<16x32xf32>, vector<16x32xf32>, vector<16x16xf32> -> vector<16x16xf32>
    %cst_93 = arith.constant 0.000000e+00 : f32
    %784 = vector.broadcast %cst_93 : f32 to vector<1x1xf32>
    %785 = vector.extract_strided_slice %783 {offsets = [0, 0], sizes = [8, 8], strides = [1, 1]} : vector<16x16xf32> to vector<8x8xf32>
    %786 = arith.negf %785 : vector<8x8xf32>
    %787 = math.exp %786 : vector<8x8xf32>
    %cst_94 = arith.constant 1.000000e+00 : f32
    %788 = vector.broadcast %cst_94 : f32 to vector<8x8xf32>
    %789 = arith.addf %788, %787 : vector<8x8xf32>
    %790 = arith.divf %788, %789 : vector<8x8xf32>
    %c0_95 = arith.constant 0 : index
    %c0_96 = arith.constant 0 : index
    %c0_97 = arith.constant 0 : index
    %791 = vector.load %arg14[%c0_95, %c0_96, %c0_97] : memref<2x8x8xf32, #tpu.memory_space<vmem>>, vector<1x8x8xf32>
    %792 = vector.shape_cast %791 : vector<1x8x8xf32> to vector<8x8xf32>
    %793 = vector.shape_cast %790 : vector<8x8xf32> to vector<1x8x8xf32>
    tpu.vector_store %arg14[%c0_95, %c0_96, %c0_97], %793 {strides = array<i32>} : memref<2x8x8xf32, #tpu.memory_space<vmem>>, vector<1x8x8xf32>,
    %c0_98 = arith.constant 0 : index
    %c0_99 = arith.constant 0 : index
    %c0_100 = arith.constant 0 : index
    %794 = vector.load %arg3[%c0_98, %c0_99, %c0_100] : memref<2x8x8xf32, #tpu.memory_space<vmem>>, vector<1x8x8xf32>
    %795 = vector.shape_cast %794 : vector<1x8x8xf32> to vector<8x8xf32>
    %c0_101 = arith.constant 0 : index
    %c0_102 = arith.constant 0 : index
    %c0_103 = arith.constant 0 : index
    %796 = vector.load %arg4[%c0_101, %c0_102, %c0_103] : memref<2x8x8xf32, #tpu.memory_space<vmem>>, vector<1x8x8xf32>
    %797 = vector.shape_cast %796 : vector<1x8x8xf32> to vector<8x8xf32>
    %798 = math.absf %785 : vector<8x8xf32>
    %cst_104 = arith.constant 0.000000e+00 : f32
    %799 = vector.broadcast %cst_104 : f32 to vector<8x8xf32>
    %800 = arith.subf %799, %798 : vector<8x8xf32>
    %801 = math.exp %800 : vector<8x8xf32>
    %cst_105 = arith.constant 1.000000e+00 : f32
    %802 = vector.broadcast %cst_105 : f32 to vector<8x8xf32>
    %803 = arith.addf %802, %801 : vector<8x8xf32>
    %804 = math.log %803 : vector<8x8xf32>
    %cst_106 = arith.constant 0.000000e+00 : f32
    %805 = vector.broadcast %cst_106 : f32 to vector<8x8xf32>
    %806 = arith.minimumf %785, %805 : vector<8x8xf32>
    %807 = arith.subf %806, %804 : vector<8x8xf32>
    %cst_107 = arith.constant -1.000000e+02 : f32
    %808 = vector.broadcast %cst_107 : f32 to vector<8x8xf32>
    %809 = arith.maximumf %807, %808 : vector<8x8xf32>
    %cst_108 = arith.constant 0.000000e+00 : f32
    %810 = vector.broadcast %cst_108 : f32 to vector<8x8xf32>
    %811 = arith.subf %810, %785 : vector<8x8xf32>
    %cst_109 = arith.constant 0.000000e+00 : f32
    %812 = vector.broadcast %cst_109 : f32 to vector<8x8xf32>
    %813 = arith.minimumf %811, %812 : vector<8x8xf32>
    %814 = arith.subf %813, %804 : vector<8x8xf32>
    %cst_110 = arith.constant -1.000000e+02 : f32
    %815 = vector.broadcast %cst_110 : f32 to vector<8x8xf32>
    %816 = arith.maximumf %814, %815 : vector<8x8xf32>
    %817 = arith.mulf %795, %809 : vector<8x8xf32>
    %cst_111 = arith.constant 1.000000e+00 : f32
    %818 = vector.broadcast %cst_111 : f32 to vector<8x8xf32>
    %819 = arith.subf %818, %795 : vector<8x8xf32>
    %820 = arith.mulf %819, %816 : vector<8x8xf32>
    %821 = arith.addf %817, %820 : vector<8x8xf32>
    %cst_112 = arith.constant 0.000000e+00 : f32
    %822 = vector.broadcast %cst_112 : f32 to vector<8x8xf32>
    %823 = arith.subf %822, %821 : vector<8x8xf32>
    %824 = arith.mulf %823, %797 : vector<8x8xf32>
    %825 = vector.shape_cast %824 : vector<8x8xf32> to vector<1x8x8xf32>
    %cst_113 = arith.constant dense<0.000000e+00> : vector<1xf32>
    %826 = vector.multi_reduction <add>, %825, %cst_113 [1, 2] : vector<1x8x8xf32> to vector<1xf32>
    %827 = vector.shape_cast %826 : vector<1xf32> to vector<1x1x1xf32>
    %828 = vector.extract %827[0, 0, 0] : f32 from vector<1x1x1xf32>
    %829 = vector.broadcast %828 : f32 to vector<1x1xf32>
    %830 = vector.shape_cast %797 : vector<8x8xf32> to vector<1x8x8xf32>
    %cst_114 = arith.constant dense<0.000000e+00> : vector<1xf32>
    %831 = vector.multi_reduction <add>, %830, %cst_114 [1, 2] : vector<1x8x8xf32> to vector<1xf32>
    %832 = vector.shape_cast %831 : vector<1xf32> to vector<1x1x1xf32>
    %833 = vector.extract %832[0, 0, 0] : f32 from vector<1x1x1xf32>
    %834 = vector.broadcast %833 : f32 to vector<1x1xf32>
    %cst_115 = arith.constant 1.000000e+00 : f32
    %835 = vector.broadcast %cst_115 : f32 to vector<1x1xf32>
    %836 = arith.maximumf %834, %835 : vector<1x1xf32>
    %837 = arith.divf %829, %836 : vector<1x1xf32>
    %838 = arith.addf %784, %837 : vector<1x1xf32>
    %839 = vector.extract_strided_slice %783 {offsets = [8, 8], sizes = [8, 8], strides = [1, 1]} : vector<16x16xf32> to vector<8x8xf32>
    %840 = arith.negf %839 : vector<8x8xf32>
    %841 = math.exp %840 : vector<8x8xf32>
    %cst_116 = arith.constant 1.000000e+00 : f32
    %842 = vector.broadcast %cst_116 : f32 to vector<8x8xf32>
    %843 = arith.addf %842, %841 : vector<8x8xf32>
    %844 = arith.divf %842, %843 : vector<8x8xf32>
    %c1 = arith.constant 1 : index
    %c0_117 = arith.constant 0 : index
    %c0_118 = arith.constant 0 : index
    %845 = vector.load %arg14[%c1, %c0_117, %c0_118] : memref<2x8x8xf32, #tpu.memory_space<vmem>>, vector<1x8x8xf32>
    %846 = vector.shape_cast %845 : vector<1x8x8xf32> to vector<8x8xf32>
    %847 = vector.shape_cast %844 : vector<8x8xf32> to vector<1x8x8xf32>
    tpu.vector_store %arg14[%c1, %c0_117, %c0_118], %847 {strides = array<i32>} : memref<2x8x8xf32, #tpu.memory_space<vmem>>, vector<1x8x8xf32>,
    %c1_119 = arith.constant 1 : index
    %c0_120 = arith.constant 0 : index
    %c0_121 = arith.constant 0 : index
    %848 = vector.load %arg3[%c1_119, %c0_120, %c0_121] : memref<2x8x8xf32, #tpu.memory_space<vmem>>, vector<1x8x8xf32>
    %849 = vector.shape_cast %848 : vector<1x8x8xf32> to vector<8x8xf32>
    %c1_122 = arith.constant 1 : index
    %c0_123 = arith.constant 0 : index
    %c0_124 = arith.constant 0 : index
    %850 = vector.load %arg4[%c1_122, %c0_123, %c0_124] : memref<2x8x8xf32, #tpu.memory_space<vmem>>, vector<1x8x8xf32>
    %851 = vector.shape_cast %850 : vector<1x8x8xf32> to vector<8x8xf32>
    %852 = math.absf %839 : vector<8x8xf32>
    %cst_125 = arith.constant 0.000000e+00 : f32
    %853 = vector.broadcast %cst_125 : f32 to vector<8x8xf32>
    %854 = arith.subf %853, %852 : vector<8x8xf32>
    %855 = math.exp %854 : vector<8x8xf32>
    %cst_126 = arith.constant 1.000000e+00 : f32
    %856 = vector.broadcast %cst_126 : f32 to vector<8x8xf32>
    %857 = arith.addf %856, %855 : vector<8x8xf32>
    %858 = math.log %857 : vector<8x8xf32>
    %cst_127 = arith.constant 0.000000e+00 : f32
    %859 = vector.broadcast %cst_127 : f32 to vector<8x8xf32>
    %860 = arith.minimumf %839, %859 : vector<8x8xf32>
    %861 = arith.subf %860, %858 : vector<8x8xf32>
    %cst_128 = arith.constant -1.000000e+02 : f32
    %862 = vector.broadcast %cst_128 : f32 to vector<8x8xf32>
    %863 = arith.maximumf %861, %862 : vector<8x8xf32>
    %cst_129 = arith.constant 0.000000e+00 : f32
    %864 = vector.broadcast %cst_129 : f32 to vector<8x8xf32>
    %865 = arith.subf %864, %839 : vector<8x8xf32>
    %cst_130 = arith.constant 0.000000e+00 : f32
    %866 = vector.broadcast %cst_130 : f32 to vector<8x8xf32>
    %867 = arith.minimumf %865, %866 : vector<8x8xf32>
    %868 = arith.subf %867, %858 : vector<8x8xf32>
    %cst_131 = arith.constant -1.000000e+02 : f32
    %869 = vector.broadcast %cst_131 : f32 to vector<8x8xf32>
    %870 = arith.maximumf %868, %869 : vector<8x8xf32>
    %871 = arith.mulf %849, %863 : vector<8x8xf32>
    %cst_132 = arith.constant 1.000000e+00 : f32
    %872 = vector.broadcast %cst_132 : f32 to vector<8x8xf32>
    %873 = arith.subf %872, %849 : vector<8x8xf32>
    %874 = arith.mulf %873, %870 : vector<8x8xf32>
    %875 = arith.addf %871, %874 : vector<8x8xf32>
    %cst_133 = arith.constant 0.000000e+00 : f32
    %876 = vector.broadcast %cst_133 : f32 to vector<8x8xf32>
    %877 = arith.subf %876, %875 : vector<8x8xf32>
    %878 = arith.mulf %877, %851 : vector<8x8xf32>
    %879 = vector.shape_cast %878 : vector<8x8xf32> to vector<1x8x8xf32>
    %cst_134 = arith.constant dense<0.000000e+00> : vector<1xf32>
    %880 = vector.multi_reduction <add>, %879, %cst_134 [1, 2] : vector<1x8x8xf32> to vector<1xf32>
    %881 = vector.shape_cast %880 : vector<1xf32> to vector<1x1x1xf32>
    %882 = vector.extract %881[0, 0, 0] : f32 from vector<1x1x1xf32>
    %883 = vector.broadcast %882 : f32 to vector<1x1xf32>
    %884 = vector.shape_cast %851 : vector<8x8xf32> to vector<1x8x8xf32>
    %cst_135 = arith.constant dense<0.000000e+00> : vector<1xf32>
    %885 = vector.multi_reduction <add>, %884, %cst_135 [1, 2] : vector<1x8x8xf32> to vector<1xf32>
    %886 = vector.shape_cast %885 : vector<1xf32> to vector<1x1x1xf32>
    %887 = vector.extract %886[0, 0, 0] : f32 from vector<1x1x1xf32>
    %888 = vector.broadcast %887 : f32 to vector<1x1xf32>
    %cst_136 = arith.constant 1.000000e+00 : f32
    %889 = vector.broadcast %cst_136 : f32 to vector<1x1xf32>
    %890 = arith.maximumf %888, %889 : vector<1x1xf32>
    %891 = arith.divf %883, %890 : vector<1x1xf32>
    %892 = arith.addf %838, %891 : vector<1x1xf32>
    %cst_137 = arith.constant 2.000000e+00 : f32
    %893 = vector.broadcast %cst_137 : f32 to vector<1x1xf32>
    %894 = arith.divf %892, %893 : vector<1x1xf32>
    %c0_138 = arith.constant 0 : index
    %c0_139 = arith.constant 0 : index
    %895 = vector.load %arg13[%c0_138, %c0_139] : memref<1x1xf32, #tpu.memory_space<vmem>>, vector<1x1xf32>
    tpu.vector_store %arg13[%c0_138, %c0_139], %894 {strides = array<i32>} : memref<1x1xf32, #tpu.memory_space<vmem>>, vector<1x1xf32>,
    return
  }
}

</mosaic_0001>

<bundles_post_ra>
// kernel: forward.1
= control target key start
LH: loop header
LB: loop body
LE: loop exit
PB: predicated region body
PF: predicated region fallthrough
CT: control target
= control target key end

     0   :  { %20 = vsyncpa [#allocation3], 0  ;;  %vm75_vm0 = vcmask 261120   ;;  %v4601_v6 = vmov 0.0   ;;  %s5599_s0 = inlined_call_operand.vmem [shape: f32[128,32], index: 0, kind: input, shape index: {}]   ;;  %s5600_s1 = inlined_call_operand.vmem [shape: f32[16,8], index: 1, kind: input, shape index: {}]   ;;  %s5601_s2 = inlined_call_operand.vmem [shape: f32[2,8], index: 2, kind: input, shape index: {}]   ;;  %s5602_s3 = inlined_call_operand.vmem [shape: f32[2,8,8], index: 3, kind: input, shape index: {}]   ;;  %s5603_s4 = inlined_call_operand.vmem [shape: f32[2,8,8], index: 4, kind: input, shape index: {}]   ;;  %s5604_s5 = inlined_call_operand.vmem [shape: f32[32,128], index: 5, kind: input, shape index: {}]   ;;  %s5605_s6 = inlined_call_operand.vmem [shape: f32[1,128], index: 6, kind: input, shape index: {}]   ;;  %s5606_s7 = inlined_call_operand.vmem [shape: f32[32,128], index: 7, kind: input, shape index: {}]   ;;  %s5607_s8 = inlined_call_operand.vmem [shape: f32[32,128], index: 8, kind: input, shape index: {}]   ;;  %s5608_s9 = inlined_call_operand.vmem [shape: f32[1,128], index: 9, kind: input, shape index: {}]   ;;  %s5609_s10 = inlined_call_operand.vmem [shape: f32[32,128], index: 10, kind: input, shape index: {}]   ;;  %s5610_s11 = inlined_call_operand.vmem [shape: f32[32,32], index: 11, kind: input, shape index: {}]   ;;  %s5611_s12 = inlined_call_operand.vmem [shape: f32[32,32], index: 12, kind: input, shape index: {}]   ;;  %s5612_s13 = inlined_call_operand.hbm [shape: f32[1,1], index: 13, kind: output, shape index: {0}]   ;;  %s5613_s14 = inlined_call_operand.hbm [shape: f32[2,8,8], index: 14, kind: output, shape index: {1}]  }
   0x1   :  { %v64_v0 = vld [vmem:[%s5604_s5] sm:$0xff]  ;;  %v65_v1 = vld [vmem:[%s5604_s5 + $0x8] sm:$0xff]  ;;  %v66_v2 = vld [vmem:[%s5604_s5 + $0x10] sm:$0xff]  ;;  %3738 = vmatprep.mubr.f32.mxu1 %v4601_v6 }
   0x2   :  { %v3946_v3 = vpack.c.bf16 %v65_v1, %v64_v0  ;;  %v67_v4 = vld [vmem:[%s5604_s5 + $0x18] sm:$0xff]  ;;  %v48_v5 = vld [vmem:[%s5599_s0] sm:$0xff]  ;;  %v270_v9 = vld [vmem:[%s5606_s7 + $0x8] sm:$0xff] }
   0x3   :  { %v3950_v7 = vpack.c.bf16 %v67_v4, %v66_v2  ;;  %3706 = vmatprep.mubr.msk.f32.mxu0 %vm75_vm0, %v48_v5  ;;  %v269_v8 = vld [vmem:[%s5606_s7] sm:$0xff]  ;;  %v271_v11 = vld [vmem:[%s5606_s7 + $0x10] sm:$0xff]  ;;  %v272_v12 = vld [vmem:[%s5606_s7 + $0x18] sm:$0xff] }
   0x4   :  { %3947 = vmatprep.subr.bf16.mxu0 %v3946_v3  ;;  %v4721_v10 = vpack.c.bf16 %v270_v9, %v269_v8  ;;  %v49_v13 = vld [vmem:[%s5599_s0 + $0x8] sm:$0xff]  ;;  %v4733_v14 = vpack.c.bf16 %v272_v12, %v271_v11 }
   0x5   :  { %3949 = vmatpush3.bf16.msra.mxu0 %v3946_v3 }
   0x6   :  { %3951 = vmatprep.subr.bf16.mxu0 %v3950_v7  ;;  %3955 = vmatprep.subr.bf16.mxu1 %v4721_v10 }
   0x9   :  { %3953 = vmatpush3.bf16.msra.mxu0 %v3950_v7 }
   0xa   :  { %21 = vsyncpa [#allocation5], 0  ;;  %v50_v15 = vld [vmem:[%s5599_s0 + $0x10] sm:$0xff]  ;;  %3957 = vmatpush3.bf16.msra.mxu1 %v4721_v10  ;;  %3987 = vmatprep.subr.bf16.mxu0 %v4721_v10  ;;  %v51_v16 = vld [vmem:[%s5599_s0 + $0x18] sm:$0xff]  ;;  %vm275_vm1 = vcmask 523264   ;;  %s4604_s5 = smov 112  }
   0xb   :  { %3959 = vmatprep.subr.bf16.mxu1 %v4733_v14  ;;  %v52_v17 = vld [vmem:[%s5599_s0 + $0x20] sm:$0xff]  ;;  %v53_v18 = vld [vmem:[%s5599_s0 + $0x28] sm:$0xff]  ;;  %v54_v19 = vld [vmem:[%s5599_s0 + $0x30] sm:$0xff]  ;;  %s4605_s27 = smov 96   ;;  %s4606_s28 = smov 48   ;;  %vm366_vm2 = vcmask 130048  }
   0xc   :  { %3707 = vmatmul.mubr.msk.f32.vlgmr.msra.gmra.mrb[0].mxu0 %vm75_vm0, %v49_v13  ;;  %v55_v20 = vld [vmem:[%s5599_s0 + $0x38] sm:$0xff]  ;;  %v56_v21 = vld [vmem:[%s5599_s0 + $0x40] sm:$0xff]  ;;  %v57_v22 = vld [vmem:[%s5599_s0 + $0x48] sm:$0xff]  ;;  %s4607_s29 = smov 32   ;;  %vm4617_vm3 = vmmov 0   ;;  %vm1918_vm4 = vcmask 1040384  }
   0xd   :  { %3709 = vmatprep.mubr.msk.f32.mxu0 %vm75_vm0, %v50_v15  ;;  %3989 = vmatpush3.bf16.msra.mxu0 %v4721_v10  ;;  %v58_v23 = vld [vmem:[%s5599_s0 + $0x50] sm:$0xff]  ;;  %v59_v24 = vld [vmem:[%s5599_s0 + $0x58] sm:$0xff]  ;;  %v60_v25 = vld [vmem:[%s5599_s0 + $0x60] sm:$0xff]  ;;  %vm3013_vm5 = vcmask 1041408   ;;  %vm3015_vm6 = vcmask 1042432   ;;  %vm3017_vm7 = vcmask 1043456  }
   0xe   :  { %3961 = vmatpush3.bf16.msra.mxu1 %v4733_v14  ;;  %3991 = vmatprep.subr.bf16.mxu0 %v4733_v14  ;;  %v61_v26 = vld [vmem:[%s5599_s0 + $0x68] sm:$0xff]  ;;  %v62_v27 = vld [vmem:[%s5599_s0 + $0x70] sm:$0xff]  ;;  %v63_v28 = vld [vmem:[%s5599_s0 + $0x78] sm:$0xff]  ;;  %s4602_s0 = smov 80   ;;  %vm3019_vm8 = vcmask 1044480   ;;  %vm3021_vm9 = vcmask 1045504  }
   0xf   :  { %3963 = vmatprep.subr.bf16.mxu1 %v4721_v10  ;;  %v3443_v31 = vld [vmem:[%s5605_s6] ss:$0 sm:$0xff]  ;;  %s4603_s6 = smov 64   ;;  %vm3023_vm10 = vcmask 1046528   ;;  %vm4091_vm11 = vmpackc.low %vm75_vm0, %vm75_vm0  ;;  %vm3289_vm12 = vcmask 64512  }
  0x10   :  { %3710 = vmatmul.mubr.msk.f32.gmra.mrb[2].mxu0 %vm75_vm0, %v51_v16 }
  0x11   :  { %3712 = vmatprep.mubr.msk.f32.mxu0 %vm75_vm0, %v52_v17  ;;  %3739 = vmatmul.mubr.f32.vlgmr.msra.gmra.mrb[0].mxu1 %v4601_v6 }
  0x12   :  { %3965 = vmatpush3.bf16.msra.mxu1 %v4721_v10  ;;  %3993 = vmatpush3.bf16.msra.mxu0 %v4733_v14 }
  0x13   :  { %3967 = vmatprep.subr.bf16.mxu1 %v4733_v14  ;;  %4003 = vmatprep.subr.bf16.mxu0 %v4721_v10 }
  0x14   :  { %3713 = vmatmul.mubr.msk.f32.gmra.mrb[4].mxu0 %vm75_vm0, %v53_v18 }
  0x15   :  { %3715 = vmatprep.mubr.msk.f32.mxu0 %vm75_vm0, %v54_v19 }
  0x16   :  { %3969 = vmatpush3.bf16.msra.mxu1 %v4733_v14 }
  0x17   :  { %3971 = vmatprep.subr.bf16.mxu1 %v4721_v10 }
  0x18   :  { %3716 = vmatmul.mubr.msk.f32.gmra.mrb[6].mxu0 %vm75_vm0, %v55_v20 }
  0x19   :  { %3718 = vmatprep.mubr.msk.f32.mxu0 %vm75_vm0, %v56_v21 }
  0x1c   :  { %3719 = vmatmul.mubr.msk.f32.gmra.mrb[8].mxu0 %vm75_vm0, %v57_v22 }
  0x1d   :  { %3721 = vmatprep.mubr.msk.f32.mxu0 %vm75_vm0, %v58_v23 }
  0x20   :  { %3722 = vmatmul.mubr.msk.f32.gmra.mrb[10].mxu0 %vm75_vm0, %v59_v24 }
  0x21   :  { %3724 = vmatprep.mubr.msk.f32.mxu0 %vm75_vm0, %v60_v25 }
  0x24   :  { %3725 = vmatmul.mubr.msk.f32.gmra.mrb[12].mxu0 %vm75_vm0, %v61_v26 }
  0x25   :  { %3727 = vmatprep.mubr.msk.f32.mxu0 %vm75_vm0, %v62_v27 }
  0x28   :  { %3728 = vmatmul.mubr.msk.f32.gmra.mrb[14].mxu0 %vm75_vm0, %v63_v28 }
  0xdf   :  { %v3708_v29 = vpop.f32.mrb[0].mxu0 }
  0xe0   :  { %v190_v30 = vpop.f32.mrb[1].mxu0  ;;  %v196_v8 = vadd.f32 %v3708_v29, %v3443_v31 }
  0xe1   :  { %v191_v12 = vadd.f32 %v3443_v31, %v190_v30 }
  0xe3   :  { %v3711_v32 = vpop.f32.mrb[2].mxu0 }
  0xe4   :  { %v206_v33 = vadd.f32 %v3711_v32, %v3443_v31  ;;  %v200_v34 = vpop.f32.mrb[3].mxu0  ;;  %v3740_v35 = vpop.f32.mrb[0].mxu1 }
  0xe5   :  { %v201_v36 = vadd.f32 %v3443_v31, %v200_v34  ;;  %v347_v37 = vpop.f32.mrb[1].mxu1 }
  0xe7   :  { %v3714_v38 = vpop.f32.mrb[4].mxu0 }
  0xe8   :  { %v216_v39 = vadd.f32 %v3714_v38, %v3443_v31  ;;  %v210_v40 = vpop.f32.mrb[5].mxu0 }
  0xe9   :  { %v211_v41 = vadd.f32 %v3443_v31, %v210_v40 }
  0xeb   :  { %v3717_v42 = vpop.f32.mrb[6].mxu0 }
  0xec   :  { %v226_v43 = vadd.f32 %v3717_v42, %v3443_v31  ;;  %v220_v44 = vpop.f32.mrb[7].mxu0 }
  0xed   :  { %v221_v45 = vadd.f32 %v3443_v31, %v220_v44 }
  0xef   :  { %v3720_v46 = vpop.f32.mrb[8].mxu0 }
  0xf0   :  { %v236_v47 = vadd.f32 %v3720_v46, %v3443_v31  ;;  %v230_v48 = vpop.f32.mrb[9].mxu0 }
  0xf1   :  { %v231_v49 = vadd.f32 %v3443_v31, %v230_v48 }
  0xf2   :  { %v4810_v50 = vsel %vm275_vm1, %v226_v43, %v236_v47  ;;  %v4813_v51 = vsel %vm275_vm1, %v236_v47, %v226_v43 }
  0xf3   :  { %v3723_v52 = vpop.f32.mrb[10].mxu0  ;;  %v4816_v53 = vsel %vm275_vm1, %v221_v45, %v231_v49  ;;  %v4819_v54 = vsel %vm275_vm1, %v231_v49, %v221_v45 }
  0xf4   :  { %v246_v55 = vadd.f32 %v3723_v52, %v3443_v31  ;;  %v240_v56 = vpop.f32.mrb[11].mxu0 }
  0xf5   :  { %v241_v57 = vadd.f32 %v3443_v31, %v240_v56 }
  0xf6   :  { %v4822_v58 = vsel %vm275_vm1, %v216_v39, %v246_v55  ;;  %v4825_v59 = vsel %vm275_vm1, %v246_v55, %v216_v39 }
  0xf7   :  { %v3726_v60 = vpop.f32.mrb[12].mxu0  ;;  %v4828_v61 = vsel %vm275_vm1, %v211_v41, %v241_v57  ;;  %v4831_v62 = vsel %vm275_vm1, %v241_v57, %v211_v41 }
  0xf8   :  { %v256_v63 = vadd.f32 %v3726_v60, %v3443_v31  ;;  %v250_v0 = vpop.f32.mrb[13].mxu0 }
  0xf9   :  { %v251_v1 = vadd.f32 %v3443_v31, %v250_v0 }
  0xfa   :  { %v4834_v2 = vsel %vm275_vm1, %v206_v33, %v256_v63  ;;  %v4837_v3 = vsel %vm275_vm1, %v256_v63, %v206_v33 }
  0xfb   :  { %v3729_v4 = vpop.f32.mrb[14].mxu0  ;;  %v4840_v5 = vsel %vm275_vm1, %v201_v36, %v251_v1  ;;  %v4843_v7 = vsel %vm275_vm1, %v251_v1, %v201_v36 }
  0xfc   :  { %v266_v9 = vadd.f32 %v3729_v4, %v3443_v31  ;;  %v260_v11 = vpop.f32.mrb[15].mxu0 }
  0xfd   :  { %v261_v13 = vadd.f32 %v3443_v31, %v260_v11 }
  0xfe   :  { %v277_v15 = vsel %vm275_vm1, %v196_v8, %v266_v9  ;;  %v4847_v16 = vsel %vm275_vm1, %v266_v9, %v196_v8 }
  0xff   :  { %v357_v17 = vadd.f32 %v3740_v35, %v277_v15  ;;  %v276_v18 = vsel %vm275_vm1, %v191_v12, %v261_v13  ;;  %v4851_v19 = vsel %vm275_vm1, %v261_v13, %v191_v12 }
 0x100   :  { %v356_v20 = vadd.f32 %v347_v37, %v276_v18 }
 0x101   :  { %362 = vrot.lane.b32.xlu1 %v357_v17, %s4602_s0 }
 0x102   :  { %360 = vrot.lane.b32.xlu0 %v356_v20, %s4602_s0 }
 0x105   :  { %387 = vrot.lane.b32.xlu1 %v356_v20, %s4603_s6 }
 0x106   :  { %381 = vrot.lane.b32.xlu0 %v356_v20, %s4604_s5 }
 0x109   :  { %389 = vrot.lane.b32.xlu1 %v357_v17, %s4603_s6 }
 0x10a   :  { %383 = vrot.lane.b32.xlu0 %v357_v17, %s4604_s5 }
 0x10d   :  { %409 = vrot.lane.b32.xlu1 %v357_v17, %s4605_s27 }
 0x10e   :  { %407 = vrot.lane.b32.xlu0 %v356_v20, %s4605_s27 }
 0x111   :  { %413 = vrot.lane.b32.xlu1 %v356_v20, %s4606_s28 }
 0x112   :  { %423 = vrot.lane.b32.xlu0 %v356_v20, %s4607_s29 }
 0x115   :  { %425 = vrot.lane.b32.xlu1 %v357_v17, %s4607_s29 }
 0x116   :  { %415 = vrot.lane.b32.xlu0 %v357_v17, %s4606_s28 }
 0x173   :  { %v363_v21 = vpop.permute.xlu1 %362 }
 0x174   :  { %v368_v22 = vsel %vm366_vm2, %v357_v17, %v363_v21  ;;  %v361_v23 = vpop.permute.xlu0 %360 }
 0x175   :  { %v367_v24 = vsel %vm366_vm2, %v356_v20, %v361_v23  ;;  %v3461_v26 = vmul.f32 -1.442695, %v368_v22 }
 0x176   :  { %v3460_v25 = vmul.f32 -1.442695, %v367_v24 }
 0x177   :  { %v388_v27 = vpop.permute.xlu1 %387 }
 0x178   :  { %4149 = vpow2.f32 %v3460_v25  ;;  %v382_v28 = vpop.permute.xlu0 %381 }
 0x179   :  { %v393_v29 = vsel %vm366_vm2, %v382_v28, %v388_v27  ;;  %4151 = vpow2.f32 %v3461_v26 }
 0x17a   :  { %v3462_v30 = vmul.f32 -1.442695, %v393_v29 }
 0x17b   :  { %v390_v31 = vpop.permute.xlu1 %389 }
 0x17c   :  { %4153 = vpow2.f32 %v3462_v30  ;;  %v384_v32 = vpop.permute.xlu0 %383 }
 0x17d   :  { %v394_v33 = vsel %vm366_vm2, %v384_v32, %v390_v31 }
 0x17e   :  { %v3463_v34 = vmul.f32 -1.442695, %v394_v33 }
 0x17f   :  { %v410_v35 = vpop.permute.xlu1 %409 }
 0x180   :  { %4155 = vpow2.f32 %v3463_v34  ;;  %v408_v36 = vpop.permute.xlu0 %407 }
 0x182   :  { %v4150_v37 = vpop.eup %4149 }
 0x183   :  { %v375_v38 = vadd.f32 1.0, %v4150_v37  ;;  %v414_v39 = vpop.permute.xlu1 %413  ;;  %v4152_v42 = vpop.eup %4151 }
 0x184   :  { %v419_v40 = vsel %vm366_vm2, %v408_v36, %v414_v39  ;;  %v424_v41 = vpop.permute.xlu0 %423  ;;  %v376_v48 = vadd.f32 1.0, %v4152_v42 }
 0x185   :  { %v429_v43 = vsel %vm366_vm2, %v361_v23, %v424_v41  ;;  %4157 = vrcp.f32 %v375_v38 }
 0x186   :  { %v4154_v44 = vpop.eup %4153  ;;  %v3464_v45 = vmul.f32 -1.442695, %v429_v43  ;;  %4159 = vtanh.f32 %v419_v40 }
 0x187   :  { %v401_v46 = vadd.f32 1.0, %v4154_v44  ;;  %v426_v47 = vpop.permute.xlu1 %425 }
 0x188   :  { %4161 = vpow2.f32 %v3464_v45  ;;  %v430_v49 = vsel %vm366_vm2, %v363_v21, %v426_v47  ;;  %v416_v52 = vpop.permute.xlu0 %415 }
 0x189   :  { %4163 = vrcp.f32 %v401_v46  ;;  %v3465_v55 = vmul.f32 -1.442695, %v430_v49  ;;  %v420_v56 = vsel %vm366_vm2, %v410_v35, %v416_v52 }
 0x18a   :  { %v4156_v57 = vpop.eup %4155  ;;  %4165 = vtanh.f32 %v420_v56 }
 0x18b   :  { %v402_v60 = vadd.f32 1.0, %v4156_v57  ;;  %4167 = vpow2.f32 %v3465_v55 }
 0x18c   :  { %4169 = vrcp.f32 %v376_v48 }
 0x18d   :  { %4171 = vrcp.f32 %v402_v60 }
 0x18f   :  { %v4158_v63 = vpop.eup %4157 }
 0x190   :  { %v4160_v0 = vpop.eup %4159 }
 0x191   :  { %v445_v12 = vmul.f32 %v4160_v0, %v4158_v63 }
 0x192   :  { %v4162_v1 = vpop.eup %4161 }
 0x193   :  { %v4164_v4 = vpop.eup %4163  ;;  %v437_v8 = vadd.f32 1.0, %v4162_v1 }
 0x194   :  { %v4166_v9 = vpop.eup %4165  ;;  %v443_v11 = vmul.f32 0.0, %v4164_v4 }
 0x195   :  { %v4168_v13 = vpop.eup %4167  ;;  %4173 = vrcp.f32 %v437_v8 }
 0x196   :  { %v4170_v15 = vpop.eup %4169  ;;  %v4873_v17 = vadd.f32 %v445_v12, %v443_v11  ;;  %v438_v20 = vadd.f32 1.0, %v4168_v13 }
 0x197   :  { %v4172_v18 = vpop.eup %4171  ;;  %v446_v22 = vmul.f32 %v4170_v15, %v4166_v9 }
 0x198   :  { %v444_v21 = vmul.f32 0.0, %v4172_v18  ;;  %4175 = vtanh.f32 %v4873_v17 }
 0x199   :  { %4177 = vrcp.f32 %v438_v20 }
 0x19a   :  { %v4876_v23 = vadd.f32 %v446_v22, %v444_v21 }
 0x19c   :  { %4179 = vtanh.f32 %v4876_v23 }
 0x19f   :  { %v4174_v24 = vpop.eup %4173 }
 0x1a2   :  { %v4176_v25 = vpop.eup %4175 }
 0x1a3   :  { %v4879_v26 = vmul.f32 %v4176_v25, %v4174_v24  ;;  %v4178_v27 = vpop.eup %4177 }
 0x1a5   :  { %3749 = vmatprep.mubr.msk.f32.mxu1 %vm75_vm0, %v4879_v26 }
 0x1a6   :  { %v4180_v28 = vpop.eup %4179 }
 0x1a7   :  { %v4883_v29 = vmul.f32 %v4180_v28, %v4178_v27 }
 0x1a9   :  { %3750 = vmatmul.mubr.msk.f32.vlgmr.msra.gmra.mrb[2].mxu1 %vm75_vm0, %v4883_v29 }
 0x1aa   :  { %3973 = vmatpush3.bf16.msra.mxu1 %v4721_v10 }
 0x1ab   :  { %3975 = vmatprep.subr.bf16.mxu1 %v4733_v14 }
 0x1ae   :  { %3977 = vmatpush3.bf16.msra.mxu1 %v4733_v14 }
 0x1af   :  { %3979 = vmatprep.subr.bf16.mxu1 %v4721_v10 }
 0x27c   :  { %v3751_v30 = vpop.f32.mrb[2].mxu1 }
 0x27d   :  { %v537_v31 = vadd.f32 %v3751_v30, %v4834_v2  ;;  %v527_v32 = vpop.f32.mrb[3].mxu1 }
 0x27e   :  { %v536_v33 = vadd.f32 %v527_v32, %v4840_v5 }
 0x27f   :  { %542 = vrot.lane.b32.xlu1 %v537_v31, %s4602_s0 }
 0x280   :  { %540 = vrot.lane.b32.xlu0 %v536_v33, %s4602_s0 }
 0x283   :  { %560 = vrot.lane.b32.xlu1 %v536_v33, %s4604_s5 }
 0x284   :  { %566 = vrot.lane.b32.xlu0 %v536_v33, %s4603_s6 }
 0x287   :  { %568 = vrot.lane.b32.xlu1 %v537_v31, %s4603_s6 }
 0x288   :  { %562 = vrot.lane.b32.xlu0 %v537_v31, %s4604_s5 }
 0x28b   :  { %588 = vrot.lane.b32.xlu1 %v537_v31, %s4605_s27 }
 0x28c   :  { %586 = vrot.lane.b32.xlu0 %v536_v33, %s4605_s27 }
 0x28f   :  { %592 = vrot.lane.b32.xlu1 %v536_v33, %s4606_s28 }
 0x290   :  { %602 = vrot.lane.b32.xlu0 %v536_v33, %s4607_s29 }
 0x293   :  { %604 = vrot.lane.b32.xlu1 %v537_v31, %s4607_s29 }
 0x294   :  { %594 = vrot.lane.b32.xlu0 %v537_v31, %s4606_s28 }
 0x2f1   :  { %v543_v2 = vpop.permute.xlu1 %542 }
 0x2f2   :  { %v547_v5 = vsel %vm366_vm2, %v537_v31, %v543_v2  ;;  %v541_v34 = vpop.permute.xlu0 %540 }
 0x2f3   :  { %v546_v35 = vsel %vm366_vm2, %v536_v33, %v541_v34  ;;  %v3469_v37 = vmul.f32 -1.442695, %v547_v5 }
 0x2f4   :  { %v3468_v36 = vmul.f32 -1.442695, %v546_v35 }
 0x2f5   :  { %v561_v38 = vpop.permute.xlu1 %560 }
 0x2f6   :  { %4181 = vpow2.f32 %v3468_v36  ;;  %v567_v39 = vpop.permute.xlu0 %566 }
 0x2f7   :  { %v572_v40 = vsel %vm366_vm2, %v561_v38, %v567_v39  ;;  %4183 = vpow2.f32 %v3469_v37 }
 0x2f8   :  { %v3470_v41 = vmul.f32 -1.442695, %v572_v40 }
 0x2f9   :  { %v569_v42 = vpop.permute.xlu1 %568 }
 0x2fa   :  { %4185 = vpow2.f32 %v3470_v41  ;;  %v563_v43 = vpop.permute.xlu0 %562 }
 0x2fb   :  { %v573_v44 = vsel %vm366_vm2, %v563_v43, %v569_v42 }
 0x2fc   :  { %v3471_v45 = vmul.f32 -1.442695, %v573_v44 }
 0x2fd   :  { %v589_v46 = vpop.permute.xlu1 %588 }
 0x2fe   :  { %4187 = vpow2.f32 %v3471_v45  ;;  %v587_v47 = vpop.permute.xlu0 %586 }
 0x300   :  { %v4182_v48 = vpop.eup %4181 }
 0x301   :  { %v554_v49 = vadd.f32 1.0, %v4182_v48  ;;  %v593_v52 = vpop.permute.xlu1 %592  ;;  %v4184_v57 = vpop.eup %4183 }
 0x302   :  { %v598_v55 = vsel %vm366_vm2, %v587_v47, %v593_v52  ;;  %v603_v56 = vpop.permute.xlu0 %602  ;;  %v555_v8 = vadd.f32 1.0, %v4184_v57 }
 0x303   :  { %v608_v60 = vsel %vm366_vm2, %v541_v34, %v603_v56  ;;  %4189 = vrcp.f32 %v554_v49 }
 0x304   :  { %v4186_v63 = vpop.eup %4185  ;;  %v3472_v0 = vmul.f32 -1.442695, %v608_v60  ;;  %4191 = vtanh.f32 %v598_v55 }
 0x305   :  { %v580_v1 = vadd.f32 1.0, %v4186_v63  ;;  %v605_v4 = vpop.permute.xlu1 %604 }
 0x306   :  { %4193 = vpow2.f32 %v3472_v0  ;;  %v609_v9 = vsel %vm366_vm2, %v543_v2, %v605_v4  ;;  %v595_v11 = vpop.permute.xlu0 %594 }
 0x307   :  { %4195 = vrcp.f32 %v580_v1  ;;  %v3473_v12 = vmul.f32 -1.442695, %v609_v9  ;;  %v599_v13 = vsel %vm366_vm2, %v589_v46, %v595_v11 }
 0x308   :  { %v4188_v15 = vpop.eup %4187  ;;  %4197 = vtanh.f32 %v599_v13 }
 0x309   :  { %v581_v18 = vadd.f32 1.0, %v4188_v15  ;;  %4199 = vpow2.f32 %v3473_v12 }
 0x30a   :  { %4201 = vrcp.f32 %v555_v8 }
 0x30b   :  { %4203 = vrcp.f32 %v581_v18 }
 0x30d   :  { %v4190_v20 = vpop.eup %4189 }
 0x30e   :  { %v4192_v21 = vpop.eup %4191 }
 0x30f   :  { %v624_v30 = vmul.f32 %v4192_v21, %v4190_v20 }
 0x310   :  { %v4194_v22 = vpop.eup %4193 }
 0x311   :  { %v4196_v24 = vpop.eup %4195  ;;  %v616_v25 = vadd.f32 1.0, %v4194_v22 }
 0x312   :  { %v4198_v27 = vpop.eup %4197  ;;  %v622_v28 = vmul.f32 %v4196_v24, %v4873_v17 }
 0x313   :  { %v4200_v31 = vpop.eup %4199  ;;  %4205 = vrcp.f32 %v616_v25 }
 0x314   :  { %v4202_v32 = vpop.eup %4201  ;;  %v4914_v33 = vadd.f32 %v624_v30, %v622_v28  ;;  %v617_v5 = vadd.f32 1.0, %v4200_v31 }
 0x315   :  { %v4204_v2 = vpop.eup %4203  ;;  %v625_v35 = vmul.f32 %v4202_v32, %v4198_v27 }
 0x316   :  { %v623_v34 = vmul.f32 %v4204_v2, %v4876_v23  ;;  %4207 = vtanh.f32 %v4914_v33 }
 0x317   :  { %4209 = vrcp.f32 %v617_v5 }
 0x318   :  { %v4918_v36 = vadd.f32 %v625_v35, %v623_v34 }
 0x31a   :  { %4211 = vtanh.f32 %v4918_v36 }
 0x31d   :  { %v4206_v37 = vpop.eup %4205 }
 0x320   :  { %v4208_v17 = vpop.eup %4207 }
 0x321   :  { %v4921_v38 = vmul.f32 %v4208_v17, %v4206_v37  ;;  %v4210_v39 = vpop.eup %4209 }
 0x323   :  { %3760 = vmatprep.mubr.msk.f32.mxu1 %vm75_vm0, %v4921_v38 }
 0x324   :  { %v4212_v40 = vpop.eup %4211 }
 0x325   :  { %v4925_v41 = vmul.f32 %v4212_v40, %v4210_v39 }
 0x327   :  { %3761 = vmatmul.mubr.msk.f32.vlgmr.msra.gmra.mrb[4].mxu1 %vm75_vm0, %v4925_v41 }
 0x328   :  { %3981 = vmatpush3.bf16.msra.mxu1 %v4721_v10 }
 0x329   :  { %3983 = vmatprep.subr.bf16.mxu1 %v4733_v14 }
 0x32c   :  { %3985 = vmatpush3.bf16.msra.mxu1 %v4733_v14 }
 0x32d   :  { %3995 = vmatprep.subr.bf16.mxu1 %v4721_v10 }
 0x3fa   :  { %v3762_v23 = vpop.f32.mrb[4].mxu1 }
 0x3fb   :  { %v716_v42 = vadd.f32 %v3762_v23, %v4822_v58  ;;  %v706_v43 = vpop.f32.mrb[5].mxu1 }
 0x3fc   :  { %v715_v44 = vadd.f32 %v706_v43, %v4828_v61 }
 0x3fd   :  { %721 = vrot.lane.b32.xlu1 %v716_v42, %s4602_s0 }
 0x3fe   :  { %719 = vrot.lane.b32.xlu0 %v715_v44, %s4602_s0 }
 0x401   :  { %739 = vrot.lane.b32.xlu1 %v715_v44, %s4604_s5 }
 0x402   :  { %745 = vrot.lane.b32.xlu0 %v715_v44, %s4603_s6 }
 0x405   :  { %747 = vrot.lane.b32.xlu1 %v716_v42, %s4603_s6 }
 0x406   :  { %741 = vrot.lane.b32.xlu0 %v716_v42, %s4604_s5 }
 0x409   :  { %767 = vrot.lane.b32.xlu1 %v716_v42, %s4605_s27 }
 0x40a   :  { %765 = vrot.lane.b32.xlu0 %v715_v44, %s4605_s27 }
 0x40d   :  { %771 = vrot.lane.b32.xlu1 %v715_v44, %s4606_s28 }
 0x40e   :  { %781 = vrot.lane.b32.xlu0 %v715_v44, %s4607_s29 }
 0x411   :  { %783 = vrot.lane.b32.xlu1 %v716_v42, %s4607_s29 }
 0x412   :  { %773 = vrot.lane.b32.xlu0 %v716_v42, %s4606_s28 }
 0x46f   :  { %v722_v58 = vpop.permute.xlu1 %721 }
 0x470   :  { %v726_v61 = vsel %vm366_vm2, %v716_v42, %v722_v58  ;;  %v720_v45 = vpop.permute.xlu0 %719 }
 0x471   :  { %v725_v46 = vsel %vm366_vm2, %v715_v44, %v720_v45  ;;  %v3477_v48 = vmul.f32 -1.442695, %v726_v61 }
 0x472   :  { %v3476_v47 = vmul.f32 -1.442695, %v725_v46 }
 0x473   :  { %v740_v49 = vpop.permute.xlu1 %739 }
 0x474   :  { %4213 = vpow2.f32 %v3476_v47  ;;  %v746_v52 = vpop.permute.xlu0 %745 }
 0x475   :  { %v751_v55 = vsel %vm366_vm2, %v740_v49, %v746_v52  ;;  %4215 = vpow2.f32 %v3477_v48 }
 0x476   :  { %v3478_v56 = vmul.f32 -1.442695, %v751_v55 }
 0x477   :  { %v748_v57 = vpop.permute.xlu1 %747 }
 0x478   :  { %4217 = vpow2.f32 %v3478_v56  ;;  %v742_v60 = vpop.permute.xlu0 %741 }
 0x479   :  { %v752_v63 = vsel %vm366_vm2, %v742_v60, %v748_v57 }
 0x47a   :  { %v3479_v0 = vmul.f32 -1.442695, %v752_v63 }
 0x47b   :  { %v768_v1 = vpop.permute.xlu1 %767 }
 0x47c   :  { %4219 = vpow2.f32 %v3479_v0  ;;  %v766_v4 = vpop.permute.xlu0 %765 }
 0x47e   :  { %v4214_v8 = vpop.eup %4213 }
 0x47f   :  { %v733_v9 = vadd.f32 1.0, %v4214_v8  ;;  %v772_v11 = vpop.permute.xlu1 %771  ;;  %v4216_v15 = vpop.eup %4215 }
 0x480   :  { %v777_v12 = vsel %vm366_vm2, %v766_v4, %v772_v11  ;;  %v782_v13 = vpop.permute.xlu0 %781  ;;  %v734_v25 = vadd.f32 1.0, %v4216_v15 }
 0x481   :  { %v787_v18 = vsel %vm366_vm2, %v720_v45, %v782_v13  ;;  %4221 = vrcp.f32 %v733_v9 }
 0x482   :  { %v4218_v20 = vpop.eup %4217  ;;  %v3480_v21 = vmul.f32 -1.442695, %v787_v18  ;;  %4223 = vtanh.f32 %v777_v12 }
 0x483   :  { %v759_v22 = vadd.f32 1.0, %v4218_v20  ;;  %v784_v24 = vpop.permute.xlu1 %783 }
 0x484   :  { %4225 = vpow2.f32 %v3480_v21  ;;  %v788_v27 = vsel %vm366_vm2, %v722_v58, %v784_v24  ;;  %v774_v28 = vpop.permute.xlu0 %773 }
 0x485   :  { %4227 = vrcp.f32 %v759_v22  ;;  %v3481_v30 = vmul.f32 -1.442695, %v788_v27  ;;  %v778_v31 = vsel %vm366_vm2, %v768_v1, %v774_v28 }
 0x486   :  { %v4220_v32 = vpop.eup %4219  ;;  %4229 = vtanh.f32 %v778_v31 }
 0x487   :  { %v760_v2 = vadd.f32 1.0, %v4220_v32  ;;  %4231 = vpow2.f32 %v3481_v30 }
 0x488   :  { %4233 = vrcp.f32 %v734_v25 }
 0x489   :  { %4235 = vrcp.f32 %v760_v2 }
 0x48b   :  { %v4222_v5 = vpop.eup %4221 }
 0x48c   :  { %v4224_v34 = vpop.eup %4223 }
 0x48d   :  { %v803_v23 = vmul.f32 %v4224_v34, %v4222_v5 }
 0x48e   :  { %v4226_v35 = vpop.eup %4225 }
 0x48f   :  { %v4228_v37 = vpop.eup %4227  ;;  %v795_v17 = vadd.f32 1.0, %v4226_v35 }
 0x490   :  { %v4230_v39 = vpop.eup %4229  ;;  %v801_v40 = vmul.f32 %v4228_v37, %v4914_v33 }
 0x491   :  { %v4232_v42 = vpop.eup %4231  ;;  %4237 = vrcp.f32 %v795_v17 }
 0x492   :  { %v4234_v43 = vpop.eup %4233  ;;  %v4956_v44 = vadd.f32 %v803_v23, %v801_v40  ;;  %v796_v61 = vadd.f32 1.0, %v4232_v42 }
 0x493   :  { %v4236_v58 = vpop.eup %4235  ;;  %v804_v46 = vmul.f32 %v4234_v43, %v4230_v39 }
 0x494   :  { %v802_v45 = vmul.f32 %v4236_v58, %v4918_v36  ;;  %4239 = vtanh.f32 %v4956_v44 }
 0x495   :  { %4241 = vrcp.f32 %v796_v61 }
 0x496   :  { %v4960_v47 = vadd.f32 %v804_v46, %v802_v45 }
 0x498   :  { %4243 = vtanh.f32 %v4960_v47 }
 0x49b   :  { %v4238_v48 = vpop.eup %4237 }
 0x49e   :  { %v4240_v33 = vpop.eup %4239 }
 0x49f   :  { %v4963_v49 = vmul.f32 %v4240_v33, %v4238_v48  ;;  %v4242_v52 = vpop.eup %4241 }
 0x4a1   :  { %3771 = vmatprep.mubr.msk.f32.mxu1 %vm75_vm0, %v4963_v49 }
 0x4a2   :  { %v4244_v55 = vpop.eup %4243 }
 0x4a3   :  { %v4967_v56 = vmul.f32 %v4244_v55, %v4242_v52 }
 0x4a5   :  { %3772 = vmatmul.mubr.msk.f32.vlgmr.msra.gmra.mrb[6].mxu1 %vm75_vm0, %v4967_v56 }
 0x4a6   :  { %3997 = vmatpush3.bf16.msra.mxu1 %v4721_v10 }
 0x4a7   :  { %3999 = vmatprep.subr.bf16.mxu1 %v4733_v14 }
 0x4aa   :  { %4001 = vmatpush3.bf16.msra.mxu1 %v4733_v14 }
 0x4ab   :  { %4011 = vmatprep.subr.bf16.mxu1 %v4721_v10 }
 0x578   :  { %v3773_v36 = vpop.f32.mrb[6].mxu1 }
 0x579   :  { %v895_v57 = vadd.f32 %v3773_v36, %v4810_v50  ;;  %v885_v60 = vpop.f32.mrb[7].mxu1 }
 0x57a   :  { %v894_v63 = vadd.f32 %v885_v60, %v4816_v53 }
 0x57b   :  { %900 = vrot.lane.b32.xlu1 %v895_v57, %s4602_s0 }
 0x57c   :  { %898 = vrot.lane.b32.xlu0 %v894_v63, %s4602_s0 }
 0x57f   :  { %918 = vrot.lane.b32.xlu1 %v894_v63, %s4604_s5 }
 0x580   :  { %924 = vrot.lane.b32.xlu0 %v894_v63, %s4603_s6 }
 0x583   :  { %926 = vrot.lane.b32.xlu1 %v895_v57, %s4603_s6 }
 0x584   :  { %920 = vrot.lane.b32.xlu0 %v895_v57, %s4604_s5 }
 0x587   :  { %946 = vrot.lane.b32.xlu1 %v895_v57, %s4605_s27 }
 0x588   :  { %944 = vrot.lane.b32.xlu0 %v894_v63, %s4605_s27 }
 0x58b   :  { %950 = vrot.lane.b32.xlu1 %v894_v63, %s4606_s28 }
 0x58c   :  { %960 = vrot.lane.b32.xlu0 %v894_v63, %s4607_s29 }
 0x58f   :  { %962 = vrot.lane.b32.xlu1 %v895_v57, %s4607_s29 }
 0x590   :  { %952 = vrot.lane.b32.xlu0 %v895_v57, %s4606_s28 }
 0x5ed   :  { %v901_v50 = vpop.permute.xlu1 %900 }
 0x5ee   :  { %v905_v53 = vsel %vm366_vm2, %v895_v57, %v901_v50  ;;  %v899_v0 = vpop.permute.xlu0 %898 }
 0x5ef   :  { %v904_v1 = vsel %vm366_vm2, %v894_v63, %v899_v0  ;;  %v3485_v8 = vmul.f32 -1.442695, %v905_v53 }
 0x5f0   :  { %v3484_v4 = vmul.f32 -1.442695, %v904_v1 }
 0x5f1   :  { %v919_v9 = vpop.permute.xlu1 %918 }
 0x5f2   :  { %4245 = vpow2.f32 %v3484_v4  ;;  %v925_v11 = vpop.permute.xlu0 %924 }
 0x5f3   :  { %v930_v12 = vsel %vm366_vm2, %v919_v9, %v925_v11  ;;  %4247 = vpow2.f32 %v3485_v8 }
 0x5f4   :  { %v3486_v13 = vmul.f32 -1.442695, %v930_v12 }
 0x5f5   :  { %v927_v15 = vpop.permute.xlu1 %926 }
 0x5f6   :  { %4249 = vpow2.f32 %v3486_v13  ;;  %v921_v18 = vpop.permute.xlu0 %920 }
 0x5f7   :  { %v931_v20 = vsel %vm366_vm2, %v921_v18, %v927_v15 }
 0x5f8   :  { %v3487_v21 = vmul.f32 -1.442695, %v931_v20 }
 0x5f9   :  { %v947_v22 = vpop.permute.xlu1 %946 }
 0x5fa   :  { %4251 = vpow2.f32 %v3487_v21  ;;  %v945_v24 = vpop.permute.xlu0 %944 }
 0x5fc   :  { %v4246_v25 = vpop.eup %4245 }
 0x5fd   :  { %v912_v27 = vadd.f32 1.0, %v4246_v25  ;;  %v951_v28 = vpop.permute.xlu1 %950  ;;  %v4248_v32 = vpop.eup %4247 }
 0x5fe   :  { %v956_v30 = vsel %vm366_vm2, %v945_v24, %v951_v28  ;;  %v961_v31 = vpop.permute.xlu0 %960  ;;  %v913_v17 = vadd.f32 1.0, %v4248_v32 }
 0x5ff   :  { %v966_v2 = vsel %vm366_vm2, %v899_v0, %v961_v31  ;;  %4253 = vrcp.f32 %v912_v27 }
 0x600   :  { %v4250_v5 = vpop.eup %4249  ;;  %v3488_v34 = vmul.f32 -1.442695, %v966_v2  ;;  %4255 = vtanh.f32 %v956_v30 }
 0x601   :  { %v938_v35 = vadd.f32 1.0, %v4250_v5  ;;  %v963_v37 = vpop.permute.xlu1 %962 }
 0x602   :  { %4257 = vpow2.f32 %v3488_v34  ;;  %v967_v39 = vsel %vm366_vm2, %v901_v50, %v963_v37  ;;  %v953_v40 = vpop.permute.xlu0 %952 }
 0x603   :  { %4259 = vrcp.f32 %v938_v35  ;;  %v3489_v23 = vmul.f32 -1.442695, %v967_v39  ;;  %v957_v42 = vsel %vm366_vm2, %v947_v22, %v953_v40 }
 0x604   :  { %v4252_v43 = vpop.eup %4251  ;;  %4261 = vtanh.f32 %v957_v42 }
 0x605   :  { %v939_v58 = vadd.f32 1.0, %v4252_v43  ;;  %4263 = vpow2.f32 %v3489_v23 }
 0x606   :  { %4265 = vrcp.f32 %v913_v17 }
 0x607   :  { %4267 = vrcp.f32 %v939_v58 }
 0x609   :  { %v4254_v61 = vpop.eup %4253 }
 0x60a   :  { %v4256_v45 = vpop.eup %4255 }
 0x60b   :  { %v982_v36 = vmul.f32 %v4256_v45, %v4254_v61 }
 0x60c   :  { %v4258_v46 = vpop.eup %4257 }
 0x60d   :  { %v4260_v48 = vpop.eup %4259  ;;  %v974_v33 = vadd.f32 1.0, %v4258_v46 }
 0x60e   :  { %v4262_v52 = vpop.eup %4261  ;;  %v980_v55 = vmul.f32 %v4260_v48, %v4956_v44 }
 0x60f   :  { %v4264_v57 = vpop.eup %4263  ;;  %4269 = vrcp.f32 %v974_v33 }
 0x610   :  { %v4266_v60 = vpop.eup %4265  ;;  %v4998_v63 = vadd.f32 %v982_v36, %v980_v55  ;;  %v975_v53 = vadd.f32 1.0, %v4264_v57 }
 0x611   :  { %v4268_v50 = vpop.eup %4267  ;;  %v983_v1 = vmul.f32 %v4266_v60, %v4262_v52 }
 0x612   :  { %v981_v0 = vmul.f32 %v4268_v50, %v4960_v47  ;;  %4271 = vtanh.f32 %v4998_v63 }
 0x613   :  { %4273 = vrcp.f32 %v975_v53 }
 0x614   :  { %v5002_v4 = vadd.f32 %v983_v1, %v981_v0 }
 0x616   :  { %4275 = vtanh.f32 %v5002_v4 }
 0x619   :  { %v4270_v8 = vpop.eup %4269 }
 0x61c   :  { %v4272_v44 = vpop.eup %4271 }
 0x61d   :  { %v5005_v9 = vmul.f32 %v4272_v44, %v4270_v8  ;;  %v4274_v11 = vpop.eup %4273 }
 0x61f   :  { %3782 = vmatprep.mubr.msk.f32.mxu0 %vm75_vm0, %v5005_v9 }
 0x620   :  { %v4276_v12 = vpop.eup %4275 }
 0x621   :  { %v5009_v13 = vmul.f32 %v4276_v12, %v4274_v11 }
 0x623   :  { %3783 = vmatmul.mubr.msk.f32.vlgmr.msra.gmra.mrb[16].mxu0 %vm75_vm0, %v5009_v13 }
 0x624   :  { %4005 = vmatpush3.bf16.msra.mxu0 %v4721_v10 }
 0x625   :  { %4007 = vmatprep.subr.bf16.mxu0 %v4733_v14 }
 0x628   :  { %4009 = vmatpush3.bf16.msra.mxu0 %v4733_v14 }
 0x6f6   :  { %v3784_v47 = vpop.f32.mrb[16].mxu0 }
 0x6f7   :  { %v1074_v15 = vadd.f32 %v3784_v47, %v4813_v51  ;;  %v1064_v18 = vpop.f32.mrb[17].mxu0 }
 0x6f8   :  { %v1073_v20 = vadd.f32 %v1064_v18, %v4819_v54 }
 0x6f9   :  { %1079 = vrot.lane.b32.xlu1 %v1074_v15, %s4602_s0 }
 0x6fa   :  { %1077 = vrot.lane.b32.xlu0 %v1073_v20, %s4602_s0 }
 0x6fd   :  { %1097 = vrot.lane.b32.xlu1 %v1073_v20, %s4604_s5 }
 0x6fe   :  { %1103 = vrot.lane.b32.xlu0 %v1073_v20, %s4603_s6 }
 0x701   :  { %1105 = vrot.lane.b32.xlu1 %v1074_v15, %s4603_s6 }
 0x702   :  { %1099 = vrot.lane.b32.xlu0 %v1074_v15, %s4604_s5 }
 0x705   :  { %1125 = vrot.lane.b32.xlu1 %v1074_v15, %s4605_s27 }
 0x706   :  { %1123 = vrot.lane.b32.xlu0 %v1073_v20, %s4605_s27 }
 0x709   :  { %1129 = vrot.lane.b32.xlu1 %v1073_v20, %s4606_s28 }
 0x70a   :  { %1139 = vrot.lane.b32.xlu0 %v1073_v20, %s4607_s29 }
 0x70d   :  { %1141 = vrot.lane.b32.xlu1 %v1074_v15, %s4607_s29 }
 0x70e   :  { %1131 = vrot.lane.b32.xlu0 %v1074_v15, %s4606_s28 }
 0x76b   :  { %v1080_v51 = vpop.permute.xlu1 %1079 }
 0x76c   :  { %v1084_v54 = vsel %vm366_vm2, %v1074_v15, %v1080_v51  ;;  %v1078_v21 = vpop.permute.xlu0 %1077 }
 0x76d   :  { %v1083_v22 = vsel %vm366_vm2, %v1073_v20, %v1078_v21  ;;  %v3493_v25 = vmul.f32 -1.442695, %v1084_v54 }
 0x76e   :  { %v3492_v24 = vmul.f32 -1.442695, %v1083_v22 }
 0x76f   :  { %v1098_v27 = vpop.permute.xlu1 %1097 }
 0x770   :  { %4277 = vpow2.f32 %v3492_v24  ;;  %v1104_v28 = vpop.permute.xlu0 %1103 }
 0x771   :  { %v1109_v30 = vsel %vm366_vm2, %v1098_v27, %v1104_v28  ;;  %4279 = vpow2.f32 %v3493_v25 }
 0x772   :  { %v3494_v31 = vmul.f32 -1.442695, %v1109_v30 }
 0x773   :  { %v1106_v32 = vpop.permute.xlu1 %1105 }
 0x774   :  { %4281 = vpow2.f32 %v3494_v31  ;;  %v1100_v2 = vpop.permute.xlu0 %1099 }
 0x775   :  { %v1110_v5 = vsel %vm366_vm2, %v1100_v2, %v1106_v32 }
 0x776   :  { %v3495_v34 = vmul.f32 -1.442695, %v1110_v5 }
 0x777   :  { %v1126_v35 = vpop.permute.xlu1 %1125 }
 0x778   :  { %4283 = vpow2.f32 %v3495_v34  ;;  %v1124_v37 = vpop.permute.xlu0 %1123 }
 0x77a   :  { %v4278_v17 = vpop.eup %4277 }
 0x77b   :  { %v1091_v39 = vadd.f32 1.0, %v4278_v17  ;;  %v1130_v40 = vpop.permute.xlu1 %1129  ;;  %v4280_v43 = vpop.eup %4279 }
 0x77c   :  { %v1135_v23 = vsel %vm366_vm2, %v1124_v37, %v1130_v40  ;;  %v1140_v42 = vpop.permute.xlu0 %1139  ;;  %v1092_v33 = vadd.f32 1.0, %v4280_v43 }
 0x77d   :  { %v1145_v58 = vsel %vm366_vm2, %v1078_v21, %v1140_v42  ;;  %4285 = vrcp.f32 %v1091_v39 }
 0x77e   :  { %v4282_v61 = vpop.eup %4281  ;;  %v3496_v45 = vmul.f32 -1.442695, %v1145_v58  ;;  %4287 = vtanh.f32 %v1135_v23 }
 0x77f   :  { %v1117_v46 = vadd.f32 1.0, %v4282_v61  ;;  %v1142_v48 = vpop.permute.xlu1 %1141 }
 0x780   :  { %4289 = vpow2.f32 %v3496_v45  ;;  %v1146_v52 = vsel %vm366_vm2, %v1080_v51, %v1142_v48  ;;  %v1132_v55 = vpop.permute.xlu0 %1131 }
 0x781   :  { %4291 = vrcp.f32 %v1117_v46  ;;  %v3497_v36 = vmul.f32 -1.442695, %v1146_v52  ;;  %v1136_v57 = vsel %vm366_vm2, %v1126_v35, %v1132_v55 }
 0x782   :  { %v4284_v60 = vpop.eup %4283  ;;  %4293 = vtanh.f32 %v1136_v57 }
 0x783   :  { %v1118_v50 = vadd.f32 1.0, %v4284_v60  ;;  %4295 = vpow2.f32 %v3497_v36 }
 0x784   :  { %4297 = vrcp.f32 %v1092_v33 }
 0x785   :  { %4299 = vrcp.f32 %v1118_v50 }
 0x787   :  { %v4286_v53 = vpop.eup %4285 }
 0x788   :  { %v4288_v0 = vpop.eup %4287 }
 0x789   :  { %v1161_v47 = vmul.f32 %v4288_v0, %v4286_v53 }
 0x78a   :  { %v4290_v1 = vpop.eup %4289 }
 0x78b   :  { %v4292_v8 = vpop.eup %4291  ;;  %v1153_v44 = vadd.f32 1.0, %v4290_v1 }
 0x78c   :  { %v4294_v11 = vpop.eup %4293  ;;  %v1159_v12 = vmul.f32 %v4292_v8, %v4998_v63 }
 0x78d   :  { %v4296_v15 = vpop.eup %4295  ;;  %4301 = vrcp.f32 %v1153_v44 }
 0x78e   :  { %v4298_v18 = vpop.eup %4297  ;;  %v5039_v20 = vadd.f32 %v1161_v47, %v1159_v12  ;;  %v1154_v54 = vadd.f32 1.0, %v4296_v15 }
 0x78f   :  { %v4300_v51 = vpop.eup %4299  ;;  %v1162_v22 = vmul.f32 %v4298_v18, %v4294_v11 }
 0x790   :  { %v1160_v21 = vmul.f32 %v4300_v51, %v5002_v4  ;;  %4303 = vtanh.f32 %v5039_v20 }
 0x791   :  { %4305 = vrcp.f32 %v1154_v54 }
 0x792   :  { %v5043_v24 = vadd.f32 %v1162_v22, %v1160_v21 }
 0x794   :  { %4307 = vtanh.f32 %v5043_v24 }
 0x797   :  { %v4302_v25 = vpop.eup %4301 }
 0x79a   :  { %v4304_v63 = vpop.eup %4303 }
 0x79b   :  { %v5046_v27 = vmul.f32 %v4304_v63, %v4302_v25  ;;  %v4306_v28 = vpop.eup %4305 }
 0x79d   :  { %3793 = vmatprep.mubr.msk.f32.mxu1 %vm75_vm0, %v5046_v27 }
 0x79e   :  { %v4308_v30 = vpop.eup %4307 }
 0x79f   :  { %v5050_v31 = vmul.f32 %v4308_v30, %v4306_v28 }
 0x7a1   :  { %3794 = vmatmul.mubr.msk.f32.vlgmr.msra.gmra.mrb[8].mxu1 %vm75_vm0, %v5050_v31 }
 0x7a2   :  { %4013 = vmatpush3.bf16.msra.mxu1 %v4721_v10 }
 0x7a3   :  { %4015 = vmatprep.subr.bf16.mxu1 %v4733_v14 }
 0x7a6   :  { %4017 = vmatpush3.bf16.msra.mxu1 %v4733_v14 }
 0x874   :  { %v3795_v4 = vpop.f32.mrb[8].mxu1 }
 0x875   :  { %v1253_v32 = vadd.f32 %v3795_v4, %v4825_v59  ;;  %v1243_v2 = vpop.f32.mrb[9].mxu1 }
 0x876   :  { %v1252_v5 = vadd.f32 %v1243_v2, %v4831_v62 }
 0x877   :  { %1258 = vrot.lane.b32.xlu1 %v1253_v32, %s4602_s0 }
 0x878   :  { %1256 = vrot.lane.b32.xlu0 %v1252_v5, %s4602_s0 }
 0x87b   :  { %1276 = vrot.lane.b32.xlu1 %v1252_v5, %s4604_s5 }
 0x87c   :  { %1282 = vrot.lane.b32.xlu0 %v1252_v5, %s4603_s6 }
 0x87f   :  { %1284 = vrot.lane.b32.xlu1 %v1253_v32, %s4603_s6 }
 0x880   :  { %1278 = vrot.lane.b32.xlu0 %v1253_v32, %s4604_s5 }
 0x883   :  { %1304 = vrot.lane.b32.xlu1 %v1253_v32, %s4605_s27 }
 0x884   :  { %1302 = vrot.lane.b32.xlu0 %v1252_v5, %s4605_s27 }
 0x887   :  { %1308 = vrot.lane.b32.xlu1 %v1252_v5, %s4606_s28 }
 0x888   :  { %1318 = vrot.lane.b32.xlu0 %v1252_v5, %s4607_s29 }
 0x88b   :  { %1320 = vrot.lane.b32.xlu1 %v1253_v32, %s4607_s29 }
 0x88c   :  { %1310 = vrot.lane.b32.xlu0 %v1253_v32, %s4606_s28 }
 0x8e9   :  { %v1259_v10 = vpop.permute.xlu1 %1258 }
 0x8ea   :  { %v1263_v14 = vsel %vm366_vm2, %v1253_v32, %v1259_v10  ;;  %v1257_v59 = vpop.permute.xlu0 %1256 }
 0x8eb   :  { %v1262_v62 = vsel %vm366_vm2, %v1252_v5, %v1257_v59  ;;  %v3501_v35 = vmul.f32 -1.442695, %v1263_v14 }
 0x8ec   :  { %v3500_v34 = vmul.f32 -1.442695, %v1262_v62 }
 0x8ed   :  { %v1277_v37 = vpop.permute.xlu1 %1276 }
 0x8ee   :  { %4309 = vpow2.f32 %v3500_v34  ;;  %v1283_v17 = vpop.permute.xlu0 %1282 }
 0x8ef   :  { %v1288_v39 = vsel %vm366_vm2, %v1277_v37, %v1283_v17  ;;  %4311 = vpow2.f32 %v3501_v35 }
 0x8f0   :  { %v3502_v40 = vmul.f32 -1.442695, %v1288_v39 }
 0x8f1   :  { %v1285_v23 = vpop.permute.xlu1 %1284 }
 0x8f2   :  { %4313 = vpow2.f32 %v3502_v40  ;;  %v1279_v42 = vpop.permute.xlu0 %1278 }
 0x8f3   :  { %v1289_v43 = vsel %vm366_vm2, %v1279_v42, %v1285_v23 }
 0x8f4   :  { %v3503_v58 = vmul.f32 -1.442695, %v1289_v43 }
 0x8f5   :  { %v1305_v61 = vpop.permute.xlu1 %1304 }
 0x8f6   :  { %4315 = vpow2.f32 %v3503_v58  ;;  %v1303_v45 = vpop.permute.xlu0 %1302 }
 0x8f8   :  { %v4310_v46 = vpop.eup %4309 }
 0x8f9   :  { %v1270_v48 = vadd.f32 1.0, %v4310_v46  ;;  %v1309_v33 = vpop.permute.xlu1 %1308  ;;  %v4312_v36 = vpop.eup %4311 }
 0x8fa   :  { %v1314_v52 = vsel %vm366_vm2, %v1303_v45, %v1309_v33  ;;  %v1319_v55 = vpop.permute.xlu0 %1318  ;;  %v1271_v1 = vadd.f32 1.0, %v4312_v36 }
 0x8fb   :  { %v1324_v57 = vsel %vm366_vm2, %v1257_v59, %v1319_v55  ;;  %4317 = vrcp.f32 %v1270_v48 }
 0x8fc   :  { %v4314_v60 = vpop.eup %4313  ;;  %v3504_v50 = vmul.f32 -1.442695, %v1324_v57  ;;  %4319 = vtanh.f32 %v1314_v52 }
 0x8fd   :  { %v1296_v53 = vadd.f32 1.0, %v4314_v60  ;;  %v1321_v0 = vpop.permute.xlu1 %1320 }
 0x8fe   :  { %4321 = vpow2.f32 %v3504_v50  ;;  %v1325_v8 = vsel %vm366_vm2, %v1259_v10, %v1321_v0  ;;  %v1311_v44 = vpop.permute.xlu0 %1310 }
 0x8ff   :  { %4323 = vrcp.f32 %v1296_v53  ;;  %v3505_v11 = vmul.f32 -1.442695, %v1325_v8  ;;  %v1315_v12 = vsel %vm366_vm2, %v1305_v61, %v1311_v44 }
 0x900   :  { %v4316_v47 = vpop.eup %4315  ;;  %4325 = vtanh.f32 %v1315_v12 }
 0x901   :  { %v1297_v15 = vadd.f32 1.0, %v4316_v47  ;;  %4327 = vpow2.f32 %v3505_v11 }
 0x902   :  { %4329 = vrcp.f32 %v1271_v1 }
 0x903   :  { %4331 = vrcp.f32 %v1297_v15 }
 0x905   :  { %v4318_v18 = vpop.eup %4317 }
 0x906   :  { %v4320_v51 = vpop.eup %4319 }
 0x907   :  { %v1340_v28 = vmul.f32 %v4320_v51, %v4318_v18 }
 0x908   :  { %v4322_v54 = vpop.eup %4321 }
 0x909   :  { %v4324_v21 = vpop.eup %4323  ;;  %v1332_v22 = vadd.f32 1.0, %v4322_v54 }
 0x90a   :  { %v4326_v25 = vpop.eup %4325  ;;  %v1338_v63 = vmul.f32 %v4324_v21, %v5039_v20 }
 0x90b   :  { %v4328_v30 = vpop.eup %4327  ;;  %4333 = vrcp.f32 %v1332_v22 }
 0x90c   :  { %v4330_v4 = vpop.eup %4329  ;;  %v5080_v32 = vadd.f32 %v1340_v28, %v1338_v63  ;;  %v1333_v5 = vadd.f32 1.0, %v4328_v30 }
 0x90d   :  { %v4332_v2 = vpop.eup %4331  ;;  %v1341_v14 = vmul.f32 %v4330_v4, %v4326_v25 }
 0x90e   :  { %v1339_v10 = vmul.f32 %v4332_v2, %v5043_v24  ;;  %4335 = vtanh.f32 %v5080_v32 }
 0x90f   :  { %4337 = vrcp.f32 %v1333_v5 }
 0x910   :  { %v5084_v59 = vadd.f32 %v1341_v14, %v1339_v10 }
 0x912   :  { %4339 = vtanh.f32 %v5084_v59 }
 0x915   :  { %v4334_v62 = vpop.eup %4333 }
 0x918   :  { %v4336_v20 = vpop.eup %4335 }
 0x919   :  { %v5087_v34 = vmul.f32 %v4336_v20, %v4334_v62  ;;  %v4338_v35 = vpop.eup %4337 }
 0x91b   :  { %3804 = vmatprep.mubr.msk.f32.mxu0 %vm75_vm0, %v5087_v34 }
 0x91c   :  { %v4340_v37 = vpop.eup %4339 }
 0x91d   :  { %v5091_v17 = vmul.f32 %v4340_v37, %v4338_v35 }
 0x91f   :  { %3805 = vmatmul.mubr.msk.f32.vlgmr.msra.gmra.mrb[18].mxu0 %vm75_vm0, %v5091_v17 }
 0x9f2   :  { %v3806_v24 = vpop.f32.mrb[18].mxu0 }
 0x9f3   :  { %v1432_v39 = vadd.f32 %v3806_v24, %v4837_v3  ;;  %v1422_v40 = vpop.f32.mrb[19].mxu0 }
 0x9f4   :  { %v1431_v23 = vadd.f32 %v1422_v40, %v4843_v7 }
 0x9f5   :  { %1437 = vrot.lane.b32.xlu1 %v1432_v39, %s4602_s0 }
 0x9f6   :  { %1435 = vrot.lane.b32.xlu0 %v1431_v23, %s4602_s0 }
 0x9f9   :  { %1455 = vrot.lane.b32.xlu1 %v1431_v23, %s4604_s5 }
 0x9fa   :  { %1461 = vrot.lane.b32.xlu0 %v1431_v23, %s4603_s6 }
 0x9fd   :  { %1463 = vrot.lane.b32.xlu1 %v1432_v39, %s4603_s6 }
 0x9fe   :  { %1457 = vrot.lane.b32.xlu0 %v1432_v39, %s4604_s5 }
 0xa01   :  { %1483 = vrot.lane.b32.xlu1 %v1432_v39, %s4605_s27 }
 0xa02   :  { %1481 = vrot.lane.b32.xlu0 %v1431_v23, %s4605_s27 }
 0xa05   :  { %1487 = vrot.lane.b32.xlu1 %v1431_v23, %s4606_s28 }
 0xa06   :  { %1497 = vrot.lane.b32.xlu0 %v1431_v23, %s4607_s29 }
 0xa09   :  { %1499 = vrot.lane.b32.xlu1 %v1432_v39, %s4607_s29 }
 0xa0a   :  { %1489 = vrot.lane.b32.xlu0 %v1432_v39, %s4606_s28 }
 0xa67   :  { %v1438_v3 = vpop.permute.xlu1 %1437 }
 0xa68   :  { %v1442_v7 = vsel %vm366_vm2, %v1432_v39, %v1438_v3  ;;  %v1436_v42 = vpop.permute.xlu0 %1435 }
 0xa69   :  { %v1441_v43 = vsel %vm366_vm2, %v1431_v23, %v1436_v42  ;;  %v3509_v61 = vmul.f32 -1.442695, %v1442_v7 }
 0xa6a   :  { %v3508_v58 = vmul.f32 -1.442695, %v1441_v43 }
 0xa6b   :  { %v1456_v45 = vpop.permute.xlu1 %1455 }
 0xa6c   :  { %4341 = vpow2.f32 %v3508_v58  ;;  %v1462_v46 = vpop.permute.xlu0 %1461 }
 0xa6d   :  { %v1467_v48 = vsel %vm366_vm2, %v1456_v45, %v1462_v46  ;;  %4343 = vpow2.f32 %v3509_v61 }
 0xa6e   :  { %v3510_v33 = vmul.f32 -1.442695, %v1467_v48  ;;  %v4609_v48 = vmov 1  }
 0xa6f   :  { %v1464_v52 = vpop.permute.xlu1 %1463  ;;  %4127 = vset.pattern.permute.xlu1 %v4609_v48 }
 0xa70   :  { %4345 = vpow2.f32 %v3510_v33  ;;  %v1458_v55 = vpop.permute.xlu0 %1457 }
 0xa71   :  { %v1468_v36 = vsel %vm366_vm2, %v1458_v55, %v1464_v52 }
 0xa72   :  { %v3511_v57 = vmul.f32 -1.442695, %v1468_v36 }
 0xa73   :  { %v1484_v60 = vpop.permute.xlu1 %1483 }
 0xa74   :  { %4347 = vpow2.f32 %v3511_v57  ;;  %v1482_v50 = vpop.permute.xlu0 %1481  ;;  %v4610_v57 = vmov 2  }
 0xa76   :  { %v4342_v53 = vpop.eup %4341 }
 0xa77   :  { %v1449_v0 = vadd.f32 1.0, %v4342_v53  ;;  %v1488_v1 = vpop.permute.xlu1 %1487  ;;  %v4344_v11 = vpop.eup %4343  ;;  %v4613_v53 = vmov 6  }
 0xa78   :  { %v1493_v8 = vsel %vm366_vm2, %v1482_v50, %v1488_v1  ;;  %v1498_v44 = vpop.permute.xlu0 %1497  ;;  %v1450_v54 = vadd.f32 1.0, %v4344_v11  ;;  %v4612_v50 = vmov 4   ;;  %v4615_v1 = vmov 5  }
 0xa79   :  { %v1503_v12 = vsel %vm366_vm2, %v1436_v42, %v1498_v44  ;;  %4349 = vrcp.f32 %v1449_v0  ;;  %v4614_v0 = vmov 7   ;;  %v1819_v44 = vld [vmem:[%s5607_s8 + $0x8] sm:$0xff] }
 0xa7a   :  { %v4346_v47 = vpop.eup %4345  ;;  %v3512_v15 = vmul.f32 -1.442695, %v1503_v12  ;;  %4351 = vtanh.f32 %v1493_v8  ;;  %v1818_v8 = vld [vmem:[%s5607_s8] sm:$0xff]  ;;  %v1820_v12 = vld [vmem:[%s5607_s8 + $0x10] sm:$0xff] }
 0xa7b   :  { %v1475_v18 = vadd.f32 1.0, %v4346_v47  ;;  %v1500_v51 = vpop.permute.xlu1 %1499  ;;  %v4018_v11 = vpack.c.bf16 %v1819_v44, %v1818_v8  ;;  %v1821_v47 = vld [vmem:[%s5607_s8 + $0x18] sm:$0xff] }
 0xa7c   :  { %4353 = vpow2.f32 %v3512_v15  ;;  %v1504_v21 = vsel %vm366_vm2, %v1438_v3, %v1500_v51  ;;  %v1490_v22 = vpop.permute.xlu0 %1489  ;;  %v4022_v15 = vpack.c.bf16 %v1821_v47, %v1820_v12  ;;  %v1911_v51 = vld [vmem:[%s5609_s10 + $0x8] sm:$0xff] }
 0xa7d   :  { %4355 = vrcp.f32 %v1475_v18  ;;  %v3513_v25 = vmul.f32 -1.442695, %v1504_v21  ;;  %v1494_v63 = vsel %vm366_vm2, %v1484_v60, %v1490_v22  ;;  %v4611_v60 = vmov 3   ;;  %4019 = vmatprep.subr.bf16.mxu0 %v4018_v11  ;;  %v1910_v18 = vld [vmem:[%s5609_s10] sm:$0xff]  ;;  %v1912_v22 = vld [vmem:[%s5609_s10 + $0x10] sm:$0xff] }
 0xa7e   :  { %v4348_v28 = vpop.eup %4347  ;;  %4357 = vtanh.f32 %v1494_v63  ;;  %4021 = vmatpush3.bf16.msra.mxu0 %v4018_v11  ;;  %v4616_v21 = vmov 0.0|0.0  }
 0xa7f   :  { %v1476_v30 = vadd.f32 1.0, %v4348_v28  ;;  %4359 = vpow2.f32 %v3513_v25  ;;  %4023 = vmatprep.subr.bf16.mxu0 %v4022_v15  ;;  %4026 = vmatprep.subr.bf16.mxu1 %v4616_v21  ;;  %v1913_v25 = vld [vmem:[%s5609_s10 + $0x18] sm:$0xff] }
 0xa80   :  { %4361 = vrcp.f32 %v1450_v54  ;;  %v5199_v54 = vpack.c.bf16 %v1911_v51, %v1910_v18  ;;  %v5212_v63 = vpack.c.bf16 %v1913_v25, %v1912_v22 }
 0xa81   :  { %4363 = vrcp.f32 %v1476_v30 }
 0xa82   :  { %4025 = vmatpush3.bf16.msra.mxu0 %v4022_v15 }
 0xa83   :  { %v4350_v4 = vpop.eup %4349  ;;  %4032 = vmatprep.subr.bf16.mxu0 %v4616_v21 }
 0xa84   :  { %v4352_v2 = vpop.eup %4351 }
 0xa85   :  { %v1519_v35 = vmul.f32 %v4352_v2, %v4350_v4 }
 0xa86   :  { %v4354_v5 = vpop.eup %4353 }
 0xa87   :  { %v4356_v10 = vpop.eup %4355  ;;  %v1511_v14 = vadd.f32 1.0, %v4354_v5 }
 0xa88   :  { %v4358_v62 = vpop.eup %4357  ;;  %v1517_v20 = vmul.f32 %v4356_v10, %v5080_v32 }
 0xa89   :  { %v4360_v37 = vpop.eup %4359  ;;  %4365 = vrcp.f32 %v1511_v14 }
 0xa8a   :  { %v4362_v24 = vpop.eup %4361  ;;  %v5118_v39 = vadd.f32 %v1519_v35, %v1517_v20  ;;  %v1512_v23 = vadd.f32 1.0, %v4360_v37 }
 0xa8b   :  { %v4364_v40 = vpop.eup %4363  ;;  %v1520_v7 = vmul.f32 %v4362_v24, %v4358_v62 }
 0xa8c   :  { %v1518_v3 = vmul.f32 %v4364_v40, %v5084_v59  ;;  %4367 = vtanh.f32 %v5118_v39  ;;  %v4608_v59 = vmov 0  }
 0xa8d   :  { %4369 = vrcp.f32 %v1512_v23  ;;  %4126 = vset.pattern.permute.xlu0 %v4608_v59 }
 0xa8e   :  { %v5122_v42 = vadd.f32 %v1520_v7, %v1518_v3 }
 0xa90   :  { %4371 = vtanh.f32 %v5122_v42 }
 0xa93   :  { %v4366_v43 = vpop.eup %4365 }
 0xa96   :  { %v4368_v32 = vpop.eup %4367 }
 0xa97   :  { %v5125_v58 = vmul.f32 %v4368_v32, %v4366_v43  ;;  %v4370_v61 = vpop.eup %4369 }
 0xa99   :  { %3815 = vmatprep.mubr.msk.f32.mxu1 %vm75_vm0, %v5125_v58 }
 0xa9a   :  { %v4372_v45 = vpop.eup %4371 }
 0xa9b   :  { %v5129_v46 = vmul.f32 %v4372_v45, %v4370_v61 }
 0xa9d   :  { %3816 = vmatmul.mubr.msk.f32.vlgmr.msra.gmra.mrb[10].mxu1 %vm75_vm0, %v5129_v46 }
 0xa9e   :  { %4028 = vmatpush3.bf16.msra.mxu1 %v5199_v54  ;;  %3837 = vmatprep.mubr.msk.f32.mxu1 %vm4617_vm3, %v4601_v6 }
 0xa9f   :  { %4029 = vmatprep.subr.bf16.mxu1 %v4616_v21 }
 0xaa2   :  { %4031 = vmatpush3.bf16.msra.mxu1 %v5212_v63 }
 0xaa3   :  { %4038 = vmatprep.subr.bf16.mxu1 %v4616_v21 }
 0xaa5   :  { %3838 = vmatmul.mubr.f32.vlgmr.msra.gmra.mrb[12].mxu1 %v4601_v6 }
 0xaa6   :  { %4040 = vmatpush3.bf16.msra.mxu1 %v5199_v54  ;;  %3859 = vmatprep.mubr.msk.f32.mxu1 %vm4617_vm3, %v4601_v6 }
 0xaa7   :  { %4041 = vmatprep.subr.bf16.mxu1 %v4616_v21 }
 0xaaa   :  { %4043 = vmatpush3.bf16.msra.mxu1 %v5212_v63 }
 0xaab   :  { %4050 = vmatprep.subr.bf16.mxu1 %v4616_v21 }
 0xb70   :  { %v3817_v33 = vpop.f32.mrb[10].mxu1 }
 0xb71   :  { %v5135_v52 = vadd.f32 %v3817_v33, %v4847_v16  ;;  %v1601_v55 = vpop.f32.mrb[11].mxu1  ;;  %v273_v16 = vld [vmem:[%s5600_s1] sm:$0xff] }
 0xb72   :  { %v5138_v36 = vadd.f32 %v1601_v55, %v4851_v19  ;;  %v274_v19 = vld [vmem:[%s5600_s1 + $0x8] sm:$0xff] }
 0xb73   :  { %1636 = vrot.lane.b32.xlu0 %v5135_v52, %s4604_s5  ;;  %1616 = vrot.lane.b32.xlu1 %v5135_v52, %s4602_s0 }
 0xb77   :  { %1642 = vrot.lane.b32.xlu1 %v5135_v52, %s4603_s6  ;;  %1614 = vrot.lane.b32.xlu0 %v5138_v36, %s4602_s0 }
 0xb7b   :  { %1634 = vrot.lane.b32.xlu1 %v5138_v36, %s4604_s5  ;;  %1668 = vrot.lane.b32.xlu0 %v5135_v52, %s4606_s28 }
 0xb7f   :  { %1662 = vrot.lane.b32.xlu1 %v5135_v52, %s4605_s27  ;;  %1640 = vrot.lane.b32.xlu0 %v5138_v36, %s4603_s6 }
 0xb83   :  { %1678 = vrot.lane.b32.xlu1 %v5135_v52, %s4607_s29  ;;  %1710 = vperm.xlu0 %4126, %v273_v16  }
 0xb87   :  { %1723 = vperm.xlu1 %4127, %v273_v16   ;;  %1660 = vrot.lane.b32.xlu0 %v5138_v36, %s4605_s27 }
 0xb88   :  { %4129 = vset.pattern.permute.xlu0 %v4609_v48 }
 0xb8b   :  { %1666 = vrot.lane.b32.xlu1 %v5138_v36, %s4606_s28  ;;  %1676 = vrot.lane.b32.xlu0 %v5138_v36, %s4607_s29 }
 0xb8c   :  { %4128 = vset.pattern.permute.xlu1 %v4608_v59 }
 0xb8f   :  { %1715 = vperm.xlu1 %4128, %v274_v19   ;;  %1727 = vperm.xlu0 %4129, %v274_v19  }
 0xb93   :  { %4130 = vset.pattern.permute.xlu1 %v4610_v57  ;;  %4131 = vset.pattern.permute.xlu0 %v4611_v60 }
 0xb94   :  { %1737 = vperm.xlu1 %4130, %v273_v16   ;;  %1751 = vperm.xlu0 %4131, %v273_v16  }
 0xb98   :  { %1741 = vperm.xlu1 %4130, %v274_v19   ;;  %4134 = vset.pattern.permute.xlu0 %v4612_v50 }
 0xb99   :  { %1769 = vperm.xlu0 %4134, %v274_v19  }
 0xb9c   :  { %4132 = vset.pattern.permute.xlu1 %v4611_v60 }
 0xb9d   :  { %1755 = vperm.xlu1 %4132, %v274_v19   ;;  %4136 = vset.pattern.permute.xlu0 %v4613_v53 }
 0xb9e   :  { %1793 = vperm.xlu0 %4136, %v273_v16  }
 0xba1   :  { %4133 = vset.pattern.permute.xlu1 %v4612_v50 }
 0xba2   :  { %1765 = vperm.xlu1 %4133, %v273_v16   ;;  %4139 = vset.pattern.permute.xlu0 %v4614_v0 }
 0xba3   :  { %1811 = vperm.xlu0 %4139, %v274_v19  }
 0xba6   :  { %4135 = vset.pattern.permute.xlu1 %v4615_v1 }
 0xba7   :  { %1779 = vperm.xlu1 %4135, %v273_v16   ;;  %4140 = vset.pattern.permute.xlu0 %v4609_v48 }
 0xbab   :  { %1783 = vperm.xlu1 %4135, %v274_v19  }
 0xbaf   :  { %4137 = vset.pattern.permute.xlu1 %v4613_v53 }
 0xbb0   :  { %1797 = vperm.xlu1 %4137, %v274_v19  }
 0xbb4   :  { %4138 = vset.pattern.permute.xlu1 %v4614_v0 }
 0xbb5   :  { %1807 = vperm.xlu1 %4138, %v273_v16  }
 0xbb9   :  { %4141 = vset.pattern.permute.xlu1 %v4608_v59 }
 0xbe5   :  { %v1637_v28 = vpop.permute.xlu0 %1636  ;;  %v1617_v30 = vpop.permute.xlu1 %1616 }
 0xbe6   :  { %v1621_v4 = vsel %vm366_vm2, %v5135_v52, %v1617_v30 }
 0xbe7   :  { %v3517_v2 = vmul.f32 -1.442695, %v1621_v4 }
 0xbe9   :  { %4373 = vpow2.f32 %v3517_v2  ;;  %v1643_v5 = vpop.permute.xlu1 %1642  ;;  %v1615_v10 = vpop.permute.xlu0 %1614 }
 0xbea   :  { %v1647_v14 = vsel %vm366_vm2, %v1637_v28, %v1643_v5  ;;  %v1620_v37 = vsel %vm366_vm2, %v5138_v36, %v1615_v10 }
 0xbeb   :  { %v3519_v62 = vmul.f32 -1.442695, %v1647_v14  ;;  %v3516_v24 = vmul.f32 -1.442695, %v1620_v37 }
 0xbed   :  { %4375 = vpow2.f32 %v3519_v62  ;;  %v1635_v20 = vpop.permute.xlu1 %1634  ;;  %v1669_v35 = vpop.permute.xlu0 %1668 }
 0xbee   :  { %4377 = vpow2.f32 %v3516_v24 }
 0xbf1   :  { %v1663_v40 = vpop.permute.xlu1 %1662  ;;  %v1641_v23 = vpop.permute.xlu0 %1640 }
 0xbf2   :  { %v1646_v3 = vsel %vm366_vm2, %v1635_v20, %v1641_v23  ;;  %v1673_v43 = vsel %vm366_vm2, %v1663_v40, %v1669_v35 }
 0xbf3   :  { %v4374_v7 = vpop.eup %4373  ;;  %v3518_v32 = vmul.f32 -1.442695, %v1646_v3  ;;  %4379 = vtanh.f32 %v1673_v43 }
 0xbf4   :  { %v1629_v61 = vadd.f32 1.0, %v4374_v7 }
 0xbf5   :  { %v1679_v45 = vpop.permute.xlu1 %1678  ;;  %4381 = vpow2.f32 %v3518_v32  ;;  %v1735_v32 = vsel %vm366_vm2, %v4967_v56, %v5091_v17 }
 0xbf6   :  { %v1683_v59 = vsel %vm366_vm2, %v1617_v30, %v1679_v45  ;;  %4383 = vrcp.f32 %v1629_v61 }
 0xbf7   :  { %v4376_v48 = vpop.eup %4375  ;;  %v3521_v33 = vmul.f32 -1.442695, %v1683_v59 }
 0xbf8   :  { %v1655_v52 = vadd.f32 1.0, %v4376_v48  ;;  %v4378_v55 = vpop.eup %4377 }
 0xbf9   :  { %4385 = vpow2.f32 %v3521_v33  ;;  %v1628_v25 = vadd.f32 1.0, %v4378_v55 }
 0xbfa   :  { %4387 = vrcp.f32 %v1655_v52 }
 0xbfd   :  { %v4380_v36 = vpop.eup %4379 }
 0xbff   :  { %v4382_v16 = vpop.eup %4381 }
 0xc00   :  { %v4384_v19 = vpop.eup %4383  ;;  %v1654_v18 = vadd.f32 1.0, %v4382_v16 }
 0xc01   :  { %v1699_v15 = vmul.f32 %v4384_v19, %v4380_v36 }
 0xc02   :  { %v5233_v8 = vpop.permute.xlu0 %1710 }
 0xc03   :  { %v4386_v44 = vpop.eup %4385 }
 0xc04   :  { %v4388_v11 = vpop.eup %4387  ;;  %v1691_v12 = vadd.f32 1.0, %v4386_v44 }
 0xc05   :  { %v1697_v47 = vmul.f32 %v4388_v11, %v5122_v42 }
 0xc06   :  { %v1724_v51 = vpop.permute.xlu1 %1723  ;;  %v1661_v22 = vpop.permute.xlu0 %1660  ;;  %4389 = vrcp.f32 %v1691_v12  ;;  %v1749_v12 = vsel %vm366_vm2, %v5009_v13, %v5050_v31 }
 0xc07   :  { %v1701_v28 = vadd.f32 %v1699_v15, %v1697_v47 }
 0xc09   :  { %4391 = vtanh.f32 %v1701_v28 }
 0xc0a   :  { %4393 = vrcp.f32 %v1654_v18  ;;  %v1667_v30 = vpop.permute.xlu1 %1666  ;;  %v1677_v4 = vpop.permute.xlu0 %1676 }
 0xc0b   :  { %4395 = vrcp.f32 %v1628_v25  ;;  %v1672_v2 = vsel %vm366_vm2, %v1661_v22, %v1667_v30  ;;  %v1682_v5 = vsel %vm366_vm2, %v1615_v10, %v1677_v4  ;;  %v1721_v10 = vsel %vm366_vm2, %v4925_v41, %v5129_v46 }
 0xc0c   :  { %4397 = vtanh.f32 %v1672_v2  ;;  %v3520_v14 = vmul.f32 -1.442695, %v1682_v5 }
 0xc0e   :  { %4399 = vpow2.f32 %v3520_v14  ;;  %v1716_v42 = vpop.permute.xlu1 %1715  ;;  %v1728_v62 = vpop.permute.xlu0 %1727  ;;  %v1720_v14 = vsel %vm366_vm2, %v4921_v38, %v5125_v58 }
 0xc0f   :  { %v1731_v48 = vmul.f32 %v1728_v62, %v1721_v10  ;;  %v1730_v62 = vmul.f32 %v1724_v51, %v1720_v14 }
 0xc10   :  { %v4390_v20 = vpop.eup %4389 }
 0xc13   :  { %v4392_v35 = vpop.eup %4391  ;;  %v1738_v37 = vpop.permute.xlu1 %1737 }
 0xc14   :  { %v4394_v24 = vpop.eup %4393  ;;  %v5238_v40 = vmul.f32 %v4392_v35, %v4390_v20  ;;  %v1752_v43 = vpop.permute.xlu0 %1751  ;;  %v1734_v35 = vsel %vm366_vm2, %v4963_v49, %v5087_v34 }
 0xc15   :  { %v4396_v23 = vpop.eup %4395  ;;  %v1696_v61 = vmul.f32 %v4394_v24, %v5118_v39  ;;  %v1763_v39 = vsel %vm366_vm2, %v5050_v31, %v5009_v13  ;;  %v1777_v13 = vsel %vm366_vm2, %v5091_v17, %v4967_v56  ;;  %v1762_v56 = vsel %vm366_vm2, %v5046_v27, %v5005_v9 }
 0xc16   :  { %v4398_v3 = vpop.eup %4397  ;;  %v1707_v7 = vsel %vm366_vm2, %v4883_v29, %v5238_v40  ;;  %v1791_v17 = vsel %vm366_vm2, %v5129_v46, %v4925_v41 }
 0xc17   :  { %v1698_v45 = vmul.f32 %v4398_v3, %v4396_v23  ;;  %v1719_v59 = vmul.f32 %v1716_v42, %v1707_v7  ;;  %v1742_v33 = vpop.permute.xlu1 %1741  ;;  %v1744_v3 = vmul.f32 %v1738_v37, %v1734_v35  ;;  %v1748_v7 = vsel %vm366_vm2, %v5005_v9, %v5046_v27 }
 0xc18   :  { %v4400_v52 = vpop.eup %4399  ;;  %v1745_v55 = vmul.f32 %v1742_v33, %v1735_v32  ;;  %v1770_v11 = vpop.permute.xlu0 %1769  ;;  %v1758_v32 = vmul.f32 %v1752_v43, %v1748_v7 }
 0xc19   :  { %v1700_v36 = vadd.f32 %v1698_v45, %v1696_v61  ;;  %v1690_v16 = vadd.f32 1.0, %v4400_v52  ;;  %v1733_v19 = vmax.f32 %v1719_v59, %v1731_v48  ;;  %v1773_v18 = vmul.f32 %v1770_v11, %v1763_v39 }
 0xc1a   :  { %v1776_v48 = vsel %vm366_vm2, %v5087_v34, %v4963_v49 }
 0xc1b   :  { %4401 = vtanh.f32 %v1700_v36  ;;  %v1747_v44 = vmax.f32 %v1733_v19, %v1745_v55  ;;  %v1790_v55 = vsel %vm366_vm2, %v5125_v58, %v4921_v38  ;;  %v1805_v19 = vsel %vm366_vm2, %v5238_v40, %v4883_v29  ;;  %v3522_v38 = vld [vmem:[%s5608_s9] ss:$0 sm:$0xff] }
 0xc1c   :  { %4403 = vrcp.f32 %v1690_v16  ;;  %v1756_v47 = vpop.permute.xlu1 %1755 }
 0xc1d   :  { %v1759_v15 = vmul.f32 %v1756_v47, %v1749_v12 }
 0xc1f   :  { %v1761_v22 = vmax.f32 %v1747_v44, %v1759_v15 }
 0xc21   :  { %v1766_v25 = vpop.permute.xlu1 %1765  ;;  %v1775_v28 = vmax.f32 %v1761_v22, %v1773_v18 }
 0xc22   :  { %v1772_v59 = vmul.f32 %v1766_v25, %v1762_v56 }
 0xc25   :  { %v4402_v30 = vpop.eup %4401 }
 0xc26   :  { %v4404_v4 = vpop.eup %4403  ;;  %v1780_v2 = vpop.permute.xlu1 %1779 }
 0xc27   :  { %v1704_v5 = vmul.f32 %v4404_v4, %v4402_v30  ;;  %v1786_v52 = vmul.f32 %v1780_v2, %v1776_v48 }
 0xc29   :  { %v1706_v42 = vsel %vm366_vm2, %v4879_v26, %v1704_v5  ;;  %v1804_v41 = vsel %vm366_vm2, %v1704_v5, %v4879_v26  ;;  %v1993_v26 = vpop.f32.mrb[12].mxu1 }
 0xc2a   :  { %v1718_v20 = vmul.f32 %v5233_v8, %v1706_v42  ;;  %v1784_v31 = vpop.permute.xlu1 %1783  ;;  %v1794_v8 = vpop.permute.xlu0 %1793 }
 0xc2b   :  { %v1787_v24 = vmul.f32 %v1784_v31, %v1777_v13  ;;  %v1800_v9 = vmul.f32 %v1794_v8, %v1790_v55  ;;  %v3839_v29 = vpop.f32.mrb[13].mxu1 }
 0xc2c   :  { %v1732_v23 = vmax.f32 %v1718_v20, %v1730_v62 }
 0xc2d   :  { %v1789_v10 = vmax.f32 %v1775_v28, %v1787_v24 }
 0xc2e   :  { %v1746_v51 = vmax.f32 %v1732_v23, %v1744_v3  ;;  %v1812_v27 = vpop.permute.xlu0 %1811 }
 0xc2f   :  { %v1798_v61 = vpop.permute.xlu1 %1797  ;;  %v1815_v34 = vmul.f32 %v1812_v27, %v1805_v19 }
 0xc30   :  { %v1760_v45 = vmax.f32 %v1746_v51, %v1758_v32  ;;  %v1801_v37 = vmul.f32 %v1798_v61, %v1791_v17 }
 0xc32   :  { %v1774_v33 = vmax.f32 %v1760_v45, %v1772_v59  ;;  %v1803_v43 = vmax.f32 %v1789_v10, %v1801_v37 }
 0xc34   :  { %v1788_v36 = vmax.f32 %v1774_v33, %v1786_v52  ;;  %v1808_v16 = vpop.permute.xlu1 %1807  ;;  %v1817_v11 = vmax.f32 %v1803_v43, %v1815_v34 }
 0xc35   :  { %v1814_v46 = vmul.f32 %v1808_v16, %v1804_v41 }
 0xc36   :  { %v1802_v49 = vmax.f32 %v1788_v36, %v1800_v9 }
 0xc38   :  { %v1816_v44 = vmax.f32 %v1802_v49, %v1814_v46 }
 0xc3a   :  { %3826 = vmatprep.mubr.msk.f32.mxu0 %vm75_vm0, %v1816_v44 }
 0xc3b   :  { %3827 = vmatmul.mubr.msk.f32.vlgmr.msra.gmra.mrb[20].mxu0 %vm75_vm0, %v1817_v11 }
 0xc3c   :  { %4034 = vmatpush3.bf16.msra.mxu0 %v5199_v54  ;;  %3848 = vmatprep.mubr.msk.f32.mxu0 %vm4617_vm3, %v4601_v6 }
 0xc3d   :  { %4035 = vmatprep.subr.bf16.mxu0 %v4616_v21 }
 0xc40   :  { %4037 = vmatpush3.bf16.msra.mxu0 %v5212_v63 }
 0xc41   :  { %4044 = vmatprep.subr.bf16.mxu0 %v4616_v21 }
 0xd0e   :  { %v3828_v58 = vpop.f32.mrb[20].mxu0 }
 0xd0f   :  { %v1907_v40 = vadd.f32 %v3828_v58, %v3522_v38  ;;  %v1901_v12 = vpop.f32.mrb[21].mxu0 }
 0xd10   :  { %v1902_v47 = vadd.f32 %v3522_v38, %v1901_v12 }
 0xd11   :  { %v1916_v15 = vrot.slane %v1907_v40, 7  ;;  %v1923_v39 = vrot.slane %v1907_v40, 6  ;;  %v2050_v18 = vrot.slane %v1907_v40, 5  ;;  %v2177_v22 = vrot.slane %v1907_v40, 1 }
 0xd12   :  { %v1921_v25 = vrot.slane %v1902_v47, 7  ;;  %v2045_v28 = vrot.slane %v1902_v47, 1  ;;  %v2048_v30 = vrot.slane %v1902_v47, 6  ;;  %v2175_v4 = vrot.slane %v1902_v47, 2 }
 0xd13   :  { %v1919_v2 = vsel %vm1918_vm4, %v1902_v47, %v1916_v15  ;;  %v2180_v5 = vrot.slane %v1902_v47, 5  ;;  %v2182_v14 = vrot.slane %v1907_v40, 4  ;;  %v2307_v42 = vrot.slane %v1902_v47, 3 }
 0xd14   :  { %v1925_v62 = vsel %vm1918_vm4, %v1921_v25, %v1923_v39  ;;  %v2047_v20 = vsel %vm1918_vm4, %v2045_v28, %v1907_v40  ;;  %v2052_v13 = vsel %vm1918_vm4, %v2048_v30, %v2050_v18  ;;  %v2179_v31 = vsel %vm1918_vm4, %v2175_v4, %v2177_v22 }
 0xd15   :  { %v1926_v35 = vsel %vm275_vm1, %v1919_v2, %v1925_v62  ;;  %v5306_v24 = vsel %vm275_vm1, %v2047_v20, %v2052_v13  ;;  %v2184_v23 = vsel %vm1918_vm4, %v2180_v5, %v2182_v14  ;;  %v2309_v3 = vrot.slane %v1907_v40, 2 }
 0xd16   :  { %v1997_v7 = vadd.f32 %v1993_v26, %v1926_v35  ;;  %v5310_v10 = vsel %vm275_vm1, %v2179_v31, %v2184_v23  ;;  %v2312_v51 = vrot.slane %v1902_v47, 4  ;;  %v2314_v32 = vrot.slane %v1907_v40, 3 }
 0xd17   :  { %v2311_v8 = vsel %vm1918_vm4, %v2307_v42, %v2309_v3  ;;  %v5314_v56 = vsel %vm275_vm1, %v2184_v23, %v2179_v31  ;;  %v5317_v17 = vsel %vm275_vm1, %v2052_v13, %v2047_v20  ;;  %v5320_v61 = vsel %vm275_vm1, %v1925_v62, %v1919_v2 }
 0xd18   :  { %2012 = vrot.lane.b32.xlu0 %v1997_v7, %s4603_s6  ;;  %1999 = vrot.lane.b32.xlu1 %v1997_v7, %s4602_s0  ;;  %v2316_v45 = vsel %vm1918_vm4, %v2312_v51, %v2314_v32 }
 0xd19   :  { %v5326_v59 = vsel %vm275_vm1, %v2311_v8, %v2316_v45  ;;  %v5329_v37 = vsel %vm275_vm1, %v2316_v45, %v2311_v8 }
 0xd1c   :  { %2025 = vrot.lane.b32.xlu0 %v1997_v7, %s4606_s28  ;;  %2009 = vrot.lane.b32.xlu1 %v1997_v7, %s4604_s5 }
 0xd20   :  { %2022 = vrot.lane.b32.xlu1 %v1997_v7, %s4605_s27 }
 0xd24   :  { %2030 = vrot.lane.b32.xlu1 %v1997_v7, %s4607_s29 }
 0xd8a   :  { %v2000_v48 = vpop.permute.xlu1 %1999  ;;  %v2013_v43 = vpop.permute.xlu0 %2012 }
 0xd8b   :  { %v2002_v33 = vsel %vm366_vm2, %v1997_v7, %v2000_v48 }
 0xd8c   :  { %v3525_v52 = vmul.f32 -1.442695, %v2002_v33 }
 0xd8e   :  { %4405 = vpow2.f32 %v3525_v52  ;;  %v2010_v55 = vpop.permute.xlu1 %2009  ;;  %v2026_v34 = vpop.permute.xlu0 %2025 }
 0xd8f   :  { %v2015_v9 = vsel %vm366_vm2, %v2010_v55, %v2013_v43 }
 0xd90   :  { %v3526_v27 = vmul.f32 -1.442695, %v2015_v9 }
 0xd92   :  { %4407 = vpow2.f32 %v3526_v27  ;;  %v2023_v36 = vpop.permute.xlu1 %2022 }
 0xd93   :  { %v2028_v44 = vsel %vm366_vm2, %v2023_v36, %v2026_v34 }
 0xd96   :  { %v2031_v16 = vpop.permute.xlu1 %2030 }
 0xd97   :  { %v2033_v41 = vsel %vm366_vm2, %v2000_v48, %v2031_v16 }
 0xd98   :  { %v4406_v46 = vpop.eup %4405  ;;  %v3527_v19 = vmul.f32 -1.442695, %v2033_v41 }
 0xd99   :  { %v2006_v49 = vadd.f32 1.0, %v4406_v46 }
 0xd9a   :  { %4409 = vpow2.f32 %v3527_v19 }
 0xd9b   :  { %4411 = vrcp.f32 %v2006_v49 }
 0xd9c   :  { %v4408_v11 = vpop.eup %4407  ;;  %4413 = vtanh.f32 %v2028_v44 }
 0xd9d   :  { %v2019_v26 = vadd.f32 1.0, %v4408_v11 }
 0xd9f   :  { %4415 = vrcp.f32 %v2019_v26 }
 0xda4   :  { %v4410_v29 = vpop.eup %4409 }
 0xda5   :  { %v4412_v38 = vpop.eup %4411  ;;  %v2037_v12 = vadd.f32 1.0, %v4410_v29 }
 0xda6   :  { %v4414_v58 = vpop.eup %4413 }
 0xda7   :  { %v2041_v15 = vmul.f32 %v4414_v58, %v4412_v38  ;;  %4417 = vrcp.f32 %v2037_v12 }
 0xda9   :  { %v4416_v40 = vpop.eup %4415 }
 0xdaa   :  { %v2040_v47 = vmul.f32 0.0, %v4416_v40 }
 0xdac   :  { %v2042_v39 = vadd.f32 %v2041_v15, %v2040_v47 }
 0xdae   :  { %4419 = vtanh.f32 %v2042_v39 }
 0xdb1   :  { %v4418_v18 = vpop.eup %4417 }
 0xdb8   :  { %v4420_v22 = vpop.eup %4419 }
 0xdb9   :  { %v5339_v25 = vmul.f32 %v4420_v22, %v4418_v18 }
 0xdbb   :  { %3849 = vmatmul.mubr.msk.f32.vlgmr.msra.gmra.mrb[22].mxu0 %vm75_vm0, %v5339_v25 }
 0xdbc   :  { %4046 = vmatpush3.bf16.msra.mxu0 %v5199_v54  ;;  %3870 = vmatprep.mubr.msk.f32.mxu0 %vm4617_vm3, %v4601_v6 }
 0xdbd   :  { %4047 = vmatprep.subr.bf16.mxu0 %v4616_v21 }
 0xdc0   :  { %4049 = vmatpush3.bf16.msra.mxu0 %v5212_v63 }
 0xdc1   :  { %4056 = vmatprep.subr.bf16.mxu0 %v4616_v21 }
 0xe8e   :  { %v2123_v28 = vpop.f32.mrb[22].mxu0 }
 0xe8f   :  { %v2127_v30 = vadd.f32 %v2123_v28, %v5306_v24  ;;  %v3850_v4 = vpop.f32.mrb[23].mxu0 }
 0xe91   :  { %2139 = vrot.lane.b32.xlu1 %v2127_v30, %s4604_s5  ;;  %2129 = vrot.lane.b32.xlu0 %v2127_v30, %s4602_s0 }
 0xe95   :  { %2152 = vrot.lane.b32.xlu1 %v2127_v30, %s4605_s27  ;;  %2142 = vrot.lane.b32.xlu0 %v2127_v30, %s4603_s6 }
 0xe99   :  { %2160 = vrot.lane.b32.xlu1 %v2127_v30, %s4607_s29  ;;  %2155 = vrot.lane.b32.xlu0 %v2127_v30, %s4606_s28 }
 0xf03   :  { %v2140_v2 = vpop.permute.xlu1 %2139  ;;  %v2130_v5 = vpop.permute.xlu0 %2129 }
 0xf04   :  { %v2132_v14 = vsel %vm366_vm2, %v2127_v30, %v2130_v5 }
 0xf05   :  { %v3529_v42 = vmul.f32 -1.442695, %v2132_v14 }
 0xf07   :  { %4421 = vpow2.f32 %v3529_v42  ;;  %v2153_v62 = vpop.permute.xlu1 %2152  ;;  %v2143_v20 = vpop.permute.xlu0 %2142 }
 0xf08   :  { %v2145_v13 = vsel %vm366_vm2, %v2140_v2, %v2143_v20 }
 0xf09   :  { %v3530_v31 = vmul.f32 -1.442695, %v2145_v13 }
 0xf0b   :  { %4423 = vpow2.f32 %v3530_v31  ;;  %v2161_v35 = vpop.permute.xlu1 %2160  ;;  %v2156_v7 = vpop.permute.xlu0 %2155 }
 0xf0c   :  { %v2163_v24 = vsel %vm366_vm2, %v2130_v5, %v2161_v35  ;;  %v2158_v32 = vsel %vm366_vm2, %v2153_v62, %v2156_v7 }
 0xf0d   :  { %v3531_v3 = vmul.f32 -1.442695, %v2163_v24 }
 0xf0f   :  { %4425 = vpow2.f32 %v3531_v3 }
 0xf11   :  { %v4422_v23 = vpop.eup %4421 }
 0xf12   :  { %v2136_v51 = vadd.f32 1.0, %v4422_v23 }
 0xf14   :  { %4427 = vrcp.f32 %v2136_v51 }
 0xf15   :  { %v4424_v8 = vpop.eup %4423  ;;  %4429 = vtanh.f32 %v2158_v32 }
 0xf16   :  { %v2149_v45 = vadd.f32 1.0, %v4424_v8 }
 0xf18   :  { %4431 = vrcp.f32 %v2149_v45 }
 0xf19   :  { %v4426_v48 = vpop.eup %4425 }
 0xf1a   :  { %v2167_v55 = vadd.f32 1.0, %v4426_v48 }
 0xf1c   :  { %4433 = vrcp.f32 %v2167_v55 }
 0xf1e   :  { %v4428_v33 = vpop.eup %4427 }
 0xf1f   :  { %v4430_v52 = vpop.eup %4429 }
 0xf20   :  { %v2171_v27 = vmul.f32 %v4430_v52, %v4428_v33 }
 0xf22   :  { %v4432_v43 = vpop.eup %4431 }
 0xf23   :  { %v2170_v9 = vmul.f32 %v4432_v43, %v2042_v39 }
 0xf25   :  { %v2172_v36 = vadd.f32 %v2171_v27, %v2170_v9 }
 0xf26   :  { %v4434_v16 = vpop.eup %4433 }
 0xf27   :  { %4435 = vtanh.f32 %v2172_v36 }
 0xf31   :  { %v4436_v41 = vpop.eup %4435 }
 0xf32   :  { %v5360_v46 = vmul.f32 %v4436_v41, %v4434_v16 }
 0xf34   :  { %3860 = vmatmul.mubr.msk.f32.vlgmr.msra.gmra.mrb[14].mxu1 %vm75_vm0, %v5360_v46 }
 0xf35   :  { %4052 = vmatpush3.bf16.msra.mxu1 %v5199_v54  ;;  %3881 = vmatprep.mubr.msk.f32.mxu1 %vm4617_vm3, %v4601_v6 }
 0xf36   :  { %4053 = vmatprep.subr.bf16.mxu1 %v4616_v21 }
 0xf39   :  { %4055 = vmatpush3.bf16.msra.mxu1 %v5212_v63 }
 0xf3a   :  { %4062 = vmatprep.subr.bf16.mxu1 %v4616_v21 }
0x1007   :  { %v2255_v19 = vpop.f32.mrb[14].mxu1 }
0x1008   :  { %v2259_v49 = vadd.f32 %v2255_v19, %v5310_v10  ;;  %v3861_v34 = vpop.f32.mrb[15].mxu1 }
0x100a   :  { %2271 = vrot.lane.b32.xlu1 %v2259_v49, %s4604_s5  ;;  %2261 = vrot.lane.b32.xlu0 %v2259_v49, %s4602_s0 }
0x100e   :  { %2284 = vrot.lane.b32.xlu1 %v2259_v49, %s4605_s27  ;;  %2274 = vrot.lane.b32.xlu0 %v2259_v49, %s4603_s6 }
0x1012   :  { %2292 = vrot.lane.b32.xlu1 %v2259_v49, %s4607_s29  ;;  %2287 = vrot.lane.b32.xlu0 %v2259_v49, %s4606_s28 }
0x107c   :  { %v2272_v44 = vpop.permute.xlu1 %2271  ;;  %v2262_v11 = vpop.permute.xlu0 %2261 }
0x107d   :  { %v2264_v26 = vsel %vm366_vm2, %v2259_v49, %v2262_v11 }
0x107e   :  { %v3533_v29 = vmul.f32 -1.442695, %v2264_v26 }
0x1080   :  { %4437 = vpow2.f32 %v3533_v29  ;;  %v2285_v10 = vpop.permute.xlu1 %2284  ;;  %v2275_v38 = vpop.permute.xlu0 %2274 }
0x1081   :  { %v2277_v58 = vsel %vm366_vm2, %v2272_v44, %v2275_v38 }
0x1082   :  { %v3534_v40 = vmul.f32 -1.442695, %v2277_v58 }
0x1084   :  { %4439 = vpow2.f32 %v3534_v40  ;;  %v2293_v12 = vpop.permute.xlu1 %2292  ;;  %v2288_v18 = vpop.permute.xlu0 %2287 }
0x1085   :  { %v2295_v47 = vsel %vm366_vm2, %v2262_v11, %v2293_v12  ;;  %v2290_v28 = vsel %vm366_vm2, %v2285_v10, %v2288_v18 }
0x1086   :  { %v3535_v39 = vmul.f32 -1.442695, %v2295_v47 }
0x1088   :  { %4441 = vpow2.f32 %v3535_v39 }
0x108a   :  { %v4438_v15 = vpop.eup %4437 }
0x108b   :  { %v2268_v22 = vadd.f32 1.0, %v4438_v15 }
0x108d   :  { %4443 = vrcp.f32 %v2268_v22 }
0x108e   :  { %v4440_v30 = vpop.eup %4439  ;;  %4445 = vtanh.f32 %v2290_v28 }
0x108f   :  { %v2281_v4 = vadd.f32 1.0, %v4440_v30 }
0x1091   :  { %4447 = vrcp.f32 %v2281_v4 }
0x1092   :  { %v4442_v2 = vpop.eup %4441 }
0x1093   :  { %v2299_v62 = vadd.f32 1.0, %v4442_v2 }
0x1095   :  { %4449 = vrcp.f32 %v2299_v62 }
0x1097   :  { %v4444_v5 = vpop.eup %4443 }
0x1098   :  { %v4446_v14 = vpop.eup %4445 }
0x1099   :  { %v2303_v13 = vmul.f32 %v4446_v14, %v4444_v5 }
0x109b   :  { %v4448_v42 = vpop.eup %4447 }
0x109c   :  { %v2302_v20 = vmul.f32 %v4448_v42, %v2172_v36 }
0x109e   :  { %v2304_v31 = vadd.f32 %v2303_v13, %v2302_v20 }
0x109f   :  { %v4450_v35 = vpop.eup %4449 }
0x10a0   :  { %4451 = vtanh.f32 %v2304_v31 }
0x10aa   :  { %v4452_v24 = vpop.eup %4451 }
0x10ab   :  { %v5381_v23 = vmul.f32 %v4452_v24, %v4450_v35 }
0x10ad   :  { %3871 = vmatmul.mubr.msk.f32.vlgmr.msra.gmra.mrb[24].mxu0 %vm75_vm0, %v5381_v23 }
0x10ae   :  { %4058 = vmatpush3.bf16.msra.mxu0 %v5199_v54  ;;  %3892 = vmatprep.mubr.msk.f32.mxu0 %vm4617_vm3, %v4601_v6 }
0x10af   :  { %4059 = vmatprep.subr.bf16.mxu0 %v4616_v21 }
0x10b2   :  { %4061 = vmatpush3.bf16.msra.mxu0 %v5212_v63 }
0x10b3   :  { %4068 = vmatprep.subr.bf16.mxu0 %v4616_v21 }
0x1180   :  { %v2387_v3 = vpop.f32.mrb[24].mxu0 }
0x1181   :  { %v2391_v7 = vadd.f32 %v2387_v3, %v5326_v59  ;;  %v3872_v51 = vpop.f32.mrb[25].mxu0 }
0x1183   :  { %2403 = vrot.lane.b32.xlu1 %v2391_v7, %s4604_s5  ;;  %2393 = vrot.lane.b32.xlu0 %v2391_v7, %s4602_s0 }
0x1187   :  { %2416 = vrot.lane.b32.xlu1 %v2391_v7, %s4605_s27  ;;  %2406 = vrot.lane.b32.xlu0 %v2391_v7, %s4603_s6 }
0x118b   :  { %2424 = vrot.lane.b32.xlu1 %v2391_v7, %s4607_s29  ;;  %2419 = vrot.lane.b32.xlu0 %v2391_v7, %s4606_s28 }
0x11f5   :  { %v2404_v32 = vpop.permute.xlu1 %2403  ;;  %v2394_v8 = vpop.permute.xlu0 %2393 }
0x11f6   :  { %v2396_v45 = vsel %vm366_vm2, %v2391_v7, %v2394_v8 }
0x11f7   :  { %v3537_v48 = vmul.f32 -1.442695, %v2396_v45 }
0x11f9   :  { %4453 = vpow2.f32 %v3537_v48  ;;  %v2417_v59 = vpop.permute.xlu1 %2416  ;;  %v2407_v33 = vpop.permute.xlu0 %2406 }
0x11fa   :  { %v2409_v52 = vsel %vm366_vm2, %v2404_v32, %v2407_v33 }
0x11fb   :  { %v3538_v43 = vmul.f32 -1.442695, %v2409_v52 }
0x11fd   :  { %4455 = vpow2.f32 %v3538_v43  ;;  %v2425_v55 = vpop.permute.xlu1 %2424  ;;  %v2420_v16 = vpop.permute.xlu0 %2419 }
0x11fe   :  { %v2427_v9 = vsel %vm366_vm2, %v2394_v8, %v2425_v55  ;;  %v2422_v19 = vsel %vm366_vm2, %v2417_v59, %v2420_v16 }
0x11ff   :  { %v3539_v36 = vmul.f32 -1.442695, %v2427_v9 }
0x1201   :  { %4457 = vpow2.f32 %v3539_v36 }
0x1203   :  { %v4454_v27 = vpop.eup %4453 }
0x1204   :  { %v2400_v41 = vadd.f32 1.0, %v4454_v27 }
0x1206   :  { %4459 = vrcp.f32 %v2400_v41 }
0x1207   :  { %v4456_v49 = vpop.eup %4455  ;;  %4461 = vtanh.f32 %v2422_v19 }
0x1208   :  { %v2413_v34 = vadd.f32 1.0, %v4456_v49 }
0x120a   :  { %4463 = vrcp.f32 %v2413_v34 }
0x120b   :  { %v4458_v44 = vpop.eup %4457 }
0x120c   :  { %v2431_v10 = vadd.f32 1.0, %v4458_v44 }
0x120e   :  { %4465 = vrcp.f32 %v2431_v10 }
0x1210   :  { %v4460_v11 = vpop.eup %4459 }
0x1211   :  { %v4462_v26 = vpop.eup %4461 }
0x1212   :  { %v2435_v58 = vmul.f32 %v4462_v26, %v4460_v11 }
0x1214   :  { %v4464_v29 = vpop.eup %4463 }
0x1215   :  { %v2434_v38 = vmul.f32 %v4464_v29, %v2304_v31 }
0x1217   :  { %v2436_v40 = vadd.f32 %v2435_v58, %v2434_v38 }
0x1218   :  { %v4466_v12 = vpop.eup %4465 }
0x1219   :  { %4467 = vtanh.f32 %v2436_v40 }
0x1223   :  { %v4468_v47 = vpop.eup %4467 }
0x1224   :  { %v5402_v15 = vmul.f32 %v4468_v47, %v4466_v12 }
0x1226   :  { %3882 = vmatmul.mubr.msk.f32.vlgmr.msra.gmra.mrb[16].mxu1 %vm75_vm0, %v5402_v15 }
0x1227   :  { %4064 = vmatpush3.bf16.msra.mxu1 %v5199_v54  ;;  %3903 = vmatprep.mubr.msk.f32.mxu1 %vm4617_vm3, %v4601_v6 }
0x1228   :  { %4065 = vmatprep.subr.bf16.mxu1 %v4616_v21 }
0x122b   :  { %4067 = vmatpush3.bf16.msra.mxu1 %v5212_v63 }
0x12f9   :  { %v2509_v39 = vpop.f32.mrb[16].mxu1 }
0x12fa   :  { %v2513_v18 = vadd.f32 %v2509_v39, %v5329_v37  ;;  %v3883_v22 = vpop.f32.mrb[17].mxu1 }
0x12fc   :  { %2525 = vrot.lane.b32.xlu1 %v2513_v18, %s4604_s5  ;;  %2515 = vrot.lane.b32.xlu0 %v2513_v18, %s4602_s0 }
0x1300   :  { %2538 = vrot.lane.b32.xlu1 %v2513_v18, %s4605_s27  ;;  %2528 = vrot.lane.b32.xlu0 %v2513_v18, %s4603_s6 }
0x1304   :  { %2546 = vrot.lane.b32.xlu1 %v2513_v18, %s4607_s29  ;;  %2541 = vrot.lane.b32.xlu0 %v2513_v18, %s4606_s28 }
0x136e   :  { %v2526_v28 = vpop.permute.xlu1 %2525  ;;  %v2516_v30 = vpop.permute.xlu0 %2515 }
0x136f   :  { %v2518_v4 = vsel %vm366_vm2, %v2513_v18, %v2516_v30 }
0x1370   :  { %v3541_v2 = vmul.f32 -1.442695, %v2518_v4 }
0x1372   :  { %4469 = vpow2.f32 %v3541_v2  ;;  %v2539_v37 = vpop.permute.xlu1 %2538  ;;  %v2529_v5 = vpop.permute.xlu0 %2528 }
0x1373   :  { %v2531_v14 = vsel %vm366_vm2, %v2526_v28, %v2529_v5 }
0x1374   :  { %v3542_v42 = vmul.f32 -1.442695, %v2531_v14 }
0x1376   :  { %4471 = vpow2.f32 %v3542_v42  ;;  %v2547_v62 = vpop.permute.xlu1 %2546  ;;  %v2542_v35 = vpop.permute.xlu0 %2541 }
0x1377   :  { %v2549_v20 = vsel %vm366_vm2, %v2516_v30, %v2547_v62  ;;  %v2544_v3 = vsel %vm366_vm2, %v2539_v37, %v2542_v35 }
0x1378   :  { %v3543_v31 = vmul.f32 -1.442695, %v2549_v20 }
0x137a   :  { %4473 = vpow2.f32 %v3543_v31 }
0x137c   :  { %v4470_v13 = vpop.eup %4469 }
0x137d   :  { %v2522_v24 = vadd.f32 1.0, %v4470_v13 }
0x137f   :  { %4475 = vrcp.f32 %v2522_v24 }
0x1380   :  { %v4472_v7 = vpop.eup %4471  ;;  %4477 = vtanh.f32 %v2544_v3 }
0x1381   :  { %v2535_v51 = vadd.f32 1.0, %v4472_v7 }
0x1383   :  { %4479 = vrcp.f32 %v2535_v51 }
0x1384   :  { %v4474_v32 = vpop.eup %4473 }
0x1385   :  { %v2553_v59 = vadd.f32 1.0, %v4474_v32 }
0x1387   :  { %4481 = vrcp.f32 %v2553_v59 }
0x1389   :  { %v4476_v8 = vpop.eup %4475 }
0x138a   :  { %v4478_v45 = vpop.eup %4477 }
0x138b   :  { %v2557_v52 = vmul.f32 %v4478_v45, %v4476_v8 }
0x138d   :  { %v4480_v48 = vpop.eup %4479 }
0x138e   :  { %v2556_v33 = vmul.f32 %v4480_v48, %v2436_v40 }
0x1390   :  { %v2558_v43 = vadd.f32 %v2557_v52, %v2556_v33 }
0x1391   :  { %v4482_v55 = vpop.eup %4481 }
0x1392   :  { %4483 = vtanh.f32 %v2558_v43 }
0x139c   :  { %v4484_v9 = vpop.eup %4483 }
0x139d   :  { %v5422_v27 = vmul.f32 %v4484_v9, %v4482_v55 }
0x139f   :  { %3893 = vmatmul.mubr.msk.f32.vlgmr.msra.gmra.mrb[26].mxu0 %vm75_vm0, %v5422_v27 }
0x13a0   :  { %4070 = vmatpush3.bf16.msra.mxu0 %v5199_v54  ;;  %3914 = vmatprep.mubr.msk.f32.mxu0 %vm4617_vm3, %v4601_v6 }
0x13a1   :  { %4071 = vmatprep.subr.bf16.mxu0 %v4616_v21 }
0x13a4   :  { %4073 = vmatpush3.bf16.msra.mxu0 %v5212_v63 }
0x1472   :  { %v2631_v36 = vpop.f32.mrb[26].mxu0 }
0x1473   :  { %v2635_v16 = vadd.f32 %v2631_v36, %v5314_v56  ;;  %v3894_v41 = vpop.f32.mrb[27].mxu0 }
0x1475   :  { %2647 = vrot.lane.b32.xlu1 %v2635_v16, %s4604_s5  ;;  %2637 = vrot.lane.b32.xlu0 %v2635_v16, %s4602_s0 }
0x1479   :  { %2660 = vrot.lane.b32.xlu1 %v2635_v16, %s4605_s27  ;;  %2650 = vrot.lane.b32.xlu0 %v2635_v16, %s4603_s6 }
0x147d   :  { %2668 = vrot.lane.b32.xlu1 %v2635_v16, %s4607_s29  ;;  %2663 = vrot.lane.b32.xlu0 %v2635_v16, %s4606_s28 }
0x14e7   :  { %v2648_v6 = vpop.permute.xlu1 %2647  ;;  %v2638_v54 = vpop.permute.xlu0 %2637 }
0x14e8   :  { %v2640_v21 = vsel %vm366_vm2, %v2635_v16, %v2638_v54 }
0x14e9   :  { %v3545_v63 = vmul.f32 -1.442695, %v2640_v21 }
0x14eb   :  { %4485 = vpow2.f32 %v3545_v63  ;;  %v2661_v56 = vpop.permute.xlu1 %2660  ;;  %v2651_v19 = vpop.permute.xlu0 %2650 }
0x14ec   :  { %v2653_v49 = vsel %vm366_vm2, %v2648_v6, %v2651_v19 }
0x14ed   :  { %v3546_v34 = vmul.f32 -1.442695, %v2653_v49 }
0x14ef   :  { %4487 = vpow2.f32 %v3546_v34  ;;  %v2669_v44 = vpop.permute.xlu1 %2668  ;;  %v2664_v10 = vpop.permute.xlu0 %2663 }
0x14f0   :  { %v2671_v11 = vsel %vm366_vm2, %v2638_v54, %v2669_v44  ;;  %v2666_v58 = vsel %vm366_vm2, %v2661_v56, %v2664_v10  ;;  %v3119_v10 = vld [vmem:[%s5611_s12 + $0x10] sm:$0xff] }
0x14f1   :  { %v3547_v29 = vmul.f32 -1.442695, %v2671_v11 }
0x14f3   :  { %4489 = vpow2.f32 %v3547_v29  ;;  %v3035_v29 = vld [vmem:[%s5610_s11 + $0x18] sm:$0xff] }
0x14f5   :  { %v4486_v26 = vpop.eup %4485 }
0x14f6   :  { %v2644_v38 = vadd.f32 1.0, %v4486_v26  ;;  %v1914_v26 = vld [vmem:[%s5601_s2] sm:$0x3] }
0x14f8   :  { %4491 = vrcp.f32 %v2644_v38 }
0x14f9   :  { %v4488_v40 = vpop.eup %4487  ;;  %4493 = vtanh.f32 %v2666_v58  ;;  %v3120_v58 = vld [vmem:[%s5611_s12 + $0x18] sm:$0xff] }
0x14fa   :  { %v2657_v12 = vadd.f32 1.0, %v4488_v40  ;;  %v4086_v40 = vpack.c.bf16 %v3120_v58, %v3119_v10 }
0x14fc   :  { %4495 = vrcp.f32 %v2657_v12 }
0x14fd   :  { %v4490_v47 = vpop.eup %4489 }
0x14fe   :  { %v2675_v28 = vadd.f32 1.0, %v4490_v47 }
0x1500   :  { %4497 = vrcp.f32 %v2675_v28 }
0x1502   :  { %v4492_v39 = vpop.eup %4491 }
0x1503   :  { %v4494_v18 = vpop.eup %4493 }
0x1504   :  { %v2679_v4 = vmul.f32 %v4494_v18, %v4492_v39 }
0x1506   :  { %v4496_v22 = vpop.eup %4495 }
0x1507   :  { %v2678_v30 = vmul.f32 %v4496_v22, %v2558_v43 }
0x1509   :  { %v2680_v2 = vadd.f32 %v2679_v4, %v2678_v30 }
0x150a   :  { %v4498_v37 = vpop.eup %4497 }
0x150b   :  { %4499 = vtanh.f32 %v2680_v2 }
0x1515   :  { %v4500_v5 = vpop.eup %4499 }
0x1516   :  { %v5442_v14 = vmul.f32 %v4500_v5, %v4498_v37 }
0x1518   :  { %3904 = vmatmul.mubr.msk.f32.vlgmr.msra.gmra.mrb[18].mxu1 %vm75_vm0, %v5442_v14 }
0x15eb   :  { %v2753_v42 = vpop.f32.mrb[18].mxu1 }
0x15ec   :  { %v2757_v62 = vadd.f32 %v2753_v42, %v5317_v17  ;;  %v3905_v20 = vpop.f32.mrb[19].mxu1 }
0x15ee   :  { %2769 = vrot.lane.b32.xlu1 %v2757_v62, %s4604_s5  ;;  %2759 = vrot.lane.b32.xlu0 %v2757_v62, %s4602_s0 }
0x15f2   :  { %2782 = vrot.lane.b32.xlu1 %v2757_v62, %s4605_s27  ;;  %2772 = vrot.lane.b32.xlu0 %v2757_v62, %s4603_s6 }
0x15f6   :  { %2790 = vrot.lane.b32.xlu1 %v2757_v62, %s4607_s29  ;;  %2785 = vrot.lane.b32.xlu0 %v2757_v62, %s4606_s28 }
0x1660   :  { %v2770_v13 = vpop.permute.xlu1 %2769  ;;  %v2760_v31 = vpop.permute.xlu0 %2759 }
0x1661   :  { %v2762_v35 = vsel %vm366_vm2, %v2757_v62, %v2760_v31 }
0x1662   :  { %v3549_v24 = vmul.f32 -1.442695, %v2762_v35 }
0x1664   :  { %4501 = vpow2.f32 %v3549_v24  ;;  %v2783_v17 = vpop.permute.xlu1 %2782  ;;  %v2773_v3 = vpop.permute.xlu0 %2772 }
0x1665   :  { %v2775_v7 = vsel %vm366_vm2, %v2770_v13, %v2773_v3 }
0x1666   :  { %v3550_v51 = vmul.f32 -1.442695, %v2775_v7 }
0x1668   :  { %4503 = vpow2.f32 %v3550_v51  ;;  %v2791_v32 = vpop.permute.xlu1 %2790  ;;  %v2786_v59 = vpop.permute.xlu0 %2785 }
0x1669   :  { %v2793_v8 = vsel %vm366_vm2, %v2760_v31, %v2791_v32  ;;  %v2788_v52 = vsel %vm366_vm2, %v2783_v17, %v2786_v59 }
0x166a   :  { %v3551_v48 = vmul.f32 -1.442695, %v2793_v8 }
0x166c   :  { %4505 = vpow2.f32 %v3551_v48 }
0x166e   :  { %v4502_v45 = vpop.eup %4501 }
0x166f   :  { %v2766_v33 = vadd.f32 1.0, %v4502_v45 }
0x1671   :  { %4507 = vrcp.f32 %v2766_v33 }
0x1672   :  { %v4504_v43 = vpop.eup %4503  ;;  %4509 = vtanh.f32 %v2788_v52 }
0x1673   :  { %v2779_v55 = vadd.f32 1.0, %v4504_v43 }
0x1675   :  { %4511 = vrcp.f32 %v2779_v55 }
0x1676   :  { %v4506_v9 = vpop.eup %4505 }
0x1677   :  { %v2797_v6 = vadd.f32 1.0, %v4506_v9 }
0x1679   :  { %4513 = vrcp.f32 %v2797_v6  ;;  %v2940_v6 = vsel %vm366_vm2, %v5381_v23, %v5442_v14 }
0x167b   :  { %v4508_v36 = vpop.eup %4507 }
0x167c   :  { %v4510_v16 = vpop.eup %4509 }
0x167d   :  { %v2801_v21 = vmul.f32 %v4510_v16, %v4508_v36 }
0x167f   :  { %v4512_v41 = vpop.eup %4511 }
0x1680   :  { %v2800_v54 = vmul.f32 %v4512_v41, %v2680_v2 }
0x1682   :  { %v5457_v63 = vadd.f32 %v2801_v21, %v2800_v54 }
0x1683   :  { %v4514_v56 = vpop.eup %4513 }
0x1684   :  { %4515 = vtanh.f32 %v5457_v63 }
0x168e   :  { %v4516_v19 = vpop.eup %4515 }
0x168f   :  { %v5460_v49 = vmul.f32 %v4516_v19, %v4514_v56  ;;  %v2952_v56 = vsel %vm366_vm2, %v5422_v27, %v5402_v15 }
0x1691   :  { %3915 = vmatmul.mubr.msk.f32.vlgmr.msra.gmra.mrb[28].mxu0 %vm75_vm0, %v5460_v49  ;;  %v2934_v9 = vsel %vm366_vm2, %v5360_v46, %v5460_v49 }
0x1764   :  { %v2875_v34 = vpop.f32.mrb[28].mxu0 }
0x1765   :  { %v2879_v44 = vadd.f32 %v2875_v34, %v5320_v61  ;;  %v3916_v11 = vpop.f32.mrb[29].mxu0  ;;  %v2964_v34 = vsel %vm366_vm2, %v5460_v49, %v5360_v46 }
0x1766   :  { %v2958_v11 = vsel %vm366_vm2, %v5442_v14, %v5381_v23 }
0x1767   :  { %2891 = vrot.lane.b32.xlu1 %v2879_v44, %s4604_s5  ;;  %2881 = vrot.lane.b32.xlu0 %v2879_v44, %s4602_s0 }
0x176b   :  { %2904 = vrot.lane.b32.xlu1 %v2879_v44, %s4605_s27  ;;  %2894 = vrot.lane.b32.xlu0 %v2879_v44, %s4603_s6 }
0x176f   :  { %2912 = vrot.lane.b32.xlu1 %v2879_v44, %s4607_s29  ;;  %2907 = vrot.lane.b32.xlu0 %v2879_v44, %s4606_s28 }
0x1773   :  { %2930 = vperm.xlu1 %4141, %v1914_v26   ;;  %2936 = vperm.xlu0 %4140, %v1914_v26  }
0x1777   :  { %4142 = vset.pattern.permute.xlu1 %v4610_v57  ;;  %4143 = vset.pattern.permute.xlu0 %v4611_v60  ;;  %v3032_v57 = vld [vmem:[%s5610_s11] sm:$0xff]  ;;  %v3033_v60 = vld [vmem:[%s5610_s11 + $0x8] sm:$0xff] }
0x1778   :  { %2942 = vperm.xlu1 %4142, %v1914_v26   ;;  %2948 = vperm.xlu0 %4143, %v1914_v26  }
0x177c   :  { %4144 = vset.pattern.permute.xlu1 %v4612_v50  ;;  %4146 = vset.pattern.permute.xlu0 %v4613_v53  ;;  %v3117_v50 = vld [vmem:[%s5611_s12] sm:$0xff]  ;;  %v4074_v53 = vpack.c.bf16 %v3033_v60, %v3032_v57 }
0x177d   :  { %2954 = vperm.xlu1 %4144, %v1914_v26   ;;  %2966 = vperm.xlu0 %4146, %v1914_v26  }
0x177e   :  { %4075 = vmatprep.subr.bf16.mxu1 %v4074_v53 }
0x177f   :  { %4077 = vmatpush3.bf16.msra.mxu1 %v4074_v53 }
0x1781   :  { %4145 = vset.pattern.permute.xlu1 %v4615_v1  ;;  %4148 = vset.pattern.permute.xlu0 %v4614_v0  ;;  %v3118_v1 = vld [vmem:[%s5611_s12 + $0x8] sm:$0xff] }
0x1782   :  { %2960 = vperm.xlu1 %4145, %v1914_v26   ;;  %v4082_v61 = vpack.c.bf16 %v3118_v1, %v3117_v50 }
0x1784   :  { %4083 = vmatprep.subr.bf16.mxu0 %v4082_v61 }
0x1785   :  { %4085 = vmatpush3.bf16.msra.mxu0 %v4082_v61 }
0x1786   :  { %4147 = vset.pattern.permute.xlu1 %v4614_v0  ;;  %v3034_v0 = vld [vmem:[%s5610_s11 + $0x10] sm:$0xff]  ;;  %4087 = vmatprep.subr.bf16.mxu0 %v4086_v40  ;;  %s4618_s11 = smov 120  }
0x1787   :  { %2972 = vperm.xlu1 %4147, %v1914_v26   ;;  %v4078_v38 = vpack.c.bf16 %v3035_v29, %v3034_v0 }
0x1789   :  { %4079 = vmatprep.subr.bf16.mxu1 %v4078_v38  ;;  %4089 = vmatpush3.bf16.msra.mxu0 %v4086_v40 }
0x178a   :  { %4081 = vmatpush3.bf16.msra.mxu1 %v4078_v38 }
0x17d9   :  { %v2892_v12 = vpop.permute.xlu1 %2891  ;;  %v2882_v47 = vpop.permute.xlu0 %2881 }
0x17da   :  { %v2884_v39 = vsel %vm366_vm2, %v2879_v44, %v2882_v47 }
0x17db   :  { %v3553_v18 = vmul.f32 -1.442695, %v2884_v39 }
0x17dd   :  { %4517 = vpow2.f32 %v3553_v18  ;;  %v2905_v22 = vpop.permute.xlu1 %2904  ;;  %v2895_v28 = vpop.permute.xlu0 %2894 }
0x17de   :  { %v2897_v30 = vsel %vm366_vm2, %v2892_v12, %v2895_v28 }
0x17df   :  { %v3554_v4 = vmul.f32 -1.442695, %v2897_v30 }
0x17e1   :  { %4519 = vpow2.f32 %v3554_v4  ;;  %v2913_v2 = vpop.permute.xlu1 %2912  ;;  %v2908_v62 = vpop.permute.xlu0 %2907 }
0x17e2   :  { %v2915_v37 = vsel %vm366_vm2, %v2882_v47, %v2913_v2  ;;  %v2910_v13 = vsel %vm366_vm2, %v2905_v22, %v2908_v62 }
0x17e3   :  { %v3555_v42 = vmul.f32 -1.442695, %v2915_v37 }
0x17e5   :  { %4521 = vpow2.f32 %v3555_v42 }
0x17e7   :  { %v4518_v5 = vpop.eup %4517 }
0x17e8   :  { %v2888_v20 = vadd.f32 1.0, %v4518_v5 }
0x17ea   :  { %4523 = vrcp.f32 %v2888_v20 }
0x17eb   :  { %v4520_v31 = vpop.eup %4519  ;;  %4525 = vtanh.f32 %v2910_v13 }
0x17ec   :  { %v2901_v35 = vadd.f32 1.0, %v4520_v31 }
0x17ee   :  { %4527 = vrcp.f32 %v2901_v35 }
0x17ef   :  { %v4522_v17 = vpop.eup %4521 }
0x17f0   :  { %v2919_v32 = vadd.f32 1.0, %v4522_v17 }
0x17f2   :  { %v2931_v24 = vpop.permute.xlu1 %2930  ;;  %4529 = vrcp.f32 %v2919_v32  ;;  %v2937_v33 = vpop.permute.xlu0 %2936 }
0x17f3   :  { %v2939_v41 = vmul.f32 %v2937_v33, %v2934_v9 }
0x17f4   :  { %v4524_v3 = vpop.eup %4523 }
0x17f5   :  { %v4526_v7 = vpop.eup %4525 }
0x17f6   :  { %v2923_v45 = vmul.f32 %v4526_v7, %v4524_v3 }
0x17f7   :  { %v2943_v48 = vpop.permute.xlu1 %2942  ;;  %v2949_v43 = vpop.permute.xlu0 %2948 }
0x17f8   :  { %v4528_v51 = vpop.eup %4527  ;;  %v2945_v21 = vmul.f32 %v2943_v48, %v2940_v6 }
0x17f9   :  { %v2922_v8 = vmul.f32 %v4528_v51, %v5457_v63  ;;  %v2946_v63 = vsel %vm366_vm2, %v5402_v15, %v5422_v27  ;;  %v2977_v27 = vrot.slane %v2939_v41, 7 }
0x17fa   :  { %v2951_v19 = vmul.f32 %v2949_v43, %v2946_v63  ;;  %v2980_v1 = vrot.slane %v2945_v21, 6  ;;  %v3000_v0 = vrot.slane %v2945_v21, 7 }
0x17fb   :  { %v2924_v59 = vadd.f32 %v2923_v45, %v2922_v8 }
0x17fc   :  { %v2955_v52 = vpop.permute.xlu1 %2954  ;;  %v4530_v55 = vpop.eup %4529  ;;  %v2983_v14 = vrot.slane %v2951_v19, 5  ;;  %v3002_v38 = vrot.slane %v2951_v19, 6 }
0x17fd   :  { %4531 = vtanh.f32 %v2924_v59  ;;  %v2967_v44 = vpop.permute.xlu0 %2966  ;;  %v2957_v57 = vmul.f32 %v2955_v52, %v2952_v56 }
0x17fe   :  { %v2969_v46 = vmul.f32 %v2967_v44, %v2964_v34 }
0x17ff   :  { %v2986_v10 = vrot.slane %v2957_v57, 4  ;;  %v3004_v47 = vrot.slane %v2957_v57, 5 }
0x1800   :  { %v2992_v18 = vrot.slane %v2969_v46, 2  ;;  %v3008_v37 = vrot.slane %v2969_v46, 3 }
0x1801   :  { %v2961_v36 = vpop.permute.xlu1 %2960 }
0x1802   :  { %v2963_v53 = vmul.f32 %v2961_v36, %v2958_v11 }
0x1804   :  { %v2989_v40 = vrot.slane %v2963_v53, 3  ;;  %v3006_v28 = vrot.slane %v2963_v53, 4 }
0x1806   :  { %v2973_v60 = vpop.permute.xlu1 %2972 }
0x1807   :  { %v4532_v16 = vpop.eup %4531 }
0x1808   :  { %v2926_v54 = vmul.f32 %v4532_v16, %v4530_v55 }
0x180a   :  { %v2927_v26 = vsel %vm366_vm2, %v5339_v25, %v2926_v54  ;;  %v2970_v15 = vsel %vm366_vm2, %v2926_v54, %v5339_v25 }
0x180b   :  { %v2933_v50 = vmul.f32 %v2931_v24, %v2927_v26  ;;  %v2975_v61 = vmul.f32 %v2973_v60, %v2970_v15 }
0x180d   :  { %v2998_v49 = vrot.slane %v2933_v50, 1  ;;  %v3012_v23 = vsel %vm1918_vm4, %v2933_v50, %v2977_v27  ;;  %v2995_v4 = vrot.slane %v2975_v61, 1  ;;  %v3010_v62 = vrot.slane %v2975_v61, 2 }
0x180e   :  { %v3014_v29 = vsel %vm3013_vm5, %v3012_v23, %v2980_v1 }
0x180f   :  { %v3025_v25 = vsel %vm1918_vm4, %v2998_v49, %v2939_v41  ;;  %v3016_v58 = vsel %vm3015_vm6, %v3014_v29, %v2983_v14  ;;  %v3291_v49 = vld [vmem:[%s5602_s3] sm:$0xff] }
0x1810   :  { %v3026_v12 = vsel %vm3013_vm5, %v3025_v25, %v3000_v0  ;;  %v3018_v39 = vsel %vm3017_vm7, %v3016_v58, %v2986_v10  ;;  %v3308_v61 = vsub.f32 1.0, %v3291_v49  ;;  %v3292_v25 = vld [vmem:[%s5603_s4] sm:$0xff] }
0x1811   :  { %v3027_v22 = vsel %vm3015_vm6, %v3026_v12, %v3002_v38  ;;  %v3020_v30 = vsel %vm3019_vm8, %v3018_v39, %v2989_v40  ;;  %v3324_v58 = vsel %vm3289_vm12, %v3292_v25, 0.0  ;;  %v3567_v12 = vld [vmem:[%s5603_s4 + $0x8] sm:$0xff] }
0x1812   :  { %v3028_v2 = vsel %vm3017_vm7, %v3027_v22, %v3004_v47  ;;  %v3022_v5 = vsel %vm3021_vm9, %v3020_v30, %v2992_v18  ;;  %v3394_v39 = vsel %vm3289_vm12, %v3567_v12, 0.0  ;;  %v3566_v18 = vld [vmem:[%s5602_s3 + $0x8] sm:$0xff]  ;;  %s4619_s3 = smov [#allocation4]  }
0x1813   :  { %v3029_v42 = vsel %vm3019_vm8, %v3028_v2, %v3006_v28  ;;  %v3024_v20 = vsel %vm3023_vm10, %v3022_v5, %v2995_v4  ;;  %v3374_v22 = vsub.f32 1.0, %v3566_v18  ;;  %s3428_s4 = sshll.u32 %s4619_s3, 4  ;;  %s3429_s4 = int_to_ptr.vmem [resolvable:$true] %s3428_s4 }
0x1814   :  { %3925 = vmatprep.mubr.msk.f32.mxu1 %vm75_vm0, %v3024_v20  ;;  %3936 = vmatprep.mubr.msk.f32.mxu0 %vm75_vm0, %v3024_v20  ;;  %v3030_v13 = vsel %vm3021_vm9, %v3029_v42, %v3008_v37  ;;  %s4553_s9 = scalar_lea.vmem %s3429_s4, 256  ;;  %p4558_p1 = scmp.lt.s32.totalorder %s3429_s4, %s3429_s4 }
0x1815   :  { %v3031_v31 = vsel %vm3023_vm10, %v3030_v13, %v3010_v62  ;;  %p4554_p0 = scmp.ne.s32.totalorder %s3429_s4, %s4553_s9  ;;  %p4559_p2 = scmp.lt.s32.totalorder %s4553_s9, %s4553_s9 }
0x1816   :  { %3926 = vmatmul.mubr.msk.f32.vlgmr.msra.gmra.mrb[20].mxu1 %vm75_vm0, %v3031_v31  ;;  %3937 = vmatmul.mubr.msk.f32.vlgmr.msra.gmra.mrb[30].mxu0 %vm75_vm0, %v3031_v31 }
0x1817   :  { %p4560_p3 = por %p4559_p2, %p4558_p1 }
0x1819   :  { %p4561_p4 = pnand %p4560_p3, %p4554_p0 }
0x18e9   :  { %v3927_v35 = vpop.f32.mrb[20].mxu1  ;;  %v3938_v24 = vpop.f32.mrb[30].mxu0 }
0x18ea   :  { %v3108_v17 = vpop.f32.mrb[21].mxu1  ;;  %v3187_v3 = vpop.f32.mrb[31].mxu0 }
0x18eb   :  { %v4090_v7 = vpack.c.bf16 %v3938_v24, %v3187_v3  ;;  %3943 = vmatprep.mubr.msk.f32.mxu1 %vm75_vm0, %v3108_v17 }
0x18ed   :  { %4092 = vmatprep.subr.msk.bf16.mxu1 %vm4091_vm11, %v4090_v7 }
0x18ee   :  { %4095 = vmatpush3.bf16.xpose.msk.msra.mxu1 %vm4091_vm11, %v4090_v7 }
0x18f5   :  { %3944 = vmatmul.mubr.msk.f32.vlgmr.msra.gmra.mrb[22].mxu1 %vm75_vm0, %v3927_v35 }
0x19c8   :  { %v3945_v51 = vpop.f32.mrb[22].mxu1 }
0x19c9   :  { %v3355_v32 = vand.u32 2147483647, %v3945_v51  ;;  %v3274_v8 = vpop.f32.mrb[23].mxu1  ;;  %v3365_v6 = vsub.f32 0.0, %v3945_v51  ;;  %v3362_v19 = vmin.f32 %v3945_v51, 0.0 }
0x19ca   :  { %v3564_v48 = vmul.f32 -1.442695, %v3274_v8  ;;  %v3293_v59 = vand.u32 2147483647, %v3274_v8  ;;  %v3303_v15 = vsub.f32 0.0, %v3274_v8  ;;  %v3300_v50 = vmin.f32 %v3274_v8, 0.0 }
0x19cb   :  { %v3356_v45 = vsub.f32 0.0, %v3355_v32  ;;  %v3366_v34 = vmin.f32 %v3365_v6, 0.0  ;;  %v3565_v28 = vmul.f32 -1.442695, %v3945_v51 }
0x19cc   :  { %4533 = vpow2.f32 %v3564_v48  ;;  %v3294_v52 = vsub.f32 0.0, %v3293_v59  ;;  %v3304_v53 = vmin.f32 %v3303_v15, 0.0 }
0x19cd   :  { %v3357_v33 = vmul.f32 1.442695, %v3356_v45 }
0x19ce   :  { %v3295_v43 = vmul.f32 1.442695, %v3294_v52 }
0x19cf   :  { %4535 = vpow2.f32 %v3357_v33 }
0x19d0   :  { %4537 = vpow2.f32 %v3295_v43 }
0x19d6   :  { %v4534_v55 = vpop.eup %4533 }
0x19d7   :  { %v3286_v9 = vadd.f32 1.0, %v4534_v55 }
0x19d9   :  { %v4536_v36 = vpop.eup %4535  ;;  %4539 = vrcp.f32 %v3286_v9 }
0x19da   :  { %v3359_v16 = vadd.f32 1.0, %v4536_v36  ;;  %v4538_v41 = vpop.eup %4537 }
0x19db   :  { %v3297_v54 = vadd.f32 1.0, %v4538_v41 }
0x19dc   :  { %4541 = vlog2.f32 %v3359_v16 }
0x19dd   :  { %4543 = vlog2.f32 %v3297_v54 }
0x19de   :  { %4545 = vpow2.f32 %v3565_v28 }
0x19e3   :  { %v4540_v21 = vpop.eup %4539 }
0x19e4   :  { %3290 = vst.msk [vmem:[#allocation4] sm:$0xff] %vm3289_vm12, %v4540_v21 }
0x19e6   :  { %v4542_v63 = vpop.eup %4541 }
0x19e7   :  { %v3361_v56 = vmul.f32 0.6931472, %v4542_v63  ;;  %v4544_v60 = vpop.eup %4543 }
0x19e8   :  { %v3299_v27 = vmul.f32 0.6931472, %v4544_v60  ;;  %v4546_v13 = vpop.eup %4545 }
0x19e9   :  { %v3363_v44 = vsub.f32 %v3362_v19, %v3361_v56  ;;  %v3367_v11 = vsub.f32 %v3366_v34, %v3361_v56  ;;  %v3342_v31 = vadd.f32 1.0, %v4546_v13 }
0x19ea   :  { %v3301_v1 = vsub.f32 %v3300_v50, %v3299_v27  ;;  %v3305_v46 = vsub.f32 %v3304_v53, %v3299_v27 }
0x19eb   :  { %v3368_v26 = vmax.f32 %v3367_v11, -100.0  ;;  %v3364_v57 = vmax.f32 %v3363_v44, -100.0  ;;  %4547 = vrcp.f32 %v3342_v31 }
0x19ec   :  { %v3302_v23 = vmax.f32 %v3301_v1, -100.0  ;;  %v3306_v14 = vmax.f32 %v3305_v46, -100.0 }
0x19ed   :  { %3376 = vrot.lane.b32.xlu0 %v3368_v26, %s4618_s11  ;;  %3370 = vrot.lane.b32.xlu1 %v3364_v57, %s4618_s11 }
0x19ee   :  { %v3307_v0 = vmul.f32 %v3302_v23, %v3291_v49  ;;  %v3309_v29 = vmul.f32 %v3308_v61, %v3306_v14 }
0x19f0   :  { %v3310_v10 = vadd.f32 %v3309_v29, %v3307_v0 }
0x19f2   :  { %v3311_v38 = vsub.f32 0.0, %v3310_v10 }
0x19f4   :  { %v3312_v40 = vmul.f32 %v3311_v38, %v3292_v25 }
0x19f5   :  { %v4548_v35 = vpop.eup %4547 }
0x19f6   :  { %v3313_v47 = vsel %vm3289_vm12, %v3312_v40, 0.0 }
0x1a0c   :  { %3325 = vadd.xlane.f32.xlu0 %v3324_v58 }
0x1a11   :  { %3314 = vadd.xlane.f32.xlu1 %v3313_v47 }
0x1a15   :  { %3395 = vadd.xlane.f32.xlu1 %v3394_v39 }
0x1a5f   :  { %v3377_v30 = vpop.permute.xlu0 %3376  ;;  %v3371_v4 = vpop.permute.xlu1 %3370 }
0x1a60   :  { %v3379_v2 = vmul.f32 %v3377_v30, %v3374_v22  ;;  %v3373_v37 = vmul.f32 %v3566_v18, %v3371_v4 }
0x1a62   :  { %v3380_v5 = vadd.f32 %v3379_v2, %v3373_v37 }
0x1a64   :  { %v3381_v42 = vsub.f32 0.0, %v3380_v5 }
0x1a66   :  { %v3382_v62 = vmul.f32 %v3567_v12, %v3381_v42 }
0x1a68   :  { %v3383_v20 = vsel %vm3289_vm12, %v3382_v62, 0.0 }
0x1a69   :  { %3384 = vadd.xlane.f32.xlu0 %v3383_v20 }
0x1a7f   :  { %3346 = vrot.lane.b32.xlu0 %v4548_v35, %s4618_s11 }
0x1a99   :  { %v3326_v24 = vpop.xlane.xlu0 %3325 }
0x1a9a   :  { %v3327_v17 = vrot.slane %v3326_v24, 4 }
0x1a9c   :  { %v3328_v3 = vadd.f32 %v3327_v17, %v3326_v24 }
0x1a9e   :  { %v3329_v7 = vrot.slane %v3328_v3, 2  ;;  %v3315_v51 = vpop.xlane.xlu1 %3314 }
0x1a9f   :  { %v3316_v32 = vrot.slane %v3315_v51, 4 }
0x1aa0   :  { %v3330_v8 = vadd.f32 %v3329_v7, %v3328_v3 }
0x1aa1   :  { %v3317_v45 = vadd.f32 %v3316_v32, %v3315_v51 }
0x1aa2   :  { %v3331_v59 = vrot.slane %v3330_v8, 1  ;;  %v3396_v9 = vpop.xlane.xlu1 %3395 }
0x1aa3   :  { %v3318_v48 = vrot.slane %v3317_v45, 2  ;;  %v3397_v36 = vrot.slane %v3396_v9, 4 }
0x1aa4   :  { %v3332_v43 = vadd.f32 %v3331_v59, %v3330_v8 }
0x1aa5   :  { %v3319_v33 = vadd.f32 %v3318_v48, %v3317_v45  ;;  %v3398_v16 = vadd.f32 %v3397_v36, %v3396_v9 }
0x1aa7   :  { %v3320_v52 = vrot.slane %v3319_v33, 1  ;;  %v3399_v41 = vrot.slane %v3398_v16, 2 }
0x1aa9   :  { %v3321_v55 = vadd.f32 %v3320_v52, %v3319_v33  ;;  %v3400_v63 = vadd.f32 %v3399_v41, %v3398_v16 }
0x1aab   :  { %4096 = vpush %v3321_v55 }
0x1aac   :  { %4098 = vpush %v3332_v43 }
0x1af6   :  { %v3385_v6 = vpop.xlane.xlu0 %3384 }
0x1af7   :  { %v3386_v54 = vrot.slane %v3385_v6, 4 }
0x1af9   :  { %v3387_v21 = vadd.f32 %v3386_v54, %v3385_v6 }
0x1afa   :  { %v3347_v56 = vpop.permute.xlu0 %3346 }
0x1afb   :  { %v3388_v19 = vrot.slane %v3387_v21, 2  ;;  %3350 = vst.msk [vmem:[#allocation4 + $0x8] sm:$0xff] %vm3289_vm12, %v3347_v56 }
0x1afc   :  { %4564 = shalt.err (!%p4561_p4)
}
0x1afd   :  { %s4565_s0 = scalar_lea.hbm %s5613_s14, 256 }
0x1afe   :  { %p4566_p5 = scmp.ne.s32.totalorder %s5613_s14, %s4565_s0  ;;  %p4569_p6 = scmp.lt.u32.totalorder %s4565_s0, %s5613_s14 }
0x1b00   :  { %p4571_p7 = pnand %p4569_p6, %p4566_p5 }
0x1b02   :  { %4574 = shalt.err (!%p4571_p7)
}
0x1b03   :  { %s4620_s29 = smov 128   ;;  %s4621_s18 = smov 8   ;;  %v3389_v34 = vadd.f32 %v3388_v19, %v3387_v21  ;;  %v3401_v44 = vrot.slane %v3400_v63, 1  ;;  %vm3411_vm13 = vcmask 0  }
0x1b04   :  { %3434 = dma.vmem_to_hbm [thread:$0]  %s3429_s4, 256, %s5613_s14, [#allocation5], %s4620_s29, %s4620_s29, %s4621_s18  }
0x1b05   :  { %v3390_v11 = vrot.slane %v3389_v34, 1  ;;  %v3402_v57 = vadd.f32 %v3401_v44, %v3400_v63  ;;  %s4097_s21 = spop %4096  ;;  %s4622_s14 = smov [#allocation2]  }
0x1b06   :  { %s4099_s22 = spop %4098  ;;  %v3323_v46 = vstv %s4097_s21  ;;  %s3419_s25 = sshll.u32 %s4622_s14, 4  ;;  %s3420_s25 = int_to_ptr.vmem [resolvable:$true] %s3419_s25 }
0x1b07   :  { %v3391_v26 = vadd.f32 %v3390_v11, %v3389_v34  ;;  %v3334_v60 = vstv %s4099_s22  ;;  %s4575_s26 = scalar_lea.vmem %s3420_s25, 16  ;;  %s4579_s11 = scalar_lea.vmem %s3420_s25, 32 }
0x1b08   :  { %v3335_v15 = vmax.f32 %v3334_v60, 1.0  ;;  %p4576_p8 = scmp.ne.s32.totalorder %s3420_s25, %s4575_s26  ;;  %p4580_p9 = scmp.lt.s32.totalorder %s3420_s25, %s3420_s25 }
0x1b09   :  { %4100 = vpush %v3391_v26  ;;  %p4581_p10 = scmp.lt.s32.totalorder %s4579_s11, %s4575_s26 }
0x1b0a   :  { %4102 = vpush %v3402_v57  ;;  %4549 = vrcp.f32 %v3335_v15 }
0x1b0b   :  { %p4582_p11 = por %p4581_p10, %p4580_p9 }
0x1b0d   :  { %p4583_p12 = pnand %p4582_p11, %p4576_p8 }
0x1b14   :  { %v4550_v53 = vpop.eup %4549 }
0x1b15   :  { %v3337_v23 = vmul.f32 %v4550_v53, %v3323_v46 }
0x1b3a   :  { %s4101_s23 = spop %4100 }
0x1b3b   :  { %s4103_s24 = spop %4102  ;;  %v3393_v49 = vstv %s4101_s23 }
0x1b3c   :  { %v3404_v27 = vstv %s4103_s24 }
0x1b3d   :  { %v3405_v50 = vmax.f32 %v3404_v27, 1.0 }
0x1b3f   :  { %4551 = vrcp.f32 %v3405_v50 }
0x1b49   :  { %v4552_v1 = vpop.eup %4551 }
0x1b4a   :  { %v3407_v14 = vmul.f32 %v4552_v1, %v3393_v49 }
0x1b4c   :  { %v3408_v61 = vadd.f32 %v3407_v14, %v3337_v23 }
0x1b4e   :  { %v3410_v0 = vmul.f32 0.5, %v3408_v61 }
0x1b50   :  { %3412 = vst.msk [vmem:[#allocation2] sm:$0x1] %vm3411_vm13, %v3410_v0 }
0x1b51   :  { %4586 = shalt.err (!%p4583_p12)
}
0x1b52   :  { %s4587_s8 = scalar_lea.hbm %s5612_s13, 16 }
0x1b53   :  { %p4588_p13 = scmp.ne.s32.totalorder %s5612_s13, %s4587_s8  ;;  %p4591_p0 = scmp.lt.u32.totalorder %s4587_s8, %s5612_s13 }
0x1b55   :  { %p4593_p1 = pnand %p4591_p0, %p4588_p13 }
0x1b57   :  { %4596 = shalt.err (!%p4593_p1)
}
0x1b58   :  { %3422 = dma.vmem_to_hbm [thread:$0]  %s3420_s25, 16, %s5612_s13, [#allocation3]  }
0x1b59   :  { %4597 = dma.done.wait [#allocation3], 16  }
0x1b5a   :  { %4598 = vsyncadd [#allocation3], 4294967280 }
0x1b5b   :  { %4599 = dma.done.wait [#allocation5], 256  }
0x1b5c   :  { %4600 = vsyncadd [#allocation5], 4294967040 }
0x1b5d   :  { %3441 = vsyncpa [#allocation3], 1 }
0x1b5e   :  { %3442 = vsyncpa [#allocation5], 1 }

</bundles_post_ra>
